<compile_context>
chip_gen: v5e
topology: v5e:2x2
jax: 0.10.0
libtpu: 0.0.40
codegen_flags: <defaults>
</compile_context>

<pallas_src>
import functools
import math

import jax
import jax.numpy as jnp
from jax.experimental import pallas as pl
from jax.experimental.pallas import tpu as pltpu

EPS = 1e-6
N_HEADS = 4


# ----------------------------------------------------------------------------
# In-kernel helper
# ----------------------------------------------------------------------------
def _vn_lrelu_cm(p, d, ns, n):
    """VN LeakyReLU in coordinate-major layout.

    p, d: [3*n, F]; rows [c*n:(c+1)*n] hold coordinate c of the same n samples.
    out = ns*p + (1-ns)*(p if <p,d> >= 0 else p - (<p,d>/|d|^2) d)
        = p - (1-ns) * min(<p,d>, 0) / |d|^2 * d
    """
    p0, p1, p2 = p[0:n], p[n:2 * n], p[2 * n:3 * n]
    d0, d1, d2 = d[0:n], d[n:2 * n], d[2 * n:3 * n]
    dot = p0 * d0 + p1 * d1 + p2 * d2
    dsq = d0 * d0 + d1 * d1 + d2 * d2 + EPS
    cc = (1.0 - ns) * jnp.minimum(dot, 0.0) * pl.reciprocal(dsq, approx=True)
    return jnp.concatenate([p0 - cc * d0, p1 - cc * d1, p2 - cc * d2], axis=0)


# ----------------------------------------------------------------------------
# The single fused Pallas kernel (whole forward pass)
# ----------------------------------------------------------------------------
def _vn_forward_kernel(
        x_ref, fc1u_ref,
        e1_ref, e1w2_ref, e2_ref, e2w2_ref,
        awau_ref, ctx_ref,
        s1_ref, s2_ref, sw3_ref,
        fc2w_ref, fc2b_ref, fow_ref, fob_ref,
        out_ref, *, B, T, D, dff, n_heads):
    f32 = jnp.float32
    n = B * T                      # rows per coordinate block
    dh = D // n_heads

    # ---- stem: fc1 (VNLinear) + vn_act (VNLeakyReLU, slope 0.0), pre-composed
    pd = jnp.dot(x_ref[...], fc1u_ref[...], preferred_element_type=f32)   # [3n,2D]
    x2 = _vn_lrelu_cm(pd[:, :D], pd[:, D:], 0.0, n)                       # [3n, D]

    # ---- VN transformer encoder layers (MHSA + VN FFN, residuals) ----
    # TODO(synk): exact VNEncoderLayer source (VN layer-norm variant/placement)
    # was not provided; the canonical VN block (MHSA + VN FFN, residuals) of
    # the previously verified port is kept.
    def enc_layer(x2, w_ref, w2_ref):
        wqkv = w_ref[:, 0:3 * D]                    # Wq (pre-scaled) | Wk | Wv
        wo = w_ref[:, 3 * D:4 * D]
        w1u = w_ref[:, 4 * D:4 * D + 2 * dff]       # [W1 | W1@U1]

        qkv = jnp.dot(x2, wqkv, preferred_element_type=f32)               # [3n,3D]
        qkv_r = qkv.reshape(3 * B, T, 3 * D)
        qkv_c = (qkv_r[0:B], qkv_r[B:2 * B], qkv_r[2 * B:3 * B])

        def cat_c(base):
            # coordinate-in-lane per-head slab: [B, T, 3*dh], lanes = (coord, d)
            return jnp.concatenate(
                [blk[:, :, base:base + dh] for blk in qkv_c], axis=-1)

        heads = ([], [], [])
        for h in range(n_heads):
            lo = h * dh
            qh = cat_c(lo)                                                # [B,T,3dh]
            kh = cat_c(D + lo)
            vh = cat_c(2 * D + lo)
            # Frobenius score over (coordinate, head-dim) = one K=3*dh einsum
            s = jnp.einsum('bqe,bke->bqk', qh, kh, preferred_element_type=f32)
            s = s - jnp.max(s, axis=-1, keepdims=True)
            e = jnp.exp(s)
            a = e * pl.reciprocal(jnp.sum(e, axis=-1, keepdims=True), approx=True)
            oh = jnp.einsum('bqk,bke->bqe', a, vh, preferred_element_type=f32)
            for c in range(3):
                heads[c].append(oh[:, :, c * dh:(c + 1) * dh])
        # assemble [3B, T, D] (rows (c,b), lanes (h,d)) -> single Wo matmul
        o_full = jnp.concatenate(
            [jnp.concatenate(heads[c], axis=-1) for c in range(3)], axis=0)
        x2 = x2 + jnp.dot(o_full.reshape(3 * n, D), wo,
                          preferred_element_type=f32)

        # VN feed-forward, p->d pre-composed: one [3n, 2*dff] matmul
        pdf = jnp.dot(x2, w1u, preferred_element_type=f32)
        hf = _vn_lrelu_cm(pdf[:, :dff], pdf[:, dff:], 0.2, n)
        return x2 + jnp.dot(hf, w2_ref[...], preferred_element_type=f32)

    x2 = enc_layer(x2, e1_ref, e1w2_ref)
    x2 = enc_layer(x2, e2_ref, e2w2_ref)

    # ---- VNAttentionWithContext pooling over time (vectorized over batch) ----
    pda = jnp.dot(x2, awau_ref[...], preferred_element_type=f32)          # [3n,2D]
    uit = _vn_lrelu_cm(pda[:, :D], pda[:, D:], 0.2, n)                    # [3n, D]
    prod = uit * ctx_ref[...]                                             # [3n, D]
    prod_c = prod[0:n] + prod[n:2 * n] + prod[2 * n:3 * n]                # [n, D]
    scores = jnp.sum(prod_c.reshape(B, T, D), axis=-1)                    # [B, T]
    scores = scores - jnp.max(scores, axis=-1, keepdims=True)
    ea = jnp.exp(scores)
    a = ea * pl.reciprocal(jnp.sum(ea, axis=-1, keepdims=True), approx=True)
    a1 = a.reshape(B, 1, T)
    a3 = jnp.concatenate([a1, a1, a1], axis=0)                            # [3B,1,T]
    pooled = jnp.einsum('xqt,xtd->xqd', a3, x2.reshape(3 * B, T, D),
                        preferred_element_type=f32).reshape(3 * B, D)     # [3B, D]

    # ---- mean over features + concat -> [3B, 2D] ----
    # TODO(synk): mean is taken over the D feature lanes per coordinate, same
    # interpretation as the previously verified port of x.mean(dim=-1)/cat(dim=2).
    pm = jnp.mean(pooled, axis=-1, keepdims=True)
    xb = jnp.concatenate([pooled, jnp.broadcast_to(pm, pooled.shape)], axis=-1)

    # ---- VNStdFeature (vectorized over batch, coordinate-major, n = B) ----
    # TODO(synk): VNBatchNorm inside the reference VNLinearLeakyReLU layers is
    # omitted (eval mode with default running stats ~ identity).
    pd1 = jnp.dot(xb, s1_ref[...], preferred_element_type=f32)            # [3B,2D]
    z1 = _vn_lrelu_cm(pd1[:, :D], pd1[:, D:], 0.2, B)                     # [3B, D]
    pd2 = jnp.dot(z1, s2_ref[...], preferred_element_type=f32)            # [3B, D]
    z2 = _vn_lrelu_cm(pd2[:, :D // 2], pd2[:, D // 2:], 0.2, B)           # [3B,D/2]
    z0 = jnp.dot(z2, sw3_ref[...], preferred_element_type=f32)            # [3B, 3]

    # ---- frame projection + fc2 + ReLU + fc_out, one matmul each ----
    # flat[b, f*3+k] = sum_c xb[c,b,f] * z0[c,b,k]; lanes built in (k,f) order,
    # fc2 rows permuted to match wrapper-side.
    sks = []
    for k in range(3):
        mk = z0[:, k:k + 1] * xb                                          # [3B,2D]
        sks.append(mk[0:B] + mk[B:2 * B] + mk[2 * B:3 * B])               # [B, 2D]
    s_all = jnp.concatenate(sks, axis=-1)                                 # [B, 6D]
    hid = jnp.dot(s_all, fc2w_ref[...], preferred_element_type=f32) + fc2b_ref[...]
    hid = jnp.maximum(hid, 0.0)        # ReLU; dropout = identity at inference
    out_ref[...] = (jnp.dot(hid, fow_ref[...], preferred_element_type=f32)
                    + fob_ref[...])                                       # [B,ncls]


# ----------------------------------------------------------------------------
# Wrapper: layout plumbing + weight pre-composition + the single pallas_call
# ----------------------------------------------------------------------------
def vn_baseline_attn_forward(x, params):
    """x: [B, 1, T, C] (NCHW-like, C % 3 == 0) -> logits [B, nb_classes]."""
    B, _, T, C = x.shape
    cin = C // 3
    D = params["fc1_w"].shape[1]
    dff = params["enc1"]["w1"].shape[1]
    ncls = params["fco_w"].shape[1]
    n = B * T
    assert D % N_HEADS == 0
    scale = 1.0 / math.sqrt(3 * (D // N_HEADS))

    # vn_c_reshape: group consecutive channel triples into 3-vectors; lay the
    # activation out coordinate-major: row = (coord, b, t), lanes = VN features.
    # TODO(synk): assumes channel triples are consecutive in C (same assumption
    # as the previously verified port of vn_c_reshape).
    xr = x.reshape(B, T, cin, 3)
    x2 = jnp.transpose(xr, (3, 0, 1, 2)).reshape(3 * B * T, cin)

    def compose(w, u):
        # p = a@w ; d = p@u  ->  one wide matmul against [w | w@u]
        return jnp.concatenate([w, jnp.dot(w, u)], axis=1)

    fc1u = compose(params["fc1_w"], params["act_u"])

    def enc_buf(p):
        # fused per-layer buffer: [Wq*scale | Wk | Wv | Wo | W1 | W1@U1]
        wqkv = jnp.concatenate([p["wq"] * scale, p["wk"], p["wv"]], axis=1)
        return jnp.concatenate([wqkv, p["wo"], compose(p["w1"], p["u1"])], axis=1)

    awau = compose(params["attn_ctx"]["w"], params["attn_ctx"]["u_dir"])
    ctx_full = jnp.broadcast_to(params["attn_ctx"]["ctx"].reshape(3, 1, D),
                                (3, n, D)).reshape(3 * n, D)
    s1c = compose(params["std"]["w1"], params["std"]["u1"])
    s2c = compose(params["std"]["w2"], params["std"]["u2"])
    H2 = params["fc2_w"].shape[1]
    # reference flatten order is (feature f, frame axis k) = f*3 + k; the
    # kernel builds lanes in (k, f) order, so permute fc2 rows accordingly.
    w2perm = params["fc2_w"].reshape(2 * D, 3, H2).transpose(1, 0, 2).reshape(
        6 * D, H2)

    kern = functools.partial(_vn_forward_kernel, B=B, T=T, D=D, dff=dff,
                             n_heads=N_HEADS)
    return pl.pallas_call(
        kern,
        out_shape=jax.ShapeDtypeStruct((B, ncls), jnp.float32),
        compiler_params=pltpu.CompilerParams(vmem_limit_bytes=4 * 1024 * 1024),
    )(x2, fc1u,
      enc_buf(params["enc1"]), params["enc1"]["w2"],
      enc_buf(params["enc2"]), params["enc2"]["w2"],
      awau, ctx_full,
      s1c, s2c, params["std"]["w3"],
      w2perm, params["fc2_b"], params["fco_w"], params["fco_b"])


# ----------------------------------------------------------------------------
# Deterministic parameter initialization (same structure/draws as before)
# ----------------------------------------------------------------------------
def init_params(key, cin, nb_units, nb_classes):
    D = nb_units // 3
    dff = 4 * D
    keys = iter(jax.random.split(key, 64))

    def lin(shape):
        return (1.0 / math.sqrt(shape[0])) * jax.random.normal(
            next(keys), shape, dtype=jnp.float32)

    def enc():
        return dict(wq=lin((D, D)), wk=lin((D, D)), wv=lin((D, D)), wo=lin((D, D)),
                    w1=lin((D, dff)), u1=lin((dff, dff)), w2=lin((dff, D)))

    return dict(
        fc1_w=lin((cin, D)),
        act_u=lin((D, D)),
        enc1=enc(),
        enc2=enc(),
        attn_ctx=dict(w=lin((D, D)), u_dir=lin((D, D)), ctx=lin((3, D))),
        std=dict(w1=lin((2 * D, D)), u1=lin((D, D)),
                 w2=lin((D, D // 2)), u2=lin((D // 2, D // 2)),
                 w3=lin((D // 2, 3))),
        fc2_w=lin((6 * D, 4 * nb_classes)),
        fc2_b=jnp.zeros((1, 4 * nb_classes), jnp.float32),
        fco_w=lin((4 * nb_classes, nb_classes)),
        fco_b=jnp.zeros((1, nb_classes), jnp.float32),
    )


# ----------------------------------------------------------------------------
if __name__ == "__main__":
    B, T, C = 2, 16, 12        # input = (B, 1, T, C)
    nb_classes = 6
    nb_units = 48              # -> VN channel width D = 16, 4 heads of d_head=4

    key = jax.random.PRNGKey(0)
    kx, kp = jax.random.split(key)
    x = jax.random.normal(kx, (B, 1, T, C), dtype=jnp.float32)
    params = init_params(kp, C // 3, nb_units, nb_classes)

    fwd = jax.jit(vn_baseline_attn_forward)
    out = fwd(x, params)
    out = jax.block_until_ready(out)
    assert out.shape == (B, nb_classes), out.shape
    assert bool(jnp.all(jnp.isfinite(out)))
    print("KERNEL_OK")
</pallas_src>

<mosaic_0001>
module attributes {stable_mosaic.version = 11 : i64} {
  func.func @_vn_forward_kernel(%arg0: memref<96x4xf32, #tpu.memory_space<vmem>>, %arg1: memref<4x32xf32, #tpu.memory_space<vmem>>, %arg2: memref<16x192xf32, #tpu.memory_space<vmem>>, %arg3: memref<64x16xf32, #tpu.memory_space<vmem>>, %arg4: memref<16x192xf32, #tpu.memory_space<vmem>>, %arg5: memref<64x16xf32, #tpu.memory_space<vmem>>, %arg6: memref<16x32xf32, #tpu.memory_space<vmem>>, %arg7: memref<96x16xf32, #tpu.memory_space<vmem>>, %arg8: memref<32x32xf32, #tpu.memory_space<vmem>>, %arg9: memref<16x16xf32, #tpu.memory_space<vmem>>, %arg10: memref<8x3xf32, #tpu.memory_space<vmem>>, %arg11: memref<96x24xf32, #tpu.memory_space<vmem>>, %arg12: memref<1x24xf32, #tpu.memory_space<vmem>>, %arg13: memref<24x6xf32, #tpu.memory_space<vmem>>, %arg14: memref<1x6xf32, #tpu.memory_space<vmem>>, %arg15: memref<2x6xf32, #tpu.memory_space<vmem>>) attributes {dimension_semantics = [], scalar_prefetch = 0 : i64, scratch_operands = 0 : i64, tpu.core_type = #tpu.core_type<tc>} {
    %c0 = arith.constant 0 : index
    %c0_0 = arith.constant 0 : index
    %0 = vector.load %arg0[%c0, %c0_0] : memref<96x4xf32, #tpu.memory_space<vmem>>, vector<96x4xf32>
    %c0_1 = arith.constant 0 : index
    %c0_2 = arith.constant 0 : index
    %1 = vector.load %arg1[%c0_1, %c0_2] : memref<4x32xf32, #tpu.memory_space<vmem>>, vector<4x32xf32>
    %cst = arith.constant dense<0.000000e+00> : vector<96x32xf32>
    %2 = tpu.matmul %0, %1, %cst {dimension_numbers = #tpu.dot_dimension_numbers<[1], [0], [0], [1], [0, 0, 1, 1], [], []>} : vector<96x4xf32>, vector<4x32xf32>, vector<96x32xf32> -> vector<96x32xf32>
    %3 = vector.extract_strided_slice %2 {offsets = [0, 0], sizes = [96, 16], strides = [1, 1]} : vector<96x32xf32> to vector<96x16xf32>
    %4 = vector.extract_strided_slice %2 {offsets = [0, 16], sizes = [96, 16], strides = [1, 1]} : vector<96x32xf32> to vector<96x16xf32>
    %5 = vector.extract_strided_slice %3 {offsets = [0, 0], sizes = [32, 16], strides = [1, 1]} : vector<96x16xf32> to vector<32x16xf32>
    %6 = vector.extract_strided_slice %3 {offsets = [32, 0], sizes = [32, 16], strides = [1, 1]} : vector<96x16xf32> to vector<32x16xf32>
    %7 = vector.extract_strided_slice %3 {offsets = [64, 0], sizes = [32, 16], strides = [1, 1]} : vector<96x16xf32> to vector<32x16xf32>
    %8 = vector.extract_strided_slice %4 {offsets = [0, 0], sizes = [32, 16], strides = [1, 1]} : vector<96x16xf32> to vector<32x16xf32>
    %9 = vector.extract_strided_slice %4 {offsets = [32, 0], sizes = [32, 16], strides = [1, 1]} : vector<96x16xf32> to vector<32x16xf32>
    %10 = vector.extract_strided_slice %4 {offsets = [64, 0], sizes = [32, 16], strides = [1, 1]} : vector<96x16xf32> to vector<32x16xf32>
    %11 = arith.mulf %5, %8 : vector<32x16xf32>
    %12 = arith.mulf %6, %9 : vector<32x16xf32>
    %13 = arith.addf %11, %12 : vector<32x16xf32>
    %14 = arith.mulf %7, %10 : vector<32x16xf32>
    %15 = arith.addf %13, %14 : vector<32x16xf32>
    %16 = arith.mulf %8, %8 : vector<32x16xf32>
    %17 = arith.mulf %9, %9 : vector<32x16xf32>
    %18 = arith.addf %16, %17 : vector<32x16xf32>
    %19 = arith.mulf %10, %10 : vector<32x16xf32>
    %20 = arith.addf %18, %19 : vector<32x16xf32>
    %cst_3 = arith.constant 9.99999997E-7 : f32
    %21 = vector.broadcast %cst_3 : f32 to vector<32x16xf32>
    %22 = arith.addf %20, %21 : vector<32x16xf32>
    %cst_4 = arith.constant 0.000000e+00 : f32
    %23 = vector.broadcast %cst_4 : f32 to vector<32x16xf32>
    %24 = arith.minimumf %15, %23 : vector<32x16xf32>
    %cst_5 = arith.constant 1.000000e+00 : f32
    %25 = vector.broadcast %cst_5 : f32 to vector<32x16xf32>
    %26 = arith.mulf %25, %24 : vector<32x16xf32>
    %27 = tpu.reciprocal %22 {approx = true} : vector<32x16xf32> -> vector<32x16xf32>
    %28 = arith.mulf %26, %27 : vector<32x16xf32>
    %29 = arith.mulf %28, %8 : vector<32x16xf32>
    %30 = arith.subf %5, %29 : vector<32x16xf32>
    %31 = arith.mulf %28, %9 : vector<32x16xf32>
    %32 = arith.subf %6, %31 : vector<32x16xf32>
    %33 = arith.mulf %28, %10 : vector<32x16xf32>
    %34 = arith.subf %7, %33 : vector<32x16xf32>
    %35 = tpu.concatenate %30, %32, %34 in 0 : vector<32x16xf32>, vector<32x16xf32>, vector<32x16xf32> -> vector<96x16xf32>
    %c0_6 = arith.constant 0 : index
    %c0_7 = arith.constant 0 : index
    %36 = vector.load %arg2[%c0_6, %c0_7] : memref<16x192xf32, #tpu.memory_space<vmem>>, vector<16x48xf32>
    %c0_8 = arith.constant 0 : index
    %c48 = arith.constant 48 : index
    %37 = vector.load %arg2[%c0_8, %c48] : memref<16x192xf32, #tpu.memory_space<vmem>>, vector<16x16xf32>
    %c0_9 = arith.constant 0 : index
    %c64 = arith.constant 64 : index
    %38 = vector.load %arg2[%c0_9, %c64] : memref<16x192xf32, #tpu.memory_space<vmem>>, vector<16x128xf32>
    %cst_10 = arith.constant dense<0.000000e+00> : vector<96x48xf32>
    %39 = tpu.matmul %35, %36, %cst_10 {dimension_numbers = #tpu.dot_dimension_numbers<[1], [0], [0], [1], [0, 0, 1, 1], [], []>} : vector<96x16xf32>, vector<16x48xf32>, vector<96x48xf32> -> vector<96x48xf32>
    %40 = vector.shape_cast %39 : vector<96x48xf32> to vector<6x16x48xf32>
    %41 = vector.extract_strided_slice %40 {offsets = [0, 0, 0], sizes = [2, 16, 48], strides = [1, 1, 1]} : vector<6x16x48xf32> to vector<2x16x48xf32>
    %42 = vector.extract_strided_slice %40 {offsets = [2, 0, 0], sizes = [2, 16, 48], strides = [1, 1, 1]} : vector<6x16x48xf32> to vector<2x16x48xf32>
    %43 = vector.extract_strided_slice %40 {offsets = [4, 0, 0], sizes = [2, 16, 48], strides = [1, 1, 1]} : vector<6x16x48xf32> to vector<2x16x48xf32>
    %44 = vector.extract_strided_slice %41 {offsets = [0, 0, 0], sizes = [2, 16, 4], strides = [1, 1, 1]} : vector<2x16x48xf32> to vector<2x16x4xf32>
    %45 = vector.extract_strided_slice %42 {offsets = [0, 0, 0], sizes = [2, 16, 4], strides = [1, 1, 1]} : vector<2x16x48xf32> to vector<2x16x4xf32>
    %46 = vector.extract_strided_slice %43 {offsets = [0, 0, 0], sizes = [2, 16, 4], strides = [1, 1, 1]} : vector<2x16x48xf32> to vector<2x16x4xf32>
    %47 = tpu.concatenate %44, %45, %46 in 2 : vector<2x16x4xf32>, vector<2x16x4xf32>, vector<2x16x4xf32> -> vector<2x16x12xf32>
    %48 = vector.extract_strided_slice %41 {offsets = [0, 0, 16], sizes = [2, 16, 4], strides = [1, 1, 1]} : vector<2x16x48xf32> to vector<2x16x4xf32>
    %49 = vector.extract_strided_slice %42 {offsets = [0, 0, 16], sizes = [2, 16, 4], strides = [1, 1, 1]} : vector<2x16x48xf32> to vector<2x16x4xf32>
    %50 = vector.extract_strided_slice %43 {offsets = [0, 0, 16], sizes = [2, 16, 4], strides = [1, 1, 1]} : vector<2x16x48xf32> to vector<2x16x4xf32>
    %51 = tpu.concatenate %48, %49, %50 in 2 : vector<2x16x4xf32>, vector<2x16x4xf32>, vector<2x16x4xf32> -> vector<2x16x12xf32>
    %52 = vector.extract_strided_slice %41 {offsets = [0, 0, 32], sizes = [2, 16, 4], strides = [1, 1, 1]} : vector<2x16x48xf32> to vector<2x16x4xf32>
    %53 = vector.extract_strided_slice %42 {offsets = [0, 0, 32], sizes = [2, 16, 4], strides = [1, 1, 1]} : vector<2x16x48xf32> to vector<2x16x4xf32>
    %54 = vector.extract_strided_slice %43 {offsets = [0, 0, 32], sizes = [2, 16, 4], strides = [1, 1, 1]} : vector<2x16x48xf32> to vector<2x16x4xf32>
    %55 = tpu.concatenate %52, %53, %54 in 2 : vector<2x16x4xf32>, vector<2x16x4xf32>, vector<2x16x4xf32> -> vector<2x16x12xf32>
    "tpu.trace_start"() <{level = 10 : i32, message = "bqe,bke->bqk"}> : () -> ()
    %cst_11 = arith.constant dense<0.000000e+00> : vector<2x16x16xf32>
    %56 = tpu.matmul %47, %51, %cst_11 {dimension_numbers = #tpu.dot_dimension_numbers<[2], [2], [1], [1], [0, 0, 0, 1, 1, 1], [0], [0]>} : vector<2x16x12xf32>, vector<2x16x12xf32>, vector<2x16x16xf32> -> vector<2x16x16xf32>
    "tpu.trace_stop"() : () -> ()
    %cst_12 = arith.constant dense<0xFF800000> : vector<2x16xf32>
    %57 = vector.multi_reduction <maximumf>, %56, %cst_12 [2] : vector<2x16x16xf32> to vector<2x16xf32>
    %58 = vector.shape_cast %57 : vector<2x16xf32> to vector<2x16x1xf32>
    %59 = vector.broadcast %58 : vector<2x16x1xf32> to vector<2x16x16xf32>
    %60 = arith.subf %56, %59 : vector<2x16x16xf32>
    %61 = math.exp %60 : vector<2x16x16xf32>
    %cst_13 = arith.constant dense<0.000000e+00> : vector<2x16xf32>
    %62 = vector.multi_reduction <add>, %61, %cst_13 [2] : vector<2x16x16xf32> to vector<2x16xf32>
    %63 = vector.shape_cast %62 : vector<2x16xf32> to vector<2x16x1xf32>
    %64 = tpu.reciprocal %63 {approx = true} : vector<2x16x1xf32> -> vector<2x16x1xf32>
    %65 = vector.broadcast %64 : vector<2x16x1xf32> to vector<2x16x16xf32>
    %66 = arith.mulf %61, %65 : vector<2x16x16xf32>
    "tpu.trace_start"() <{level = 10 : i32, message = "bqk,bke->bqe"}> : () -> ()
    %cst_14 = arith.constant dense<0.000000e+00> : vector<2x16x12xf32>
    %67 = tpu.matmul %66, %55, %cst_14 {dimension_numbers = #tpu.dot_dimension_numbers<[2], [1], [1], [2], [0, 0, 0, 1, 1, 2], [0], [0]>} : vector<2x16x16xf32>, vector<2x16x12xf32>, vector<2x16x12xf32> -> vector<2x16x12xf32>
    "tpu.trace_stop"() : () -> ()
    %68 = vector.extract_strided_slice %67 {offsets = [0, 0, 0], sizes = [2, 16, 4], strides = [1, 1, 1]} : vector<2x16x12xf32> to vector<2x16x4xf32>
    %69 = vector.extract_strided_slice %67 {offsets = [0, 0, 4], sizes = [2, 16, 4], strides = [1, 1, 1]} : vector<2x16x12xf32> to vector<2x16x4xf32>
    %70 = vector.extract_strided_slice %67 {offsets = [0, 0, 8], sizes = [2, 16, 4], strides = [1, 1, 1]} : vector<2x16x12xf32> to vector<2x16x4xf32>
    %71 = vector.extract_strided_slice %41 {offsets = [0, 0, 4], sizes = [2, 16, 4], strides = [1, 1, 1]} : vector<2x16x48xf32> to vector<2x16x4xf32>
    %72 = vector.extract_strided_slice %42 {offsets = [0, 0, 4], sizes = [2, 16, 4], strides = [1, 1, 1]} : vector<2x16x48xf32> to vector<2x16x4xf32>
    %73 = vector.extract_strided_slice %43 {offsets = [0, 0, 4], sizes = [2, 16, 4], strides = [1, 1, 1]} : vector<2x16x48xf32> to vector<2x16x4xf32>
    %74 = tpu.concatenate %71, %72, %73 in 2 : vector<2x16x4xf32>, vector<2x16x4xf32>, vector<2x16x4xf32> -> vector<2x16x12xf32>
    %75 = vector.extract_strided_slice %41 {offsets = [0, 0, 20], sizes = [2, 16, 4], strides = [1, 1, 1]} : vector<2x16x48xf32> to vector<2x16x4xf32>
    %76 = vector.extract_strided_slice %42 {offsets = [0, 0, 20], sizes = [2, 16, 4], strides = [1, 1, 1]} : vector<2x16x48xf32> to vector<2x16x4xf32>
    %77 = vector.extract_strided_slice %43 {offsets = [0, 0, 20], sizes = [2, 16, 4], strides = [1, 1, 1]} : vector<2x16x48xf32> to vector<2x16x4xf32>
    %78 = tpu.concatenate %75, %76, %77 in 2 : vector<2x16x4xf32>, vector<2x16x4xf32>, vector<2x16x4xf32> -> vector<2x16x12xf32>
    %79 = vector.extract_strided_slice %41 {offsets = [0, 0, 36], sizes = [2, 16, 4], strides = [1, 1, 1]} : vector<2x16x48xf32> to vector<2x16x4xf32>
    %80 = vector.extract_strided_slice %42 {offsets = [0, 0, 36], sizes = [2, 16, 4], strides = [1, 1, 1]} : vector<2x16x48xf32> to vector<2x16x4xf32>
    %81 = vector.extract_strided_slice %43 {offsets = [0, 0, 36], sizes = [2, 16, 4], strides = [1, 1, 1]} : vector<2x16x48xf32> to vector<2x16x4xf32>
    %82 = tpu.concatenate %79, %80, %81 in 2 : vector<2x16x4xf32>, vector<2x16x4xf32>, vector<2x16x4xf32> -> vector<2x16x12xf32>
    "tpu.trace_start"() <{level = 10 : i32, message = "bqe,bke->bqk"}> : () -> ()
    %cst_15 = arith.constant dense<0.000000e+00> : vector<2x16x16xf32>
    %83 = tpu.matmul %74, %78, %cst_15 {dimension_numbers = #tpu.dot_dimension_numbers<[2], [2], [1], [1], [0, 0, 0, 1, 1, 1], [0], [0]>} : vector<2x16x12xf32>, vector<2x16x12xf32>, vector<2x16x16xf32> -> vector<2x16x16xf32>
    "tpu.trace_stop"() : () -> ()
    %cst_16 = arith.constant dense<0xFF800000> : vector<2x16xf32>
    %84 = vector.multi_reduction <maximumf>, %83, %cst_16 [2] : vector<2x16x16xf32> to vector<2x16xf32>
    %85 = vector.shape_cast %84 : vector<2x16xf32> to vector<2x16x1xf32>
    %86 = vector.broadcast %85 : vector<2x16x1xf32> to vector<2x16x16xf32>
    %87 = arith.subf %83, %86 : vector<2x16x16xf32>
    %88 = math.exp %87 : vector<2x16x16xf32>
    %cst_17 = arith.constant dense<0.000000e+00> : vector<2x16xf32>
    %89 = vector.multi_reduction <add>, %88, %cst_17 [2] : vector<2x16x16xf32> to vector<2x16xf32>
    %90 = vector.shape_cast %89 : vector<2x16xf32> to vector<2x16x1xf32>
    %91 = tpu.reciprocal %90 {approx = true} : vector<2x16x1xf32> -> vector<2x16x1xf32>
    %92 = vector.broadcast %91 : vector<2x16x1xf32> to vector<2x16x16xf32>
    %93 = arith.mulf %88, %92 : vector<2x16x16xf32>
    "tpu.trace_start"() <{level = 10 : i32, message = "bqk,bke->bqe"}> : () -> ()
    %cst_18 = arith.constant dense<0.000000e+00> : vector<2x16x12xf32>
    %94 = tpu.matmul %93, %82, %cst_18 {dimension_numbers = #tpu.dot_dimension_numbers<[2], [1], [1], [2], [0, 0, 0, 1, 1, 2], [0], [0]>} : vector<2x16x16xf32>, vector<2x16x12xf32>, vector<2x16x12xf32> -> vector<2x16x12xf32>
    "tpu.trace_stop"() : () -> ()
    %95 = vector.extract_strided_slice %94 {offsets = [0, 0, 0], sizes = [2, 16, 4], strides = [1, 1, 1]} : vector<2x16x12xf32> to vector<2x16x4xf32>
    %96 = vector.extract_strided_slice %94 {offsets = [0, 0, 4], sizes = [2, 16, 4], strides = [1, 1, 1]} : vector<2x16x12xf32> to vector<2x16x4xf32>
    %97 = vector.extract_strided_slice %94 {offsets = [0, 0, 8], sizes = [2, 16, 4], strides = [1, 1, 1]} : vector<2x16x12xf32> to vector<2x16x4xf32>
    %98 = vector.extract_strided_slice %41 {offsets = [0, 0, 8], sizes = [2, 16, 4], strides = [1, 1, 1]} : vector<2x16x48xf32> to vector<2x16x4xf32>
    %99 = vector.extract_strided_slice %42 {offsets = [0, 0, 8], sizes = [2, 16, 4], strides = [1, 1, 1]} : vector<2x16x48xf32> to vector<2x16x4xf32>
    %100 = vector.extract_strided_slice %43 {offsets = [0, 0, 8], sizes = [2, 16, 4], strides = [1, 1, 1]} : vector<2x16x48xf32> to vector<2x16x4xf32>
    %101 = tpu.concatenate %98, %99, %100 in 2 : vector<2x16x4xf32>, vector<2x16x4xf32>, vector<2x16x4xf32> -> vector<2x16x12xf32>
    %102 = vector.extract_strided_slice %41 {offsets = [0, 0, 24], sizes = [2, 16, 4], strides = [1, 1, 1]} : vector<2x16x48xf32> to vector<2x16x4xf32>
    %103 = vector.extract_strided_slice %42 {offsets = [0, 0, 24], sizes = [2, 16, 4], strides = [1, 1, 1]} : vector<2x16x48xf32> to vector<2x16x4xf32>
    %104 = vector.extract_strided_slice %43 {offsets = [0, 0, 24], sizes = [2, 16, 4], strides = [1, 1, 1]} : vector<2x16x48xf32> to vector<2x16x4xf32>
    %105 = tpu.concatenate %102, %103, %104 in 2 : vector<2x16x4xf32>, vector<2x16x4xf32>, vector<2x16x4xf32> -> vector<2x16x12xf32>
    %106 = vector.extract_strided_slice %41 {offsets = [0, 0, 40], sizes = [2, 16, 4], strides = [1, 1, 1]} : vector<2x16x48xf32> to vector<2x16x4xf32>
    %107 = vector.extract_strided_slice %42 {offsets = [0, 0, 40], sizes = [2, 16, 4], strides = [1, 1, 1]} : vector<2x16x48xf32> to vector<2x16x4xf32>
    %108 = vector.extract_strided_slice %43 {offsets = [0, 0, 40], sizes = [2, 16, 4], strides = [1, 1, 1]} : vector<2x16x48xf32> to vector<2x16x4xf32>
    %109 = tpu.concatenate %106, %107, %108 in 2 : vector<2x16x4xf32>, vector<2x16x4xf32>, vector<2x16x4xf32> -> vector<2x16x12xf32>
    "tpu.trace_start"() <{level = 10 : i32, message = "bqe,bke->bqk"}> : () -> ()
    %cst_19 = arith.constant dense<0.000000e+00> : vector<2x16x16xf32>
    %110 = tpu.matmul %101, %105, %cst_19 {dimension_numbers = #tpu.dot_dimension_numbers<[2], [2], [1], [1], [0, 0, 0, 1, 1, 1], [0], [0]>} : vector<2x16x12xf32>, vector<2x16x12xf32>, vector<2x16x16xf32> -> vector<2x16x16xf32>
    "tpu.trace_stop"() : () -> ()
    %cst_20 = arith.constant dense<0xFF800000> : vector<2x16xf32>
    %111 = vector.multi_reduction <maximumf>, %110, %cst_20 [2] : vector<2x16x16xf32> to vector<2x16xf32>
    %112 = vector.shape_cast %111 : vector<2x16xf32> to vector<2x16x1xf32>
    %113 = vector.broadcast %112 : vector<2x16x1xf32> to vector<2x16x16xf32>
    %114 = arith.subf %110, %113 : vector<2x16x16xf32>
    %115 = math.exp %114 : vector<2x16x16xf32>
    %cst_21 = arith.constant dense<0.000000e+00> : vector<2x16xf32>
    %116 = vector.multi_reduction <add>, %115, %cst_21 [2] : vector<2x16x16xf32> to vector<2x16xf32>
    %117 = vector.shape_cast %116 : vector<2x16xf32> to vector<2x16x1xf32>
    %118 = tpu.reciprocal %117 {approx = true} : vector<2x16x1xf32> -> vector<2x16x1xf32>
    %119 = vector.broadcast %118 : vector<2x16x1xf32> to vector<2x16x16xf32>
    %120 = arith.mulf %115, %119 : vector<2x16x16xf32>
    "tpu.trace_start"() <{level = 10 : i32, message = "bqk,bke->bqe"}> : () -> ()
    %cst_22 = arith.constant dense<0.000000e+00> : vector<2x16x12xf32>
    %121 = tpu.matmul %120, %109, %cst_22 {dimension_numbers = #tpu.dot_dimension_numbers<[2], [1], [1], [2], [0, 0, 0, 1, 1, 2], [0], [0]>} : vector<2x16x16xf32>, vector<2x16x12xf32>, vector<2x16x12xf32> -> vector<2x16x12xf32>
    "tpu.trace_stop"() : () -> ()
    %122 = vector.extract_strided_slice %121 {offsets = [0, 0, 0], sizes = [2, 16, 4], strides = [1, 1, 1]} : vector<2x16x12xf32> to vector<2x16x4xf32>
    %123 = vector.extract_strided_slice %121 {offsets = [0, 0, 4], sizes = [2, 16, 4], strides = [1, 1, 1]} : vector<2x16x12xf32> to vector<2x16x4xf32>
    %124 = vector.extract_strided_slice %121 {offsets = [0, 0, 8], sizes = [2, 16, 4], strides = [1, 1, 1]} : vector<2x16x12xf32> to vector<2x16x4xf32>
    %125 = vector.extract_strided_slice %41 {offsets = [0, 0, 12], sizes = [2, 16, 4], strides = [1, 1, 1]} : vector<2x16x48xf32> to vector<2x16x4xf32>
    %126 = vector.extract_strided_slice %42 {offsets = [0, 0, 12], sizes = [2, 16, 4], strides = [1, 1, 1]} : vector<2x16x48xf32> to vector<2x16x4xf32>
    %127 = vector.extract_strided_slice %43 {offsets = [0, 0, 12], sizes = [2, 16, 4], strides = [1, 1, 1]} : vector<2x16x48xf32> to vector<2x16x4xf32>
    %128 = tpu.concatenate %125, %126, %127 in 2 : vector<2x16x4xf32>, vector<2x16x4xf32>, vector<2x16x4xf32> -> vector<2x16x12xf32>
    %129 = vector.extract_strided_slice %41 {offsets = [0, 0, 28], sizes = [2, 16, 4], strides = [1, 1, 1]} : vector<2x16x48xf32> to vector<2x16x4xf32>
    %130 = vector.extract_strided_slice %42 {offsets = [0, 0, 28], sizes = [2, 16, 4], strides = [1, 1, 1]} : vector<2x16x48xf32> to vector<2x16x4xf32>
    %131 = vector.extract_strided_slice %43 {offsets = [0, 0, 28], sizes = [2, 16, 4], strides = [1, 1, 1]} : vector<2x16x48xf32> to vector<2x16x4xf32>
    %132 = tpu.concatenate %129, %130, %131 in 2 : vector<2x16x4xf32>, vector<2x16x4xf32>, vector<2x16x4xf32> -> vector<2x16x12xf32>
    %133 = vector.extract_strided_slice %41 {offsets = [0, 0, 44], sizes = [2, 16, 4], strides = [1, 1, 1]} : vector<2x16x48xf32> to vector<2x16x4xf32>
    %134 = vector.extract_strided_slice %42 {offsets = [0, 0, 44], sizes = [2, 16, 4], strides = [1, 1, 1]} : vector<2x16x48xf32> to vector<2x16x4xf32>
    %135 = vector.extract_strided_slice %43 {offsets = [0, 0, 44], sizes = [2, 16, 4], strides = [1, 1, 1]} : vector<2x16x48xf32> to vector<2x16x4xf32>
    %136 = tpu.concatenate %133, %134, %135 in 2 : vector<2x16x4xf32>, vector<2x16x4xf32>, vector<2x16x4xf32> -> vector<2x16x12xf32>
    "tpu.trace_start"() <{level = 10 : i32, message = "bqe,bke->bqk"}> : () -> ()
    %cst_23 = arith.constant dense<0.000000e+00> : vector<2x16x16xf32>
    %137 = tpu.matmul %128, %132, %cst_23 {dimension_numbers = #tpu.dot_dimension_numbers<[2], [2], [1], [1], [0, 0, 0, 1, 1, 1], [0], [0]>} : vector<2x16x12xf32>, vector<2x16x12xf32>, vector<2x16x16xf32> -> vector<2x16x16xf32>
    "tpu.trace_stop"() : () -> ()
    %cst_24 = arith.constant dense<0xFF800000> : vector<2x16xf32>
    %138 = vector.multi_reduction <maximumf>, %137, %cst_24 [2] : vector<2x16x16xf32> to vector<2x16xf32>
    %139 = vector.shape_cast %138 : vector<2x16xf32> to vector<2x16x1xf32>
    %140 = vector.broadcast %139 : vector<2x16x1xf32> to vector<2x16x16xf32>
    %141 = arith.subf %137, %140 : vector<2x16x16xf32>
    %142 = math.exp %141 : vector<2x16x16xf32>
    %cst_25 = arith.constant dense<0.000000e+00> : vector<2x16xf32>
    %143 = vector.multi_reduction <add>, %142, %cst_25 [2] : vector<2x16x16xf32> to vector<2x16xf32>
    %144 = vector.shape_cast %143 : vector<2x16xf32> to vector<2x16x1xf32>
    %145 = tpu.reciprocal %144 {approx = true} : vector<2x16x1xf32> -> vector<2x16x1xf32>
    %146 = vector.broadcast %145 : vector<2x16x1xf32> to vector<2x16x16xf32>
    %147 = arith.mulf %142, %146 : vector<2x16x16xf32>
    "tpu.trace_start"() <{level = 10 : i32, message = "bqk,bke->bqe"}> : () -> ()
    %cst_26 = arith.constant dense<0.000000e+00> : vector<2x16x12xf32>
    %148 = tpu.matmul %147, %136, %cst_26 {dimension_numbers = #tpu.dot_dimension_numbers<[2], [1], [1], [2], [0, 0, 0, 1, 1, 2], [0], [0]>} : vector<2x16x16xf32>, vector<2x16x12xf32>, vector<2x16x12xf32> -> vector<2x16x12xf32>
    "tpu.trace_stop"() : () -> ()
    %149 = vector.extract_strided_slice %148 {offsets = [0, 0, 0], sizes = [2, 16, 4], strides = [1, 1, 1]} : vector<2x16x12xf32> to vector<2x16x4xf32>
    %150 = vector.extract_strided_slice %148 {offsets = [0, 0, 4], sizes = [2, 16, 4], strides = [1, 1, 1]} : vector<2x16x12xf32> to vector<2x16x4xf32>
    %151 = vector.extract_strided_slice %148 {offsets = [0, 0, 8], sizes = [2, 16, 4], strides = [1, 1, 1]} : vector<2x16x12xf32> to vector<2x16x4xf32>
    %152 = tpu.concatenate %68, %95, %122, %149 in 2 : vector<2x16x4xf32>, vector<2x16x4xf32>, vector<2x16x4xf32>, vector<2x16x4xf32> -> vector<2x16x16xf32>
    %153 = tpu.concatenate %69, %96, %123, %150 in 2 : vector<2x16x4xf32>, vector<2x16x4xf32>, vector<2x16x4xf32>, vector<2x16x4xf32> -> vector<2x16x16xf32>
    %154 = tpu.concatenate %70, %97, %124, %151 in 2 : vector<2x16x4xf32>, vector<2x16x4xf32>, vector<2x16x4xf32>, vector<2x16x4xf32> -> vector<2x16x16xf32>
    %155 = tpu.concatenate %152, %153, %154 in 0 : vector<2x16x16xf32>, vector<2x16x16xf32>, vector<2x16x16xf32> -> vector<6x16x16xf32>
    %156 = vector.shape_cast %155 : vector<6x16x16xf32> to vector<96x16xf32>
    %cst_27 = arith.constant dense<0.000000e+00> : vector<96x16xf32>
    %157 = tpu.matmul %156, %37, %cst_27 {dimension_numbers = #tpu.dot_dimension_numbers<[1], [0], [0], [1], [0, 0, 1, 1], [], []>} : vector<96x16xf32>, vector<16x16xf32>, vector<96x16xf32> -> vector<96x16xf32>
    %158 = arith.addf %35, %157 : vector<96x16xf32>
    %cst_28 = arith.constant dense<0.000000e+00> : vector<96x128xf32>
    %159 = tpu.matmul %158, %38, %cst_28 {dimension_numbers = #tpu.dot_dimension_numbers<[1], [0], [0], [1], [0, 0, 1, 1], [], []>} : vector<96x16xf32>, vector<16x128xf32>, vector<96x128xf32> -> vector<96x128xf32>
    %160 = vector.extract_strided_slice %159 {offsets = [0, 0], sizes = [96, 64], strides = [1, 1]} : vector<96x128xf32> to vector<96x64xf32>
    %161 = vector.extract_strided_slice %159 {offsets = [0, 64], sizes = [96, 64], strides = [1, 1]} : vector<96x128xf32> to vector<96x64xf32>
    %162 = vector.extract_strided_slice %160 {offsets = [0, 0], sizes = [32, 64], strides = [1, 1]} : vector<96x64xf32> to vector<32x64xf32>
    %163 = vector.extract_strided_slice %160 {offsets = [32, 0], sizes = [32, 64], strides = [1, 1]} : vector<96x64xf32> to vector<32x64xf32>
    %164 = vector.extract_strided_slice %160 {offsets = [64, 0], sizes = [32, 64], strides = [1, 1]} : vector<96x64xf32> to vector<32x64xf32>
    %165 = vector.extract_strided_slice %161 {offsets = [0, 0], sizes = [32, 64], strides = [1, 1]} : vector<96x64xf32> to vector<32x64xf32>
    %166 = vector.extract_strided_slice %161 {offsets = [32, 0], sizes = [32, 64], strides = [1, 1]} : vector<96x64xf32> to vector<32x64xf32>
    %167 = vector.extract_strided_slice %161 {offsets = [64, 0], sizes = [32, 64], strides = [1, 1]} : vector<96x64xf32> to vector<32x64xf32>
    %168 = arith.mulf %162, %165 : vector<32x64xf32>
    %169 = arith.mulf %163, %166 : vector<32x64xf32>
    %170 = arith.addf %168, %169 : vector<32x64xf32>
    %171 = arith.mulf %164, %167 : vector<32x64xf32>
    %172 = arith.addf %170, %171 : vector<32x64xf32>
    %173 = arith.mulf %165, %165 : vector<32x64xf32>
    %174 = arith.mulf %166, %166 : vector<32x64xf32>
    %175 = arith.addf %173, %174 : vector<32x64xf32>
    %176 = arith.mulf %167, %167 : vector<32x64xf32>
    %177 = arith.addf %175, %176 : vector<32x64xf32>
    %cst_29 = arith.constant 9.99999997E-7 : f32
    %178 = vector.broadcast %cst_29 : f32 to vector<32x64xf32>
    %179 = arith.addf %177, %178 : vector<32x64xf32>
    %cst_30 = arith.constant 0.000000e+00 : f32
    %180 = vector.broadcast %cst_30 : f32 to vector<32x64xf32>
    %181 = arith.minimumf %172, %180 : vector<32x64xf32>
    %cst_31 = arith.constant 8.000000e-01 : f32
    %182 = vector.broadcast %cst_31 : f32 to vector<32x64xf32>
    %183 = arith.mulf %182, %181 : vector<32x64xf32>
    %184 = tpu.reciprocal %179 {approx = true} : vector<32x64xf32> -> vector<32x64xf32>
    %185 = arith.mulf %183, %184 : vector<32x64xf32>
    %186 = arith.mulf %185, %165 : vector<32x64xf32>
    %187 = arith.subf %162, %186 : vector<32x64xf32>
    %188 = arith.mulf %185, %166 : vector<32x64xf32>
    %189 = arith.subf %163, %188 : vector<32x64xf32>
    %190 = arith.mulf %185, %167 : vector<32x64xf32>
    %191 = arith.subf %164, %190 : vector<32x64xf32>
    %192 = tpu.concatenate %187, %189, %191 in 0 : vector<32x64xf32>, vector<32x64xf32>, vector<32x64xf32> -> vector<96x64xf32>
    %c0_32 = arith.constant 0 : index
    %c0_33 = arith.constant 0 : index
    %193 = vector.load %arg3[%c0_32, %c0_33] : memref<64x16xf32, #tpu.memory_space<vmem>>, vector<64x16xf32>
    %cst_34 = arith.constant dense<0.000000e+00> : vector<96x16xf32>
    %194 = tpu.matmul %192, %193, %cst_34 {dimension_numbers = #tpu.dot_dimension_numbers<[1], [0], [0], [1], [0, 0, 1, 1], [], []>} : vector<96x64xf32>, vector<64x16xf32>, vector<96x16xf32> -> vector<96x16xf32>
    %195 = arith.addf %158, %194 : vector<96x16xf32>
    %c0_35 = arith.constant 0 : index
    %c0_36 = arith.constant 0 : index
    %196 = vector.load %arg4[%c0_35, %c0_36] : memref<16x192xf32, #tpu.memory_space<vmem>>, vector<16x48xf32>
    %c0_37 = arith.constant 0 : index
    %c48_38 = arith.constant 48 : index
    %197 = vector.load %arg4[%c0_37, %c48_38] : memref<16x192xf32, #tpu.memory_space<vmem>>, vector<16x16xf32>
    %c0_39 = arith.constant 0 : index
    %c64_40 = arith.constant 64 : index
    %198 = vector.load %arg4[%c0_39, %c64_40] : memref<16x192xf32, #tpu.memory_space<vmem>>, vector<16x128xf32>
    %cst_41 = arith.constant dense<0.000000e+00> : vector<96x48xf32>
    %199 = tpu.matmul %195, %196, %cst_41 {dimension_numbers = #tpu.dot_dimension_numbers<[1], [0], [0], [1], [0, 0, 1, 1], [], []>} : vector<96x16xf32>, vector<16x48xf32>, vector<96x48xf32> -> vector<96x48xf32>
    %200 = vector.shape_cast %199 : vector<96x48xf32> to vector<6x16x48xf32>
    %201 = vector.extract_strided_slice %200 {offsets = [0, 0, 0], sizes = [2, 16, 48], strides = [1, 1, 1]} : vector<6x16x48xf32> to vector<2x16x48xf32>
    %202 = vector.extract_strided_slice %200 {offsets = [2, 0, 0], sizes = [2, 16, 48], strides = [1, 1, 1]} : vector<6x16x48xf32> to vector<2x16x48xf32>
    %203 = vector.extract_strided_slice %200 {offsets = [4, 0, 0], sizes = [2, 16, 48], strides = [1, 1, 1]} : vector<6x16x48xf32> to vector<2x16x48xf32>
    %204 = vector.extract_strided_slice %201 {offsets = [0, 0, 0], sizes = [2, 16, 4], strides = [1, 1, 1]} : vector<2x16x48xf32> to vector<2x16x4xf32>
    %205 = vector.extract_strided_slice %202 {offsets = [0, 0, 0], sizes = [2, 16, 4], strides = [1, 1, 1]} : vector<2x16x48xf32> to vector<2x16x4xf32>
    %206 = vector.extract_strided_slice %203 {offsets = [0, 0, 0], sizes = [2, 16, 4], strides = [1, 1, 1]} : vector<2x16x48xf32> to vector<2x16x4xf32>
    %207 = tpu.concatenate %204, %205, %206 in 2 : vector<2x16x4xf32>, vector<2x16x4xf32>, vector<2x16x4xf32> -> vector<2x16x12xf32>
    %208 = vector.extract_strided_slice %201 {offsets = [0, 0, 16], sizes = [2, 16, 4], strides = [1, 1, 1]} : vector<2x16x48xf32> to vector<2x16x4xf32>
    %209 = vector.extract_strided_slice %202 {offsets = [0, 0, 16], sizes = [2, 16, 4], strides = [1, 1, 1]} : vector<2x16x48xf32> to vector<2x16x4xf32>
    %210 = vector.extract_strided_slice %203 {offsets = [0, 0, 16], sizes = [2, 16, 4], strides = [1, 1, 1]} : vector<2x16x48xf32> to vector<2x16x4xf32>
    %211 = tpu.concatenate %208, %209, %210 in 2 : vector<2x16x4xf32>, vector<2x16x4xf32>, vector<2x16x4xf32> -> vector<2x16x12xf32>
    %212 = vector.extract_strided_slice %201 {offsets = [0, 0, 32], sizes = [2, 16, 4], strides = [1, 1, 1]} : vector<2x16x48xf32> to vector<2x16x4xf32>
    %213 = vector.extract_strided_slice %202 {offsets = [0, 0, 32], sizes = [2, 16, 4], strides = [1, 1, 1]} : vector<2x16x48xf32> to vector<2x16x4xf32>
    %214 = vector.extract_strided_slice %203 {offsets = [0, 0, 32], sizes = [2, 16, 4], strides = [1, 1, 1]} : vector<2x16x48xf32> to vector<2x16x4xf32>
    %215 = tpu.concatenate %212, %213, %214 in 2 : vector<2x16x4xf32>, vector<2x16x4xf32>, vector<2x16x4xf32> -> vector<2x16x12xf32>
    "tpu.trace_start"() <{level = 10 : i32, message = "bqe,bke->bqk"}> : () -> ()
    %cst_42 = arith.constant dense<0.000000e+00> : vector<2x16x16xf32>
    %216 = tpu.matmul %207, %211, %cst_42 {dimension_numbers = #tpu.dot_dimension_numbers<[2], [2], [1], [1], [0, 0, 0, 1, 1, 1], [0], [0]>} : vector<2x16x12xf32>, vector<2x16x12xf32>, vector<2x16x16xf32> -> vector<2x16x16xf32>
    "tpu.trace_stop"() : () -> ()
    %cst_43 = arith.constant dense<0xFF800000> : vector<2x16xf32>
    %217 = vector.multi_reduction <maximumf>, %216, %cst_43 [2] : vector<2x16x16xf32> to vector<2x16xf32>
    %218 = vector.shape_cast %217 : vector<2x16xf32> to vector<2x16x1xf32>
    %219 = vector.broadcast %218 : vector<2x16x1xf32> to vector<2x16x16xf32>
    %220 = arith.subf %216, %219 : vector<2x16x16xf32>
    %221 = math.exp %220 : vector<2x16x16xf32>
    %cst_44 = arith.constant dense<0.000000e+00> : vector<2x16xf32>
    %222 = vector.multi_reduction <add>, %221, %cst_44 [2] : vector<2x16x16xf32> to vector<2x16xf32>
    %223 = vector.shape_cast %222 : vector<2x16xf32> to vector<2x16x1xf32>
    %224 = tpu.reciprocal %223 {approx = true} : vector<2x16x1xf32> -> vector<2x16x1xf32>
    %225 = vector.broadcast %224 : vector<2x16x1xf32> to vector<2x16x16xf32>
    %226 = arith.mulf %221, %225 : vector<2x16x16xf32>
    "tpu.trace_start"() <{level = 10 : i32, message = "bqk,bke->bqe"}> : () -> ()
    %cst_45 = arith.constant dense<0.000000e+00> : vector<2x16x12xf32>
    %227 = tpu.matmul %226, %215, %cst_45 {dimension_numbers = #tpu.dot_dimension_numbers<[2], [1], [1], [2], [0, 0, 0, 1, 1, 2], [0], [0]>} : vector<2x16x16xf32>, vector<2x16x12xf32>, vector<2x16x12xf32> -> vector<2x16x12xf32>
    "tpu.trace_stop"() : () -> ()
    %228 = vector.extract_strided_slice %227 {offsets = [0, 0, 0], sizes = [2, 16, 4], strides = [1, 1, 1]} : vector<2x16x12xf32> to vector<2x16x4xf32>
    %229 = vector.extract_strided_slice %227 {offsets = [0, 0, 4], sizes = [2, 16, 4], strides = [1, 1, 1]} : vector<2x16x12xf32> to vector<2x16x4xf32>
    %230 = vector.extract_strided_slice %227 {offsets = [0, 0, 8], sizes = [2, 16, 4], strides = [1, 1, 1]} : vector<2x16x12xf32> to vector<2x16x4xf32>
    %231 = vector.extract_strided_slice %201 {offsets = [0, 0, 4], sizes = [2, 16, 4], strides = [1, 1, 1]} : vector<2x16x48xf32> to vector<2x16x4xf32>
    %232 = vector.extract_strided_slice %202 {offsets = [0, 0, 4], sizes = [2, 16, 4], strides = [1, 1, 1]} : vector<2x16x48xf32> to vector<2x16x4xf32>
    %233 = vector.extract_strided_slice %203 {offsets = [0, 0, 4], sizes = [2, 16, 4], strides = [1, 1, 1]} : vector<2x16x48xf32> to vector<2x16x4xf32>
    %234 = tpu.concatenate %231, %232, %233 in 2 : vector<2x16x4xf32>, vector<2x16x4xf32>, vector<2x16x4xf32> -> vector<2x16x12xf32>
    %235 = vector.extract_strided_slice %201 {offsets = [0, 0, 20], sizes = [2, 16, 4], strides = [1, 1, 1]} : vector<2x16x48xf32> to vector<2x16x4xf32>
    %236 = vector.extract_strided_slice %202 {offsets = [0, 0, 20], sizes = [2, 16, 4], strides = [1, 1, 1]} : vector<2x16x48xf32> to vector<2x16x4xf32>
    %237 = vector.extract_strided_slice %203 {offsets = [0, 0, 20], sizes = [2, 16, 4], strides = [1, 1, 1]} : vector<2x16x48xf32> to vector<2x16x4xf32>
    %238 = tpu.concatenate %235, %236, %237 in 2 : vector<2x16x4xf32>, vector<2x16x4xf32>, vector<2x16x4xf32> -> vector<2x16x12xf32>
    %239 = vector.extract_strided_slice %201 {offsets = [0, 0, 36], sizes = [2, 16, 4], strides = [1, 1, 1]} : vector<2x16x48xf32> to vector<2x16x4xf32>
    %240 = vector.extract_strided_slice %202 {offsets = [0, 0, 36], sizes = [2, 16, 4], strides = [1, 1, 1]} : vector<2x16x48xf32> to vector<2x16x4xf32>
    %241 = vector.extract_strided_slice %203 {offsets = [0, 0, 36], sizes = [2, 16, 4], strides = [1, 1, 1]} : vector<2x16x48xf32> to vector<2x16x4xf32>
    %242 = tpu.concatenate %239, %240, %241 in 2 : vector<2x16x4xf32>, vector<2x16x4xf32>, vector<2x16x4xf32> -> vector<2x16x12xf32>
    "tpu.trace_start"() <{level = 10 : i32, message = "bqe,bke->bqk"}> : () -> ()
    %cst_46 = arith.constant dense<0.000000e+00> : vector<2x16x16xf32>
    %243 = tpu.matmul %234, %238, %cst_46 {dimension_numbers = #tpu.dot_dimension_numbers<[2], [2], [1], [1], [0, 0, 0, 1, 1, 1], [0], [0]>} : vector<2x16x12xf32>, vector<2x16x12xf32>, vector<2x16x16xf32> -> vector<2x16x16xf32>
    "tpu.trace_stop"() : () -> ()
    %cst_47 = arith.constant dense<0xFF800000> : vector<2x16xf32>
    %244 = vector.multi_reduction <maximumf>, %243, %cst_47 [2] : vector<2x16x16xf32> to vector<2x16xf32>
    %245 = vector.shape_cast %244 : vector<2x16xf32> to vector<2x16x1xf32>
    %246 = vector.broadcast %245 : vector<2x16x1xf32> to vector<2x16x16xf32>
    %247 = arith.subf %243, %246 : vector<2x16x16xf32>
    %248 = math.exp %247 : vector<2x16x16xf32>
    %cst_48 = arith.constant dense<0.000000e+00> : vector<2x16xf32>
    %249 = vector.multi_reduction <add>, %248, %cst_48 [2] : vector<2x16x16xf32> to vector<2x16xf32>
    %250 = vector.shape_cast %249 : vector<2x16xf32> to vector<2x16x1xf32>
    %251 = tpu.reciprocal %250 {approx = true} : vector<2x16x1xf32> -> vector<2x16x1xf32>
    %252 = vector.broadcast %251 : vector<2x16x1xf32> to vector<2x16x16xf32>
    %253 = arith.mulf %248, %252 : vector<2x16x16xf32>
    "tpu.trace_start"() <{level = 10 : i32, message = "bqk,bke->bqe"}> : () -> ()
    %cst_49 = arith.constant dense<0.000000e+00> : vector<2x16x12xf32>
    %254 = tpu.matmul %253, %242, %cst_49 {dimension_numbers = #tpu.dot_dimension_numbers<[2], [1], [1], [2], [0, 0, 0, 1, 1, 2], [0], [0]>} : vector<2x16x16xf32>, vector<2x16x12xf32>, vector<2x16x12xf32> -> vector<2x16x12xf32>
    "tpu.trace_stop"() : () -> ()
    %255 = vector.extract_strided_slice %254 {offsets = [0, 0, 0], sizes = [2, 16, 4], strides = [1, 1, 1]} : vector<2x16x12xf32> to vector<2x16x4xf32>
    %256 = vector.extract_strided_slice %254 {offsets = [0, 0, 4], sizes = [2, 16, 4], strides = [1, 1, 1]} : vector<2x16x12xf32> to vector<2x16x4xf32>
    %257 = vector.extract_strided_slice %254 {offsets = [0, 0, 8], sizes = [2, 16, 4], strides = [1, 1, 1]} : vector<2x16x12xf32> to vector<2x16x4xf32>
    %258 = vector.extract_strided_slice %201 {offsets = [0, 0, 8], sizes = [2, 16, 4], strides = [1, 1, 1]} : vector<2x16x48xf32> to vector<2x16x4xf32>
    %259 = vector.extract_strided_slice %202 {offsets = [0, 0, 8], sizes = [2, 16, 4], strides = [1, 1, 1]} : vector<2x16x48xf32> to vector<2x16x4xf32>
    %260 = vector.extract_strided_slice %203 {offsets = [0, 0, 8], sizes = [2, 16, 4], strides = [1, 1, 1]} : vector<2x16x48xf32> to vector<2x16x4xf32>
    %261 = tpu.concatenate %258, %259, %260 in 2 : vector<2x16x4xf32>, vector<2x16x4xf32>, vector<2x16x4xf32> -> vector<2x16x12xf32>
    %262 = vector.extract_strided_slice %201 {offsets = [0, 0, 24], sizes = [2, 16, 4], strides = [1, 1, 1]} : vector<2x16x48xf32> to vector<2x16x4xf32>
    %263 = vector.extract_strided_slice %202 {offsets = [0, 0, 24], sizes = [2, 16, 4], strides = [1, 1, 1]} : vector<2x16x48xf32> to vector<2x16x4xf32>
    %264 = vector.extract_strided_slice %203 {offsets = [0, 0, 24], sizes = [2, 16, 4], strides = [1, 1, 1]} : vector<2x16x48xf32> to vector<2x16x4xf32>
    %265 = tpu.concatenate %262, %263, %264 in 2 : vector<2x16x4xf32>, vector<2x16x4xf32>, vector<2x16x4xf32> -> vector<2x16x12xf32>
    %266 = vector.extract_strided_slice %201 {offsets = [0, 0, 40], sizes = [2, 16, 4], strides = [1, 1, 1]} : vector<2x16x48xf32> to vector<2x16x4xf32>
    %267 = vector.extract_strided_slice %202 {offsets = [0, 0, 40], sizes = [2, 16, 4], strides = [1, 1, 1]} : vector<2x16x48xf32> to vector<2x16x4xf32>
    %268 = vector.extract_strided_slice %203 {offsets = [0, 0, 40], sizes = [2, 16, 4], strides = [1, 1, 1]} : vector<2x16x48xf32> to vector<2x16x4xf32>
    %269 = tpu.concatenate %266, %267, %268 in 2 : vector<2x16x4xf32>, vector<2x16x4xf32>, vector<2x16x4xf32> -> vector<2x16x12xf32>
    "tpu.trace_start"() <{level = 10 : i32, message = "bqe,bke->bqk"}> : () -> ()
    %cst_50 = arith.constant dense<0.000000e+00> : vector<2x16x16xf32>
    %270 = tpu.matmul %261, %265, %cst_50 {dimension_numbers = #tpu.dot_dimension_numbers<[2], [2], [1], [1], [0, 0, 0, 1, 1, 1], [0], [0]>} : vector<2x16x12xf32>, vector<2x16x12xf32>, vector<2x16x16xf32> -> vector<2x16x16xf32>
    "tpu.trace_stop"() : () -> ()
    %cst_51 = arith.constant dense<0xFF800000> : vector<2x16xf32>
    %271 = vector.multi_reduction <maximumf>, %270, %cst_51 [2] : vector<2x16x16xf32> to vector<2x16xf32>
    %272 = vector.shape_cast %271 : vector<2x16xf32> to vector<2x16x1xf32>
    %273 = vector.broadcast %272 : vector<2x16x1xf32> to vector<2x16x16xf32>
    %274 = arith.subf %270, %273 : vector<2x16x16xf32>
    %275 = math.exp %274 : vector<2x16x16xf32>
    %cst_52 = arith.constant dense<0.000000e+00> : vector<2x16xf32>
    %276 = vector.multi_reduction <add>, %275, %cst_52 [2] : vector<2x16x16xf32> to vector<2x16xf32>
    %277 = vector.shape_cast %276 : vector<2x16xf32> to vector<2x16x1xf32>
    %278 = tpu.reciprocal %277 {approx = true} : vector<2x16x1xf32> -> vector<2x16x1xf32>
    %279 = vector.broadcast %278 : vector<2x16x1xf32> to vector<2x16x16xf32>
    %280 = arith.mulf %275, %279 : vector<2x16x16xf32>
    "tpu.trace_start"() <{level = 10 : i32, message = "bqk,bke->bqe"}> : () -> ()
    %cst_53 = arith.constant dense<0.000000e+00> : vector<2x16x12xf32>
    %281 = tpu.matmul %280, %269, %cst_53 {dimension_numbers = #tpu.dot_dimension_numbers<[2], [1], [1], [2], [0, 0, 0, 1, 1, 2], [0], [0]>} : vector<2x16x16xf32>, vector<2x16x12xf32>, vector<2x16x12xf32> -> vector<2x16x12xf32>
    "tpu.trace_stop"() : () -> ()
    %282 = vector.extract_strided_slice %281 {offsets = [0, 0, 0], sizes = [2, 16, 4], strides = [1, 1, 1]} : vector<2x16x12xf32> to vector<2x16x4xf32>
    %283 = vector.extract_strided_slice %281 {offsets = [0, 0, 4], sizes = [2, 16, 4], strides = [1, 1, 1]} : vector<2x16x12xf32> to vector<2x16x4xf32>
    %284 = vector.extract_strided_slice %281 {offsets = [0, 0, 8], sizes = [2, 16, 4], strides = [1, 1, 1]} : vector<2x16x12xf32> to vector<2x16x4xf32>
    %285 = vector.extract_strided_slice %201 {offsets = [0, 0, 12], sizes = [2, 16, 4], strides = [1, 1, 1]} : vector<2x16x48xf32> to vector<2x16x4xf32>
    %286 = vector.extract_strided_slice %202 {offsets = [0, 0, 12], sizes = [2, 16, 4], strides = [1, 1, 1]} : vector<2x16x48xf32> to vector<2x16x4xf32>
    %287 = vector.extract_strided_slice %203 {offsets = [0, 0, 12], sizes = [2, 16, 4], strides = [1, 1, 1]} : vector<2x16x48xf32> to vector<2x16x4xf32>
    %288 = tpu.concatenate %285, %286, %287 in 2 : vector<2x16x4xf32>, vector<2x16x4xf32>, vector<2x16x4xf32> -> vector<2x16x12xf32>
    %289 = vector.extract_strided_slice %201 {offsets = [0, 0, 28], sizes = [2, 16, 4], strides = [1, 1, 1]} : vector<2x16x48xf32> to vector<2x16x4xf32>
    %290 = vector.extract_strided_slice %202 {offsets = [0, 0, 28], sizes = [2, 16, 4], strides = [1, 1, 1]} : vector<2x16x48xf32> to vector<2x16x4xf32>
    %291 = vector.extract_strided_slice %203 {offsets = [0, 0, 28], sizes = [2, 16, 4], strides = [1, 1, 1]} : vector<2x16x48xf32> to vector<2x16x4xf32>
    %292 = tpu.concatenate %289, %290, %291 in 2 : vector<2x16x4xf32>, vector<2x16x4xf32>, vector<2x16x4xf32> -> vector<2x16x12xf32>
    %293 = vector.extract_strided_slice %201 {offsets = [0, 0, 44], sizes = [2, 16, 4], strides = [1, 1, 1]} : vector<2x16x48xf32> to vector<2x16x4xf32>
    %294 = vector.extract_strided_slice %202 {offsets = [0, 0, 44], sizes = [2, 16, 4], strides = [1, 1, 1]} : vector<2x16x48xf32> to vector<2x16x4xf32>
    %295 = vector.extract_strided_slice %203 {offsets = [0, 0, 44], sizes = [2, 16, 4], strides = [1, 1, 1]} : vector<2x16x48xf32> to vector<2x16x4xf32>
    %296 = tpu.concatenate %293, %294, %295 in 2 : vector<2x16x4xf32>, vector<2x16x4xf32>, vector<2x16x4xf32> -> vector<2x16x12xf32>
    "tpu.trace_start"() <{level = 10 : i32, message = "bqe,bke->bqk"}> : () -> ()
    %cst_54 = arith.constant dense<0.000000e+00> : vector<2x16x16xf32>
    %297 = tpu.matmul %288, %292, %cst_54 {dimension_numbers = #tpu.dot_dimension_numbers<[2], [2], [1], [1], [0, 0, 0, 1, 1, 1], [0], [0]>} : vector<2x16x12xf32>, vector<2x16x12xf32>, vector<2x16x16xf32> -> vector<2x16x16xf32>
    "tpu.trace_stop"() : () -> ()
    %cst_55 = arith.constant dense<0xFF800000> : vector<2x16xf32>
    %298 = vector.multi_reduction <maximumf>, %297, %cst_55 [2] : vector<2x16x16xf32> to vector<2x16xf32>
    %299 = vector.shape_cast %298 : vector<2x16xf32> to vector<2x16x1xf32>
    %300 = vector.broadcast %299 : vector<2x16x1xf32> to vector<2x16x16xf32>
    %301 = arith.subf %297, %300 : vector<2x16x16xf32>
    %302 = math.exp %301 : vector<2x16x16xf32>
    %cst_56 = arith.constant dense<0.000000e+00> : vector<2x16xf32>
    %303 = vector.multi_reduction <add>, %302, %cst_56 [2] : vector<2x16x16xf32> to vector<2x16xf32>
    %304 = vector.shape_cast %303 : vector<2x16xf32> to vector<2x16x1xf32>
    %305 = tpu.reciprocal %304 {approx = true} : vector<2x16x1xf32> -> vector<2x16x1xf32>
    %306 = vector.broadcast %305 : vector<2x16x1xf32> to vector<2x16x16xf32>
    %307 = arith.mulf %302, %306 : vector<2x16x16xf32>
    "tpu.trace_start"() <{level = 10 : i32, message = "bqk,bke->bqe"}> : () -> ()
    %cst_57 = arith.constant dense<0.000000e+00> : vector<2x16x12xf32>
    %308 = tpu.matmul %307, %296, %cst_57 {dimension_numbers = #tpu.dot_dimension_numbers<[2], [1], [1], [2], [0, 0, 0, 1, 1, 2], [0], [0]>} : vector<2x16x16xf32>, vector<2x16x12xf32>, vector<2x16x12xf32> -> vector<2x16x12xf32>
    "tpu.trace_stop"() : () -> ()
    %309 = vector.extract_strided_slice %308 {offsets = [0, 0, 0], sizes = [2, 16, 4], strides = [1, 1, 1]} : vector<2x16x12xf32> to vector<2x16x4xf32>
    %310 = vector.extract_strided_slice %308 {offsets = [0, 0, 4], sizes = [2, 16, 4], strides = [1, 1, 1]} : vector<2x16x12xf32> to vector<2x16x4xf32>
    %311 = vector.extract_strided_slice %308 {offsets = [0, 0, 8], sizes = [2, 16, 4], strides = [1, 1, 1]} : vector<2x16x12xf32> to vector<2x16x4xf32>
    %312 = tpu.concatenate %228, %255, %282, %309 in 2 : vector<2x16x4xf32>, vector<2x16x4xf32>, vector<2x16x4xf32>, vector<2x16x4xf32> -> vector<2x16x16xf32>
    %313 = tpu.concatenate %229, %256, %283, %310 in 2 : vector<2x16x4xf32>, vector<2x16x4xf32>, vector<2x16x4xf32>, vector<2x16x4xf32> -> vector<2x16x16xf32>
    %314 = tpu.concatenate %230, %257, %284, %311 in 2 : vector<2x16x4xf32>, vector<2x16x4xf32>, vector<2x16x4xf32>, vector<2x16x4xf32> -> vector<2x16x16xf32>
    %315 = tpu.concatenate %312, %313, %314 in 0 : vector<2x16x16xf32>, vector<2x16x16xf32>, vector<2x16x16xf32> -> vector<6x16x16xf32>
    %316 = vector.shape_cast %315 : vector<6x16x16xf32> to vector<96x16xf32>
    %cst_58 = arith.constant dense<0.000000e+00> : vector<96x16xf32>
    %317 = tpu.matmul %316, %197, %cst_58 {dimension_numbers = #tpu.dot_dimension_numbers<[1], [0], [0], [1], [0, 0, 1, 1], [], []>} : vector<96x16xf32>, vector<16x16xf32>, vector<96x16xf32> -> vector<96x16xf32>
    %318 = arith.addf %195, %317 : vector<96x16xf32>
    %cst_59 = arith.constant dense<0.000000e+00> : vector<96x128xf32>
    %319 = tpu.matmul %318, %198, %cst_59 {dimension_numbers = #tpu.dot_dimension_numbers<[1], [0], [0], [1], [0, 0, 1, 1], [], []>} : vector<96x16xf32>, vector<16x128xf32>, vector<96x128xf32> -> vector<96x128xf32>
    %320 = vector.extract_strided_slice %319 {offsets = [0, 0], sizes = [96, 64], strides = [1, 1]} : vector<96x128xf32> to vector<96x64xf32>
    %321 = vector.extract_strided_slice %319 {offsets = [0, 64], sizes = [96, 64], strides = [1, 1]} : vector<96x128xf32> to vector<96x64xf32>
    %322 = vector.extract_strided_slice %320 {offsets = [0, 0], sizes = [32, 64], strides = [1, 1]} : vector<96x64xf32> to vector<32x64xf32>
    %323 = vector.extract_strided_slice %320 {offsets = [32, 0], sizes = [32, 64], strides = [1, 1]} : vector<96x64xf32> to vector<32x64xf32>
    %324 = vector.extract_strided_slice %320 {offsets = [64, 0], sizes = [32, 64], strides = [1, 1]} : vector<96x64xf32> to vector<32x64xf32>
    %325 = vector.extract_strided_slice %321 {offsets = [0, 0], sizes = [32, 64], strides = [1, 1]} : vector<96x64xf32> to vector<32x64xf32>
    %326 = vector.extract_strided_slice %321 {offsets = [32, 0], sizes = [32, 64], strides = [1, 1]} : vector<96x64xf32> to vector<32x64xf32>
    %327 = vector.extract_strided_slice %321 {offsets = [64, 0], sizes = [32, 64], strides = [1, 1]} : vector<96x64xf32> to vector<32x64xf32>
    %328 = arith.mulf %322, %325 : vector<32x64xf32>
    %329 = arith.mulf %323, %326 : vector<32x64xf32>
    %330 = arith.addf %328, %329 : vector<32x64xf32>
    %331 = arith.mulf %324, %327 : vector<32x64xf32>
    %332 = arith.addf %330, %331 : vector<32x64xf32>
    %333 = arith.mulf %325, %325 : vector<32x64xf32>
    %334 = arith.mulf %326, %326 : vector<32x64xf32>
    %335 = arith.addf %333, %334 : vector<32x64xf32>
    %336 = arith.mulf %327, %327 : vector<32x64xf32>
    %337 = arith.addf %335, %336 : vector<32x64xf32>
    %cst_60 = arith.constant 9.99999997E-7 : f32
    %338 = vector.broadcast %cst_60 : f32 to vector<32x64xf32>
    %339 = arith.addf %337, %338 : vector<32x64xf32>
    %cst_61 = arith.constant 0.000000e+00 : f32
    %340 = vector.broadcast %cst_61 : f32 to vector<32x64xf32>
    %341 = arith.minimumf %332, %340 : vector<32x64xf32>
    %cst_62 = arith.constant 8.000000e-01 : f32
    %342 = vector.broadcast %cst_62 : f32 to vector<32x64xf32>
    %343 = arith.mulf %342, %341 : vector<32x64xf32>
    %344 = tpu.reciprocal %339 {approx = true} : vector<32x64xf32> -> vector<32x64xf32>
    %345 = arith.mulf %343, %344 : vector<32x64xf32>
    %346 = arith.mulf %345, %325 : vector<32x64xf32>
    %347 = arith.subf %322, %346 : vector<32x64xf32>
    %348 = arith.mulf %345, %326 : vector<32x64xf32>
    %349 = arith.subf %323, %348 : vector<32x64xf32>
    %350 = arith.mulf %345, %327 : vector<32x64xf32>
    %351 = arith.subf %324, %350 : vector<32x64xf32>
    %352 = tpu.concatenate %347, %349, %351 in 0 : vector<32x64xf32>, vector<32x64xf32>, vector<32x64xf32> -> vector<96x64xf32>
    %c0_63 = arith.constant 0 : index
    %c0_64 = arith.constant 0 : index
    %353 = vector.load %arg5[%c0_63, %c0_64] : memref<64x16xf32, #tpu.memory_space<vmem>>, vector<64x16xf32>
    %cst_65 = arith.constant dense<0.000000e+00> : vector<96x16xf32>
    %354 = tpu.matmul %352, %353, %cst_65 {dimension_numbers = #tpu.dot_dimension_numbers<[1], [0], [0], [1], [0, 0, 1, 1], [], []>} : vector<96x64xf32>, vector<64x16xf32>, vector<96x16xf32> -> vector<96x16xf32>
    %355 = arith.addf %318, %354 : vector<96x16xf32>
    %c0_66 = arith.constant 0 : index
    %c0_67 = arith.constant 0 : index
    %356 = vector.load %arg6[%c0_66, %c0_67] : memref<16x32xf32, #tpu.memory_space<vmem>>, vector<16x32xf32>
    %cst_68 = arith.constant dense<0.000000e+00> : vector<96x32xf32>
    %357 = tpu.matmul %355, %356, %cst_68 {dimension_numbers = #tpu.dot_dimension_numbers<[1], [0], [0], [1], [0, 0, 1, 1], [], []>} : vector<96x16xf32>, vector<16x32xf32>, vector<96x32xf32> -> vector<96x32xf32>
    %358 = vector.extract_strided_slice %357 {offsets = [0, 0], sizes = [96, 16], strides = [1, 1]} : vector<96x32xf32> to vector<96x16xf32>
    %359 = vector.extract_strided_slice %357 {offsets = [0, 16], sizes = [96, 16], strides = [1, 1]} : vector<96x32xf32> to vector<96x16xf32>
    %360 = vector.extract_strided_slice %358 {offsets = [0, 0], sizes = [32, 16], strides = [1, 1]} : vector<96x16xf32> to vector<32x16xf32>
    %361 = vector.extract_strided_slice %358 {offsets = [32, 0], sizes = [32, 16], strides = [1, 1]} : vector<96x16xf32> to vector<32x16xf32>
    %362 = vector.extract_strided_slice %358 {offsets = [64, 0], sizes = [32, 16], strides = [1, 1]} : vector<96x16xf32> to vector<32x16xf32>
    %363 = vector.extract_strided_slice %359 {offsets = [0, 0], sizes = [32, 16], strides = [1, 1]} : vector<96x16xf32> to vector<32x16xf32>
    %364 = vector.extract_strided_slice %359 {offsets = [32, 0], sizes = [32, 16], strides = [1, 1]} : vector<96x16xf32> to vector<32x16xf32>
    %365 = vector.extract_strided_slice %359 {offsets = [64, 0], sizes = [32, 16], strides = [1, 1]} : vector<96x16xf32> to vector<32x16xf32>
    %366 = arith.mulf %360, %363 : vector<32x16xf32>
    %367 = arith.mulf %361, %364 : vector<32x16xf32>
    %368 = arith.addf %366, %367 : vector<32x16xf32>
    %369 = arith.mulf %362, %365 : vector<32x16xf32>
    %370 = arith.addf %368, %369 : vector<32x16xf32>
    %371 = arith.mulf %363, %363 : vector<32x16xf32>
    %372 = arith.mulf %364, %364 : vector<32x16xf32>
    %373 = arith.addf %371, %372 : vector<32x16xf32>
    %374 = arith.mulf %365, %365 : vector<32x16xf32>
    %375 = arith.addf %373, %374 : vector<32x16xf32>
    %cst_69 = arith.constant 9.99999997E-7 : f32
    %376 = vector.broadcast %cst_69 : f32 to vector<32x16xf32>
    %377 = arith.addf %375, %376 : vector<32x16xf32>
    %cst_70 = arith.constant 0.000000e+00 : f32
    %378 = vector.broadcast %cst_70 : f32 to vector<32x16xf32>
    %379 = arith.minimumf %370, %378 : vector<32x16xf32>
    %cst_71 = arith.constant 8.000000e-01 : f32
    %380 = vector.broadcast %cst_71 : f32 to vector<32x16xf32>
    %381 = arith.mulf %380, %379 : vector<32x16xf32>
    %382 = tpu.reciprocal %377 {approx = true} : vector<32x16xf32> -> vector<32x16xf32>
    %383 = arith.mulf %381, %382 : vector<32x16xf32>
    %384 = arith.mulf %383, %363 : vector<32x16xf32>
    %385 = arith.subf %360, %384 : vector<32x16xf32>
    %386 = arith.mulf %383, %364 : vector<32x16xf32>
    %387 = arith.subf %361, %386 : vector<32x16xf32>
    %388 = arith.mulf %383, %365 : vector<32x16xf32>
    %389 = arith.subf %362, %388 : vector<32x16xf32>
    %390 = tpu.concatenate %385, %387, %389 in 0 : vector<32x16xf32>, vector<32x16xf32>, vector<32x16xf32> -> vector<96x16xf32>
    %c0_72 = arith.constant 0 : index
    %c0_73 = arith.constant 0 : index
    %391 = vector.load %arg7[%c0_72, %c0_73] : memref<96x16xf32, #tpu.memory_space<vmem>>, vector<96x16xf32>
    %392 = arith.mulf %390, %391 : vector<96x16xf32>
    %393 = vector.extract_strided_slice %392 {offsets = [0, 0], sizes = [32, 16], strides = [1, 1]} : vector<96x16xf32> to vector<32x16xf32>
    %394 = vector.extract_strided_slice %392 {offsets = [32, 0], sizes = [32, 16], strides = [1, 1]} : vector<96x16xf32> to vector<32x16xf32>
    %395 = arith.addf %393, %394 : vector<32x16xf32>
    %396 = vector.extract_strided_slice %392 {offsets = [64, 0], sizes = [32, 16], strides = [1, 1]} : vector<96x16xf32> to vector<32x16xf32>
    %397 = arith.addf %395, %396 : vector<32x16xf32>
    %398 = vector.shape_cast %397 : vector<32x16xf32> to vector<2x16x16xf32>
    %cst_74 = arith.constant dense<0.000000e+00> : vector<2x16xf32>
    %399 = vector.multi_reduction <add>, %398, %cst_74 [2] : vector<2x16x16xf32> to vector<2x16xf32>
    %cst_75 = arith.constant dense<0xFF800000> : vector<2xf32>
    %400 = vector.multi_reduction <maximumf>, %399, %cst_75 [1] : vector<2x16xf32> to vector<2xf32>
    %401 = vector.shape_cast %400 : vector<2xf32> to vector<2x1xf32>
    %402 = vector.broadcast %401 : vector<2x1xf32> to vector<2x16xf32>
    %403 = arith.subf %399, %402 : vector<2x16xf32>
    %404 = math.exp %403 : vector<2x16xf32>
    %cst_76 = arith.constant dense<0.000000e+00> : vector<2xf32>
    %405 = vector.multi_reduction <add>, %404, %cst_76 [1] : vector<2x16xf32> to vector<2xf32>
    %406 = vector.shape_cast %405 : vector<2xf32> to vector<2x1xf32>
    %407 = tpu.reciprocal %406 {approx = true} : vector<2x1xf32> -> vector<2x1xf32>
    %408 = vector.broadcast %407 : vector<2x1xf32> to vector<2x16xf32>
    %409 = arith.mulf %404, %408 : vector<2x16xf32>
    %410 = vector.shape_cast %409 : vector<2x16xf32> to vector<2x1x16xf32>
    %411 = tpu.concatenate %410, %410, %410 in 0 : vector<2x1x16xf32>, vector<2x1x16xf32>, vector<2x1x16xf32> -> vector<6x1x16xf32>
    %412 = vector.shape_cast %355 : vector<96x16xf32> to vector<6x16x16xf32>
    "tpu.trace_start"() <{level = 10 : i32, message = "xqt,xtd->xqd"}> : () -> ()
    %cst_77 = arith.constant dense<0.000000e+00> : vector<6x1x16xf32>
    %413 = tpu.matmul %411, %412, %cst_77 {dimension_numbers = #tpu.dot_dimension_numbers<[2], [1], [1], [2], [0, 0, 0, 1, 1, 2], [0], [0]>} : vector<6x1x16xf32>, vector<6x16x16xf32>, vector<6x1x16xf32> -> vector<6x1x16xf32>
    "tpu.trace_stop"() : () -> ()
    %414 = vector.shape_cast %413 : vector<6x1x16xf32> to vector<6x16xf32>
    %cst_78 = arith.constant dense<0.000000e+00> : vector<6xf32>
    %415 = vector.multi_reduction <add>, %414, %cst_78 [1] : vector<6x16xf32> to vector<6xf32>
    %416 = vector.shape_cast %415 : vector<6xf32> to vector<6x1xf32>
    %cst_79 = arith.constant 1.600000e+01 : f32
    %417 = vector.broadcast %cst_79 : f32 to vector<6x1xf32>
    %418 = arith.divf %416, %417 : vector<6x1xf32>
    %419 = vector.shape_cast %418 : vector<6x1xf32> to vector<6x1xf32>
    %420 = vector.broadcast %419 : vector<6x1xf32> to vector<6x16xf32>
    %421 = tpu.concatenate %414, %420 in 1 : vector<6x16xf32>, vector<6x16xf32> -> vector<6x32xf32>
    %c0_80 = arith.constant 0 : index
    %c0_81 = arith.constant 0 : index
    %422 = vector.load %arg8[%c0_80, %c0_81] : memref<32x32xf32, #tpu.memory_space<vmem>>, vector<32x32xf32>
    %cst_82 = arith.constant dense<0.000000e+00> : vector<6x32xf32>
    %423 = tpu.matmul %421, %422, %cst_82 {dimension_numbers = #tpu.dot_dimension_numbers<[1], [0], [0], [1], [0, 0, 1, 1], [], []>} : vector<6x32xf32>, vector<32x32xf32>, vector<6x32xf32> -> vector<6x32xf32>
    %424 = vector.extract_strided_slice %423 {offsets = [0, 0], sizes = [6, 16], strides = [1, 1]} : vector<6x32xf32> to vector<6x16xf32>
    %425 = vector.extract_strided_slice %423 {offsets = [0, 16], sizes = [6, 16], strides = [1, 1]} : vector<6x32xf32> to vector<6x16xf32>
    %426 = vector.extract_strided_slice %424 {offsets = [0, 0], sizes = [2, 16], strides = [1, 1]} : vector<6x16xf32> to vector<2x16xf32>
    %427 = vector.extract_strided_slice %424 {offsets = [2, 0], sizes = [2, 16], strides = [1, 1]} : vector<6x16xf32> to vector<2x16xf32>
    %428 = vector.extract_strided_slice %424 {offsets = [4, 0], sizes = [2, 16], strides = [1, 1]} : vector<6x16xf32> to vector<2x16xf32>
    %429 = vector.extract_strided_slice %425 {offsets = [0, 0], sizes = [2, 16], strides = [1, 1]} : vector<6x16xf32> to vector<2x16xf32>
    %430 = vector.extract_strided_slice %425 {offsets = [2, 0], sizes = [2, 16], strides = [1, 1]} : vector<6x16xf32> to vector<2x16xf32>
    %431 = vector.extract_strided_slice %425 {offsets = [4, 0], sizes = [2, 16], strides = [1, 1]} : vector<6x16xf32> to vector<2x16xf32>
    %432 = arith.mulf %426, %429 : vector<2x16xf32>
    %433 = arith.mulf %427, %430 : vector<2x16xf32>
    %434 = arith.addf %432, %433 : vector<2x16xf32>
    %435 = arith.mulf %428, %431 : vector<2x16xf32>
    %436 = arith.addf %434, %435 : vector<2x16xf32>
    %437 = arith.mulf %429, %429 : vector<2x16xf32>
    %438 = arith.mulf %430, %430 : vector<2x16xf32>
    %439 = arith.addf %437, %438 : vector<2x16xf32>
    %440 = arith.mulf %431, %431 : vector<2x16xf32>
    %441 = arith.addf %439, %440 : vector<2x16xf32>
    %cst_83 = arith.constant 9.99999997E-7 : f32
    %442 = vector.broadcast %cst_83 : f32 to vector<2x16xf32>
    %443 = arith.addf %441, %442 : vector<2x16xf32>
    %cst_84 = arith.constant 0.000000e+00 : f32
    %444 = vector.broadcast %cst_84 : f32 to vector<2x16xf32>
    %445 = arith.minimumf %436, %444 : vector<2x16xf32>
    %cst_85 = arith.constant 8.000000e-01 : f32
    %446 = vector.broadcast %cst_85 : f32 to vector<2x16xf32>
    %447 = arith.mulf %446, %445 : vector<2x16xf32>
    %448 = tpu.reciprocal %443 {approx = true} : vector<2x16xf32> -> vector<2x16xf32>
    %449 = arith.mulf %447, %448 : vector<2x16xf32>
    %450 = arith.mulf %449, %429 : vector<2x16xf32>
    %451 = arith.subf %426, %450 : vector<2x16xf32>
    %452 = arith.mulf %449, %430 : vector<2x16xf32>
    %453 = arith.subf %427, %452 : vector<2x16xf32>
    %454 = arith.mulf %449, %431 : vector<2x16xf32>
    %455 = arith.subf %428, %454 : vector<2x16xf32>
    %456 = tpu.concatenate %451, %453, %455 in 0 : vector<2x16xf32>, vector<2x16xf32>, vector<2x16xf32> -> vector<6x16xf32>
    %c0_86 = arith.constant 0 : index
    %c0_87 = arith.constant 0 : index
    %457 = vector.load %arg9[%c0_86, %c0_87] : memref<16x16xf32, #tpu.memory_space<vmem>>, vector<16x16xf32>
    %cst_88 = arith.constant dense<0.000000e+00> : vector<6x16xf32>
    %458 = tpu.matmul %456, %457, %cst_88 {dimension_numbers = #tpu.dot_dimension_numbers<[1], [0], [0], [1], [0, 0, 1, 1], [], []>} : vector<6x16xf32>, vector<16x16xf32>, vector<6x16xf32> -> vector<6x16xf32>
    %459 = vector.extract_strided_slice %458 {offsets = [0, 0], sizes = [6, 8], strides = [1, 1]} : vector<6x16xf32> to vector<6x8xf32>
    %460 = vector.extract_strided_slice %458 {offsets = [0, 8], sizes = [6, 8], strides = [1, 1]} : vector<6x16xf32> to vector<6x8xf32>
    %461 = vector.extract_strided_slice %459 {offsets = [0, 0], sizes = [2, 8], strides = [1, 1]} : vector<6x8xf32> to vector<2x8xf32>
    %462 = vector.extract_strided_slice %459 {offsets = [2, 0], sizes = [2, 8], strides = [1, 1]} : vector<6x8xf32> to vector<2x8xf32>
    %463 = vector.extract_strided_slice %459 {offsets = [4, 0], sizes = [2, 8], strides = [1, 1]} : vector<6x8xf32> to vector<2x8xf32>
    %464 = vector.extract_strided_slice %460 {offsets = [0, 0], sizes = [2, 8], strides = [1, 1]} : vector<6x8xf32> to vector<2x8xf32>
    %465 = vector.extract_strided_slice %460 {offsets = [2, 0], sizes = [2, 8], strides = [1, 1]} : vector<6x8xf32> to vector<2x8xf32>
    %466 = vector.extract_strided_slice %460 {offsets = [4, 0], sizes = [2, 8], strides = [1, 1]} : vector<6x8xf32> to vector<2x8xf32>
    %467 = arith.mulf %461, %464 : vector<2x8xf32>
    %468 = arith.mulf %462, %465 : vector<2x8xf32>
    %469 = arith.addf %467, %468 : vector<2x8xf32>
    %470 = arith.mulf %463, %466 : vector<2x8xf32>
    %471 = arith.addf %469, %470 : vector<2x8xf32>
    %472 = arith.mulf %464, %464 : vector<2x8xf32>
    %473 = arith.mulf %465, %465 : vector<2x8xf32>
    %474 = arith.addf %472, %473 : vector<2x8xf32>
    %475 = arith.mulf %466, %466 : vector<2x8xf32>
    %476 = arith.addf %474, %475 : vector<2x8xf32>
    %cst_89 = arith.constant 9.99999997E-7 : f32
    %477 = vector.broadcast %cst_89 : f32 to vector<2x8xf32>
    %478 = arith.addf %476, %477 : vector<2x8xf32>
    %cst_90 = arith.constant 0.000000e+00 : f32
    %479 = vector.broadcast %cst_90 : f32 to vector<2x8xf32>
    %480 = arith.minimumf %471, %479 : vector<2x8xf32>
    %cst_91 = arith.constant 8.000000e-01 : f32
    %481 = vector.broadcast %cst_91 : f32 to vector<2x8xf32>
    %482 = arith.mulf %481, %480 : vector<2x8xf32>
    %483 = tpu.reciprocal %478 {approx = true} : vector<2x8xf32> -> vector<2x8xf32>
    %484 = arith.mulf %482, %483 : vector<2x8xf32>
    %485 = arith.mulf %484, %464 : vector<2x8xf32>
    %486 = arith.subf %461, %485 : vector<2x8xf32>
    %487 = arith.mulf %484, %465 : vector<2x8xf32>
    %488 = arith.subf %462, %487 : vector<2x8xf32>
    %489 = arith.mulf %484, %466 : vector<2x8xf32>
    %490 = arith.subf %463, %489 : vector<2x8xf32>
    %491 = tpu.concatenate %486, %488, %490 in 0 : vector<2x8xf32>, vector<2x8xf32>, vector<2x8xf32> -> vector<6x8xf32>
    %c0_92 = arith.constant 0 : index
    %c0_93 = arith.constant 0 : index
    %492 = vector.load %arg10[%c0_92, %c0_93] : memref<8x3xf32, #tpu.memory_space<vmem>>, vector<8x3xf32>
    %cst_94 = arith.constant dense<0.000000e+00> : vector<6x3xf32>
    %493 = tpu.matmul %491, %492, %cst_94 {dimension_numbers = #tpu.dot_dimension_numbers<[1], [0], [0], [1], [0, 0, 1, 1], [], []>} : vector<6x8xf32>, vector<8x3xf32>, vector<6x3xf32> -> vector<6x3xf32>
    %494 = vector.extract_strided_slice %493 {offsets = [0, 0], sizes = [6, 1], strides = [1, 1]} : vector<6x3xf32> to vector<6x1xf32>
    %495 = vector.broadcast %494 : vector<6x1xf32> to vector<6x32xf32>
    %496 = arith.mulf %495, %421 : vector<6x32xf32>
    %497 = vector.extract_strided_slice %496 {offsets = [0, 0], sizes = [2, 32], strides = [1, 1]} : vector<6x32xf32> to vector<2x32xf32>
    %498 = vector.extract_strided_slice %496 {offsets = [2, 0], sizes = [2, 32], strides = [1, 1]} : vector<6x32xf32> to vector<2x32xf32>
    %499 = arith.addf %497, %498 : vector<2x32xf32>
    %500 = vector.extract_strided_slice %496 {offsets = [4, 0], sizes = [2, 32], strides = [1, 1]} : vector<6x32xf32> to vector<2x32xf32>
    %501 = arith.addf %499, %500 : vector<2x32xf32>
    %502 = vector.extract_strided_slice %493 {offsets = [0, 1], sizes = [6, 1], strides = [1, 1]} : vector<6x3xf32> to vector<6x1xf32>
    %503 = vector.broadcast %502 : vector<6x1xf32> to vector<6x32xf32>
    %504 = arith.mulf %503, %421 : vector<6x32xf32>
    %505 = vector.extract_strided_slice %504 {offsets = [0, 0], sizes = [2, 32], strides = [1, 1]} : vector<6x32xf32> to vector<2x32xf32>
    %506 = vector.extract_strided_slice %504 {offsets = [2, 0], sizes = [2, 32], strides = [1, 1]} : vector<6x32xf32> to vector<2x32xf32>
    %507 = arith.addf %505, %506 : vector<2x32xf32>
    %508 = vector.extract_strided_slice %504 {offsets = [4, 0], sizes = [2, 32], strides = [1, 1]} : vector<6x32xf32> to vector<2x32xf32>
    %509 = arith.addf %507, %508 : vector<2x32xf32>
    %510 = vector.extract_strided_slice %493 {offsets = [0, 2], sizes = [6, 1], strides = [1, 1]} : vector<6x3xf32> to vector<6x1xf32>
    %511 = vector.broadcast %510 : vector<6x1xf32> to vector<6x32xf32>
    %512 = arith.mulf %511, %421 : vector<6x32xf32>
    %513 = vector.extract_strided_slice %512 {offsets = [0, 0], sizes = [2, 32], strides = [1, 1]} : vector<6x32xf32> to vector<2x32xf32>
    %514 = vector.extract_strided_slice %512 {offsets = [2, 0], sizes = [2, 32], strides = [1, 1]} : vector<6x32xf32> to vector<2x32xf32>
    %515 = arith.addf %513, %514 : vector<2x32xf32>
    %516 = vector.extract_strided_slice %512 {offsets = [4, 0], sizes = [2, 32], strides = [1, 1]} : vector<6x32xf32> to vector<2x32xf32>
    %517 = arith.addf %515, %516 : vector<2x32xf32>
    %518 = tpu.concatenate %501, %509, %517 in 1 : vector<2x32xf32>, vector<2x32xf32>, vector<2x32xf32> -> vector<2x96xf32>
    %c0_95 = arith.constant 0 : index
    %c0_96 = arith.constant 0 : index
    %519 = vector.load %arg11[%c0_95, %c0_96] : memref<96x24xf32, #tpu.memory_space<vmem>>, vector<96x24xf32>
    %cst_97 = arith.constant dense<0.000000e+00> : vector<2x24xf32>
    %520 = tpu.matmul %518, %519, %cst_97 {dimension_numbers = #tpu.dot_dimension_numbers<[1], [0], [0], [1], [0, 0, 1, 1], [], []>} : vector<2x96xf32>, vector<96x24xf32>, vector<2x24xf32> -> vector<2x24xf32>
    %c0_98 = arith.constant 0 : index
    %c0_99 = arith.constant 0 : index
    %521 = vector.load %arg12[%c0_98, %c0_99] : memref<1x24xf32, #tpu.memory_space<vmem>>, vector<1x24xf32>
    %522 = vector.broadcast %521 : vector<1x24xf32> to vector<2x24xf32>
    %523 = arith.addf %520, %522 : vector<2x24xf32>
    %cst_100 = arith.constant 0.000000e+00 : f32
    %524 = vector.broadcast %cst_100 : f32 to vector<2x24xf32>
    %525 = arith.maximumf %523, %524 : vector<2x24xf32>
    %c0_101 = arith.constant 0 : index
    %c0_102 = arith.constant 0 : index
    %526 = vector.load %arg13[%c0_101, %c0_102] : memref<24x6xf32, #tpu.memory_space<vmem>>, vector<24x6xf32>
    %cst_103 = arith.constant dense<0.000000e+00> : vector<2x6xf32>
    %527 = tpu.matmul %525, %526, %cst_103 {dimension_numbers = #tpu.dot_dimension_numbers<[1], [0], [0], [1], [0, 0, 1, 1], [], []>} : vector<2x24xf32>, vector<24x6xf32>, vector<2x6xf32> -> vector<2x6xf32>
    %c0_104 = arith.constant 0 : index
    %c0_105 = arith.constant 0 : index
    %528 = vector.load %arg14[%c0_104, %c0_105] : memref<1x6xf32, #tpu.memory_space<vmem>>, vector<1x6xf32>
    %529 = vector.broadcast %528 : vector<1x6xf32> to vector<2x6xf32>
    %530 = arith.addf %527, %529 : vector<2x6xf32>
    %c0_106 = arith.constant 0 : index
    %c0_107 = arith.constant 0 : index
    %531 = vector.load %arg15[%c0_106, %c0_107] : memref<2x6xf32, #tpu.memory_space<vmem>>, vector<2x6xf32>
    tpu.vector_store %arg15[%c0_106, %c0_107], %530 {strides = array<i32>} : memref<2x6xf32, #tpu.memory_space<vmem>>, vector<2x6xf32>,
    return
  }
}

</mosaic_0001>

<bundles_post_ra>
// kernel: vn_baseline_attn_forward.1
= control target key start
LH: loop header
LB: loop body
LE: loop exit
PB: predicated region body
PF: predicated region fallthrough
CT: control target
= control target key end

     0   :  { %vm101_vm0 = vcmask 1043456   ;;  %vm64_vm1 = vcmask 31744   ;;  %s8491_s0 = inlined_call_operand.vmem [shape: f32[96,4], index: 0, kind: input, shape index: {}]   ;;  %s8492_s1 = inlined_call_operand.vmem [shape: f32[4,32], index: 1, kind: input, shape index: {}]   ;;  %s8493_s2 = inlined_call_operand.vmem [shape: f32[16,192], index: 2, kind: input, shape index: {}]   ;;  %s8494_s3 = inlined_call_operand.vmem [shape: f32[64,16], index: 3, kind: input, shape index: {}]   ;;  %s8495_s4 = inlined_call_operand.vmem [shape: f32[16,192], index: 4, kind: input, shape index: {}]   ;;  %s8496_s5 = inlined_call_operand.vmem [shape: f32[64,16], index: 5, kind: input, shape index: {}]   ;;  %s8497_s6 = inlined_call_operand.vmem [shape: f32[16,32], index: 6, kind: input, shape index: {}]   ;;  %s8498_s7 = inlined_call_operand.vmem [shape: f32[96,16], index: 7, kind: input, shape index: {}]   ;;  %s8499_s8 = inlined_call_operand.vmem [shape: f32[32,32], index: 8, kind: input, shape index: {}]   ;;  %s8500_s9 = inlined_call_operand.vmem [shape: f32[16,16], index: 9, kind: input, shape index: {}]   ;;  %s8501_s10 = inlined_call_operand.vmem [shape: f32[8,3], index: 10, kind: input, shape index: {}]   ;;  %s8502_s11 = inlined_call_operand.vmem [shape: f32[96,24], index: 11, kind: input, shape index: {}]   ;;  %s8503_s12 = inlined_call_operand.vmem [shape: f32[1,24], index: 12, kind: input, shape index: {}]   ;;  %s8504_s13 = inlined_call_operand.vmem [shape: f32[24,6], index: 13, kind: input, shape index: {}]   ;;  %s8505_s14 = inlined_call_operand.vmem [shape: f32[1,6], index: 14, kind: input, shape index: {}]   ;;  %s8506_s15 = inlined_call_operand.hbm [shape: f32[2,6], index: 15, kind: output, shape index: {}]  }
   0x1   :  { %v63_v0 = vld [vmem:[%s8492_s1] sm:$0xf] }
   0x2   :  { %v51_v1 = vld [vmem:[%s8491_s0] sm:$0xff]  ;;  %4989 = vmatpush.msk.msra.mxu0 %vm101_vm0, %v63_v0 }
   0x3   :  { %4990 = vmatmul.msk.f32.vlgmr.msra.gmra.mxu0 %vm64_vm1, %v51_v1 }
   0x4   :  { %20 = vsyncpa [#allocation3], 0  ;;  %v52_v2 = vld [vmem:[%s8491_s0 + $0x8] sm:$0xff]  ;;  %v53_v3 = vld [vmem:[%s8491_s0 + $0x10] sm:$0xff]  ;;  %s5727_s27 = smov 112   ;;  %vm306_vm2 = vcmask 130048  }
   0x5   :  { %v54_v4 = vld [vmem:[%s8491_s0 + $0x18] sm:$0xff]  ;;  %v55_v5 = vld [vmem:[%s8491_s0 + $0x20] sm:$0xff]  ;;  %v56_v6 = vld [vmem:[%s8491_s0 + $0x28] sm:$0xff]  ;;  %s5728_s16 = smov 4   ;;  %s5729_s17 = smov 116   ;;  %vm529_vm3 = vcmask 97280  }
   0x6   :  { %v57_v7 = vld [vmem:[%s8491_s0 + $0x30] sm:$0xff]  ;;  %v58_v8 = vld [vmem:[%s8491_s0 + $0x38] sm:$0xff]  ;;  %v59_v9 = vld [vmem:[%s8491_s0 + $0x40] sm:$0xff]  ;;  %s5730_s18 = smov 120   ;;  %s8520_s19 = smov 8   ;;  %vm432_vm4 = vcmask 64512  }
   0x7   :  { %v60_v10 = vld [vmem:[%s8491_s0 + $0x48] sm:$0xff]  ;;  %v61_v11 = vld [vmem:[%s8491_s0 + $0x50] sm:$0xff]  ;;  %v62_v12 = vld [vmem:[%s8491_s0 + $0x58] sm:$0xff]  ;;  %s5732_s20 = smov 100   ;;  %s8516_s21 = smov 96   ;;  %vm1869_vm5 = vcmask 523264  }
   0x8   :  { %v303_v53 = vld [vmem:[%s8493_s2 + $0x10] sm:$0xff]  ;;  %v302_v54 = vld [vmem:[%s8493_s2] sm:$0xff]  ;;  %s5734_s22 = smov 108   ;;  %s5735_s23 = smov 104   ;;  %vm4426_vm6 = vcmask 130112   ;;  %vm4431_vm7 = vcmask 1041409  }
   0x9   :  { %357 = vmatpush.msra.mxu1 %v303_v53  ;;  %5217 = vmatpush.msra.mxu3 %v303_v53  ;;  %s5736_s24 = smov 124   ;;  %s8514_s25 = smov 92   ;;  %vm4434_vm8 = vcmask 123904   ;;  %vm4647_vm9 = vcmask 1042434   ;;  %vm4650_vm10 = vcmask 1043459   ;;  %vm4653_vm11 = vcmask 1044484  }
   0xa   :  { %s8507_s1 = smov 84   ;;  %s8512_s26 = smov 88   ;;  %vm4656_vm12 = vcmask 1045509   ;;  %vm4659_vm13 = vcmask 128000   ;;  %vm4676_vm15 = vcmask 261120  }
   0xb   :  { %4991 = vmatmul.msk.f32.gmra.mxu0 %vm64_vm1, %v52_v2  ;;  %358 = vmatpush.msra.mxu1 %v302_v54  ;;  %s8509_s0 = smov 12   ;;  %s8553_s30 = smov 8  }
   0xc   :  { %5218 = vmatpush.msra.mxu3 %v302_v54 }
  0x13   :  { %4992 = vmatmul.msk.f32.gmra.mxu0 %vm64_vm1, %v53_v3 }
  0x1b   :  { %4993 = vmatmul.msk.f32.gmra.mxu0 %vm64_vm1, %v54_v4 }
  0x23   :  { %4994 = vmatmul.msk.f32.gmra.mxu0 %vm64_vm1, %v55_v5 }
  0x2b   :  { %4995 = vmatmul.msk.f32.gmra.mxu0 %vm64_vm1, %v56_v6 }
  0x33   :  { %4996 = vmatmul.msk.f32.gmra.mxu0 %vm64_vm1, %v57_v7 }
  0x3b   :  { %4997 = vmatmul.msk.f32.gmra.mxu0 %vm64_vm1, %v58_v8 }
  0x43   :  { %4998 = vmatmul.msk.f32.gmra.mxu0 %vm64_vm1, %v59_v9 }
  0x4b   :  { %4999 = vmatmul.msk.f32.gmra.mxu0 %vm64_vm1, %v60_v10 }
  0x53   :  { %5000 = vmatmul.msk.f32.gmra.mxu0 %vm64_vm1, %v61_v11 }
  0x5b   :  { %5001 = vmatmul.msk.f32.gmra.mxu0 %vm64_vm1, %v62_v12 }
  0x80   :  { %v5881_v13 = vpop.f32.mrf.mxu0 }
  0x81   :  { %162 = vrot.lane.b32.xlu0 %v5881_v13, %s5727_s27  ;;  %v226_v22 = vmul.f32 %v5881_v13, %v5881_v13 }
  0x88   :  { %v5885_v14 = vpop.f32.mrf.mxu0 }
  0x89   :  { %164 = vrot.lane.b32.xlu1 %v5885_v14, %s5727_s27  ;;  %v227_v29 = vmul.f32 %v5885_v14, %v5885_v14 }
  0x90   :  { %v5889_v15 = vpop.f32.mrf.mxu0 }
  0x91   :  { %v228_v37 = vmul.f32 %v5889_v15, %v5889_v15 }
  0x98   :  { %v5891_v16 = vpop.f32.mrf.mxu0 }
  0x99   :  { %v229_v45 = vmul.f32 %v5891_v16, %v5891_v16 }
  0xa0   :  { %v5893_v17 = vpop.f32.mrf.mxu0 }
  0xa1   :  { %182 = vrot.lane.b32.xlu0 %v5893_v17, %s5727_s27  ;;  %v230_v21 = vmul.f32 %v5893_v17, %v5893_v17 }
  0xa3   :  { %v234_v24 = vadd.f32 %v230_v21, %v226_v22 }
  0xa8   :  { %v5897_v18 = vpop.f32.mrf.mxu0 }
  0xa9   :  { %184 = vrot.lane.b32.xlu2 %v5897_v18, %s5727_s27  ;;  %v231_v27 = vmul.f32 %v5897_v18, %v5897_v18 }
  0xab   :  { %v235_v31 = vadd.f32 %v231_v27, %v227_v29 }
  0xb0   :  { %v5901_v19 = vpop.f32.mrf.mxu0 }
  0xb1   :  { %v232_v35 = vmul.f32 %v5901_v19, %v5901_v19 }
  0xb3   :  { %v236_v39 = vadd.f32 %v232_v35, %v228_v37 }
  0xb8   :  { %v5903_v20 = vpop.f32.mrf.mxu0 }
  0xb9   :  { %v233_v43 = vmul.f32 %v5903_v20, %v5903_v20 }
  0xbb   :  { %v237_v47 = vadd.f32 %v233_v43, %v229_v45 }
  0xc0   :  { %v5909_v23 = vpop.f32.mrf.mxu0 }
  0xc1   :  { %v238_v25 = vmul.f32 %v5909_v23, %v5909_v23  ;;  %206 = vrot.lane.b32.xlu1 %v5909_v23, %s5727_s27 }
  0xc3   :  { %v242_v26 = vadd.f32 %v238_v25, %v234_v24 }
  0xc5   :  { %v246_v28 = vadd.f32 1e-06, %v242_v26 }
  0xc7   :  { %5521 = vrcp.f32 %v246_v28 }
  0xc8   :  { %v5919_v30 = vpop.f32.mrf.mxu0 }
  0xc9   :  { %v239_v32 = vmul.f32 %v5919_v30, %v5919_v30  ;;  %166 = vrot.lane.b32.xlu1 %v5889_v15, %s5727_s27  ;;  %208 = vrot.lane.b32.xlu0 %v5919_v30, %s5727_s27 }
  0xcb   :  { %v243_v33 = vadd.f32 %v239_v32, %v235_v31 }
  0xcd   :  { %v5522_v34 = vpop.eup %5521  ;;  %v247_v36 = vadd.f32 1e-06, %v243_v33 }
  0xce   :  { %262 = vrot.lane.b32.xlu2 %v5522_v34, %s5727_s27 }
  0xcf   :  { %5523 = vrcp.f32 %v247_v36 }
  0xd0   :  { %v5932_v38 = vpop.f32.mrf.mxu0 }
  0xd1   :  { %v240_v40 = vmul.f32 %v5932_v38, %v5932_v38  ;;  %210 = vrot.lane.b32.xlu1 %v5932_v38, %s5727_s27 }
  0xd3   :  { %v244_v41 = vadd.f32 %v240_v40, %v236_v39 }
  0xd5   :  { %v5524_v42 = vpop.eup %5523  ;;  %v248_v44 = vadd.f32 1e-06, %v244_v41 }
  0xd6   :  { %186 = vrot.lane.b32.xlu2 %v5901_v19, %s5727_s27  ;;  %264 = vrot.lane.b32.xlu0 %v5524_v42, %s5727_s27 }
  0xd7   :  { %5525 = vrcp.f32 %v248_v44 }
  0xd8   :  { %v5945_v46 = vpop.f32.mrf.mxu0 }
  0xd9   :  { %v241_v48 = vmul.f32 %v5945_v46, %v5945_v46 }
  0xdb   :  { %v245_v49 = vadd.f32 %v241_v48, %v237_v47 }
  0xdd   :  { %v5526_v50 = vpop.eup %5525  ;;  %v249_v51 = vadd.f32 1e-06, %v245_v49 }
  0xde   :  { %168 = vrot.lane.b32.xlu2 %v5891_v16, %s5727_s27  ;;  %188 = vrot.lane.b32.xlu0 %v5903_v20, %s5727_s27 }
  0xdf   :  { %5527 = vrcp.f32 %v249_v51  ;;  %266 = vrot.lane.b32.xlu1 %v5526_v50, %s5727_s27 }
  0xe5   :  { %v5528_v52 = vpop.eup %5527 }
  0xe6   :  { %212 = vrot.lane.b32.xlu2 %v5945_v46, %s5727_s27  ;;  %268 = vrot.lane.b32.xlu0 %v5528_v52, %s5727_s27 }
  0xf3   :  { %v163_v55 = vpop.permute.xlu0 %162 }
  0xf4   :  { %v174_v60 = vmul.f32 %v163_v55, %v5881_v13 }
  0xfb   :  { %v165_v57 = vpop.permute.xlu1 %164 }
  0xfc   :  { %v175_v10 = vmul.f32 %v165_v57, %v5885_v14 }
 0x103   :  { %v185_v56 = vpop.permute.xlu2 %184 }
 0x104   :  { %v195_v8 = vmul.f32 %v185_v56, %v5897_v18 }
 0x106   :  { %v199_v12 = vadd.f32 %v195_v8, %v175_v10 }
 0x113   :  { %v183_v58 = vpop.permute.xlu0 %182 }
 0x114   :  { %v194_v59 = vmul.f32 %v183_v58, %v5893_v17 }
 0x116   :  { %v198_v63 = vadd.f32 %v194_v59, %v174_v60 }
 0x128   :  { %v263_v61 = vpop.permute.xlu2 %262 }
 0x130   :  { %v187_v5 = vpop.permute.xlu2 %186 }
 0x131   :  { %v196_v27 = vmul.f32 %v187_v5, %v5901_v19 }
 0x133   :  { %v5965_v62 = vpop.permute.xlu1 %206 }
 0x134   :  { %v218_v0 = vmul.f32 %v5965_v62, %v5909_v23 }
 0x136   :  { %v222_v1 = vadd.f32 %v218_v0, %v198_v63 }
 0x138   :  { %v250_v2 = vmin.f32 %v222_v1, 0.0  ;;  %v169_v24 = vpop.permute.xlu2 %168 }
 0x139   :  { %v177_v39 = vmul.f32 %v169_v24, %v5891_v16 }
 0x13a   :  { %v274_v3 = vmul.f32 %v263_v61, %v250_v2 }
 0x13b   :  { %v167_v4 = vpop.permute.xlu1 %166  ;;  %v209_v6 = vpop.permute.xlu0 %208 }
 0x13c   :  { %v278_v7 = vmul.f32 %v274_v3, %v163_v55  ;;  %v219_v11 = vmul.f32 %v209_v6, %v5919_v30  ;;  %v176_v25 = vmul.f32 %v167_v4, %v5889_v15 }
 0x13e   :  { %v5971_v9 = vsub.f32 %v5881_v13, %v278_v7  ;;  %v223_v21 = vadd.f32 %v219_v11, %v199_v12  ;;  %v200_v31 = vadd.f32 %v196_v27, %v176_v25 }
 0x140   :  { %5002 = vmatmul.msk.f32.vlgmr.msra.gmra.mxu1 %vm306_vm2, %v5971_v9  ;;  %v251_v26 = vmin.f32 %v223_v21, 0.0  ;;  %v213_v35 = vpop.permute.xlu2 %212 }
 0x141   :  { %v221_v43 = vmul.f32 %v213_v35, %v5945_v46 }
 0x143   :  { %v211_v22 = vpop.permute.xlu1 %210 }
 0x144   :  { %v220_v28 = vmul.f32 %v211_v22, %v5932_v38 }
 0x146   :  { %v224_v33 = vadd.f32 %v220_v28, %v200_v31 }
 0x148   :  { %v265_v13 = vpop.permute.xlu0 %264  ;;  %v252_v37 = vmin.f32 %v224_v33, 0.0 }
 0x149   :  { %v275_v29 = vmul.f32 %v265_v13, %v251_v26 }
 0x14b   :  { %v279_v32 = vmul.f32 %v275_v29, %v165_v57  ;;  %v287_v57 = vmul.f32 %v275_v29, %v185_v56 }
 0x14d   :  { %v5981_v34 = vsub.f32 %v5885_v14, %v279_v32 }
 0x14f   :  { %5003 = vmatmul.msk.f32.gmra.mxu1 %vm306_vm2, %v5981_v34 }
 0x150   :  { %v189_v36 = vpop.permute.xlu0 %188 }
 0x151   :  { %v197_v40 = vmul.f32 %v189_v36, %v5903_v20  ;;  %v267_v41 = vpop.permute.xlu1 %266 }
 0x152   :  { %v276_v42 = vmul.f32 %v267_v41, %v252_v37 }
 0x153   :  { %v201_v44 = vadd.f32 %v197_v40, %v177_v39 }
 0x154   :  { %v280_v45 = vmul.f32 %v276_v42, %v167_v4 }
 0x155   :  { %v225_v47 = vadd.f32 %v221_v43, %v201_v44 }
 0x156   :  { %v5989_v14 = vsub.f32 %v5889_v15, %v280_v45  ;;  %v286_v15 = vmul.f32 %v274_v3, %v183_v58 }
 0x157   :  { %v253_v48 = vmin.f32 %v225_v47, 0.0 }
 0x158   :  { %5004 = vmatmul.msk.f32.gmra.mxu1 %vm306_vm2, %v5989_v14  ;;  %v269_v49 = vpop.permute.xlu0 %268  ;;  %v6004_v55 = vsub.f32 %v5893_v17, %v286_v15 }
 0x159   :  { %v277_v50 = vmul.f32 %v269_v49, %v253_v48 }
 0x15b   :  { %v281_v51 = vmul.f32 %v277_v50, %v169_v24  ;;  %v297_v52 = vmul.f32 %v277_v50, %v213_v35  ;;  %v289_v58 = vmul.f32 %v277_v50, %v189_v36 }
 0x15d   :  { %v5994_v53 = vsub.f32 %v5891_v16, %v281_v51  ;;  %v5997_v54 = vsub.f32 %v5945_v46, %v297_v52  ;;  %v6009_v16 = vsub.f32 %v5897_v18, %v287_v57  ;;  %v288_v46 = vmul.f32 %v276_v42, %v187_v5 }
 0x15e   :  { %v6019_v17 = vsub.f32 %v5903_v20, %v289_v58  ;;  %v294_v18 = vmul.f32 %v274_v3, %v5965_v62  ;;  %v296_v20 = vmul.f32 %v276_v42, %v211_v22 }
 0x15f   :  { %5013 = vmatmul.msk.f32.vlgmr.msra.gmra.mxu3 %vm306_vm2, %v5997_v54  ;;  %v6014_v59 = vsub.f32 %v5901_v19, %v288_v46  ;;  %v295_v19 = vmul.f32 %v275_v29, %v209_v6 }
 0x160   :  { %5005 = vmatmul.msk.f32.gmra.mxu1 %vm306_vm2, %v5994_v53  ;;  %v6025_v56 = vsub.f32 %v5909_v23, %v294_v18  ;;  %v6035_v61 = vsub.f32 %v5932_v38, %v296_v20 }
 0x161   :  { %v6030_v60 = vsub.f32 %v5919_v30, %v295_v19 }
 0x168   :  { %5006 = vmatmul.msk.f32.gmra.mxu1 %vm306_vm2, %v6004_v55 }
 0x170   :  { %5007 = vmatmul.msk.f32.gmra.mxu1 %vm306_vm2, %v6009_v16 }
 0x178   :  { %5008 = vmatmul.msk.f32.gmra.mxu1 %vm306_vm2, %v6014_v59 }
 0x180   :  { %5009 = vmatmul.msk.f32.gmra.mxu1 %vm306_vm2, %v6019_v17 }
 0x188   :  { %5010 = vmatmul.msk.f32.gmra.mxu1 %vm306_vm2, %v6025_v56 }
 0x190   :  { %5011 = vmatmul.msk.f32.gmra.mxu1 %vm306_vm2, %v6030_v60 }
 0x198   :  { %5012 = vmatmul.msk.f32.gmra.mxu1 %vm306_vm2, %v6035_v61 }
 0x1bd   :  { %v6039_v62 = vpop.f32.mrf.mxu1 }
 0x1be   :  { %441 = vrot.lane.b32.xlu1 %v6039_v62, %s5727_s27 }
 0x1cc   :  { %v6043_v23 = vpop.f32.mrf.mxu1 }
 0x1cd   :  { %443 = vrot.lane.b32.xlu1 %v6043_v23, %s5727_s27  ;;  %v6107_v8 = vpack.i.bf16 %v6039_v62, %v6043_v23 }
 0x1d5   :  { %v6047_v30 = vpop.f32.mrf.mxu1 }
 0x1dd   :  { %v6049_v63 = vpop.f32.mrf.mxu1 }
 0x1de   :  { %447 = vrot.lane.b32.xlu2 %v6049_v63, %s5727_s27  ;;  %v6139_v11 = vpack.i.bf16 %v6047_v30, %v6049_v63 }
 0x1e2   :  { %v6059_v0 = vpop.f32.mrf.mxu3 }
 0x1e5   :  { %v6053_v38 = vpop.f32.mrf.mxu1 }
 0x1e6   :  { %400 = vrot.lane.b32.xlu1 %v6053_v38, %s5728_s16  ;;  %453 = vrot.lane.b32.xlu2 %v6053_v38, %s5729_s17 }
 0x1ed   :  { %v6061_v1 = vpop.f32.mrf.mxu1 }
 0x1ee   :  { %471 = vrot.lane.b32.xlu1 %v6059_v0, %s5730_s18  ;;  %402 = vrot.lane.b32.xlu0 %v6061_v1, %s5728_s16  ;;  %v6103_v7 = vpack.i.bf16 %v6053_v38, %v6061_v1 }
 0x1ef   :  { %455 = vrot.lane.b32.xlu2 %v6061_v1, %s5729_s17 }
 0x1f5   :  { %v6069_v2 = vpop.f32.mrf.mxu1 }
 0x1fd   :  { %v6071_v3 = vpop.f32.mrf.mxu1 }
 0x1fe   :  { %v6149_v21 = vpack.i.bf16 %v6069_v2, %v6071_v3 }
 0x205   :  { %v6073_v4 = vpop.f32.mrf.mxu1 }
 0x206   :  { %416 = vrot.lane.b32.xlu2 %v6073_v4, %s8520_s19  ;;  %465 = vrot.lane.b32.xlu0 %v6073_v4, %s5730_s18 }
 0x20d   :  { %v6079_v5 = vpop.f32.mrf.mxu1 }
 0x20e   :  { %445 = vrot.lane.b32.xlu2 %v6047_v30, %s5727_s27  ;;  %418 = vrot.lane.b32.xlu1 %v6079_v5, %s8520_s19  ;;  %v6117_v10 = vpack.i.bf16 %v6073_v4, %v6079_v5 }
 0x20f   :  { %467 = vrot.lane.b32.xlu0 %v6079_v5, %s5730_s18 }
 0x215   :  { %v6087_v6 = vpop.f32.mrf.mxu1 }
 0x216   :  { %404 = vrot.lane.b32.xlu2 %v6069_v2, %s5728_s16  ;;  %469 = vrot.lane.b32.xlu1 %v6087_v6, %s5730_s18  ;;  %v6163_v25 = vpack.i.bf16 %v6087_v6, %v6059_v0 }
 0x217   :  { %459 = vrot.lane.b32.xlu0 %v6071_v3, %s5729_s17 }
 0x21e   :  { %422 = vrot.lane.b32.xlu2 %v6059_v0, %s8520_s19  ;;  %406 = vrot.lane.b32.xlu1 %v6071_v3, %s5728_s16 }
 0x21f   :  { %457 = vrot.lane.b32.xlu0 %v6069_v2, %s5729_s17 }
 0x226   :  { %5249 = vrot.lane.b32.xlu2 %v6103_v7, %s5732_s20  ;;  %5244 = vrot.lane.b32.xlu1 %v6107_v8, %s8516_s21 }
 0x227   :  { %420 = vrot.lane.b32.xlu0 %v6087_v6, %s8520_s19 }
 0x22e   :  { %736 = vrot.lane.b32.xlu2 %v6043_v23, %s5734_s22  ;;  %734 = vrot.lane.b32.xlu1 %v6039_v62, %s5734_s22 }
 0x22f   :  { %5254 = vrot.lane.b32.xlu0 %v6117_v10, %s5735_s23 }
 0x230   :  { %v442_v26 = vpop.permute.xlu1 %441 }
 0x236   :  { %748 = vrot.lane.b32.xlu2 %v6061_v1, %s5727_s27  ;;  %714 = vrot.lane.b32.xlu1 %v6073_v4, %s5728_s16 }
 0x237   :  { %746 = vrot.lane.b32.xlu0 %v6053_v38, %s5727_s27 }
 0x238   :  { %v448_v12 = vpop.permute.xlu2 %447 }
 0x23e   :  { %760 = vrot.lane.b32.xlu2 %v6079_v5, %s5729_s17  ;;  %716 = vrot.lane.b32.xlu1 %v6079_v5, %s5728_s16 }
 0x23f   :  { %702 = vrot.lane.b32.xlu0 %v6039_v62, %s5736_s24  ;;  %v444_v28 = vpop.permute.xlu1 %443 }
 0x240   :  { %v454_v22 = vpop.permute.xlu2 %453 }
 0x241   :  { %v477_v43 = vsel %vm64_vm1, %v442_v26, %v454_v22 }
 0x246   :  { %5259 = vrot.lane.b32.xlu2 %v6139_v11, %s8516_s21  ;;  %752 = vrot.lane.b32.xlu1 %v6071_v3, %s5727_s27 }
 0x247   :  { %704 = vrot.lane.b32.xlu0 %v6043_v23, %s5736_s24 }
 0x249   :  { %v456_v24 = vpop.permute.xlu2 %455 }
 0x24a   :  { %v478_v39 = vsel %vm64_vm1, %v444_v28, %v456_v24 }
 0x24e   :  { %5264 = vrot.lane.b32.xlu2 %v6149_v21, %s5732_s20  ;;  %738 = vrot.lane.b32.xlu1 %v6047_v30, %s5734_s22 }
 0x24f   :  { %740 = vrot.lane.b32.xlu0 %v6049_v63, %s5734_s22 }
 0x256   :  { %758 = vrot.lane.b32.xlu2 %v6073_v4, %s5729_s17 }
 0x257   :  { %764 = vrot.lane.b32.xlu0 %v6059_v0, %s5729_s17 }
 0x258   :  { %v401_v29 = vpop.permute.xlu1 %400 }
 0x259   :  { %v428_v45 = vsel %vm64_vm1, %v6039_v62, %v401_v29 }
 0x25e   :  { %5269 = vrot.lane.b32.xlu2 %v6163_v25, %s5735_s23 }
 0x25f   :  { %750 = vrot.lane.b32.xlu0 %v6069_v2, %s5727_s27 }
 0x260   :  { %v417_v27 = vpop.permute.xlu2 %416  ;;  %v403_v31 = vpop.permute.xlu0 %402 }
 0x261   :  { %v472_v33 = vpop.permute.xlu1 %471  ;;  %v433_v50 = vsel %vm432_vm4, %v428_v45, %v417_v27  ;;  %v429_v15 = vsel %vm64_vm1, %v6043_v23, %v403_v31 }
 0x268   :  { %v446_v13 = vpop.permute.xlu2 %445 }
 0x270   :  { %v405_v32 = vpop.permute.xlu2 %404 }
 0x278   :  { %v466_v35 = vpop.permute.xlu0 %465  ;;  %v423_v36 = vpop.permute.xlu2 %422 }
 0x279   :  { %v481_v44 = vsel %vm432_vm4, %v477_v43, %v466_v35 }
 0x280   :  { %v419_v37 = vpop.permute.xlu1 %418  ;;  %v5250_v40 = vpop.permute.xlu2 %5249 }
 0x281   :  { %v468_v41 = vpop.permute.xlu0 %467  ;;  %v434_v58 = vsel %vm432_vm4, %v429_v15, %v419_v37  ;;  %v5251_v29 = vunpack.i.l.bf16 %v5250_v40 }
 0x282   :  { %v482_v42 = vsel %vm432_vm4, %v478_v39, %v468_v41 }
 0x283   :  { %5014 = vmatpush.xpose.msk.msra.mxu2 %vm529_vm3, %v482_v42 }
 0x287   :  { %5015 = vmatpush.xpose.msk.msra.mxu2 %vm529_vm3, %v481_v44 }
 0x288   :  { %v470_v47 = vpop.permute.xlu1 %469  ;;  %v737_v48 = vpop.permute.xlu2 %736 }
 0x289   :  { %v460_v49 = vpop.permute.xlu0 %459 }
 0x28a   :  { %v480_v51 = vsel %vm64_vm1, %v448_v12, %v460_v49  ;;  %5016 = vmatmul.msk.f32.vlgmr.msra.gmra.mxu2 %vm529_vm3, %v433_v50  ;;  %v430_v12 = vsel %vm64_vm1, %v6047_v30, %v405_v32  ;;  %v5252_v32 = vunpack.i.h.bf16 %v5250_v40 }
 0x28b   :  { %v484_v52 = vsel %vm432_vm4, %v480_v51, %v472_v33 }
 0x28c   :  { %5018 = vmatpush.xpose.msk.msrb.mxu3 %vm529_vm3, %v484_v52 }
 0x290   :  { %v749_v57 = vpop.permute.xlu2 %748  ;;  %v407_v19 = vpop.permute.xlu1 %406 }
 0x291   :  { %v458_v46 = vpop.permute.xlu0 %457  ;;  %v431_v28 = vsel %vm64_vm1, %v6049_v63, %v407_v19  ;;  %v771_v45 = vsel %vm64_vm1, %v737_v48, %v749_v57 }
 0x292   :  { %v479_v18 = vsel %vm64_vm1, %v446_v13, %v458_v46  ;;  %5017 = vmatmul.msk.f32.gmra.mxu2 %vm529_vm3, %v434_v58  ;;  %v436_v41 = vsel %vm432_vm4, %v431_v28, %v423_v36 }
 0x293   :  { %v483_v20 = vsel %vm432_vm4, %v479_v18, %v470_v47 }
 0x294   :  { %5019 = vmatpush.xpose.msk.msrb.mxu3 %vm529_vm3, %v483_v20 }
 0x298   :  { %v761_v22 = vpop.permute.xlu2 %760  ;;  %v5245_v27 = vpop.permute.xlu1 %5244 }
 0x299   :  { %v421_v24 = vpop.permute.xlu0 %420  ;;  %v5246_v13 = vunpack.i.l.bf16 %v5245_v27  ;;  %v5247_v31 = vunpack.i.h.bf16 %v5245_v27  ;;  %v775_v49 = vsel %vm432_vm4, %v771_v45, %v761_v22 }
 0x29a   :  { %v435_v26 = vsel %vm432_vm4, %v430_v12, %v421_v24 }
 0x29b   :  { %5020 = vmatmul.msk.f32.vlgmr.msrb.gmra.mxu3 %vm529_vm3, %v435_v26  ;;  %v522_v42 = vsel %vm64_vm1, %v5246_v13, %v5251_v29  ;;  %v521_v44 = vsel %vm64_vm1, %v5247_v31, %v5252_v32 }
 0x2a0   :  { %v5260_v33 = vpop.permute.xlu2 %5259  ;;  %v735_v50 = vpop.permute.xlu1 %734 }
 0x2a1   :  { %v5255_v35 = vpop.permute.xlu0 %5254  ;;  %v5261_v58 = vunpack.i.l.bf16 %v5260_v33  ;;  %v5262_v24 = vunpack.i.h.bf16 %v5260_v33 }
 0x2a2   :  { %v5257_v37 = vunpack.i.h.bf16 %v5255_v35  ;;  %v5256_v39 = vunpack.i.l.bf16 %v5255_v35 }
 0x2a3   :  { %5021 = vmatmul.msk.f32.gmra.mxu3 %vm529_vm3, %v436_v41 }
 0x2a4   :  { %v526_v43 = vsel %vm432_vm4, %v522_v42, %v5256_v39  ;;  %v525_v47 = vsel %vm432_vm4, %v521_v44, %v5257_v37 }
 0x2a5   :  { %664 = vmatpush.msrb.mxu2 %v526_v43 }
 0x2a7   :  { %665 = vmatpush.msrb.mxu2 %v525_v47 }
 0x2a8   :  { %v5265_v36 = vpop.permute.xlu2 %5264  ;;  %v6209_v48 = vpop.permute.xlu1 %714 }
 0x2a9   :  { %5026 = vmatpush.xpose.msk.msra.mxu2 %vm529_vm3, %v775_v49  ;;  %v747_v40 = vpop.permute.xlu0 %746  ;;  %v5266_v57 = vunpack.i.l.bf16 %v5265_v36  ;;  %v5267_v18 = vunpack.i.h.bf16 %v5265_v36 }
 0x2aa   :  { %v770_v51 = vsel %vm64_vm1, %v735_v50, %v747_v40 }
 0x2ab   :  { %v524_v26 = vsel %vm64_vm1, %v5261_v58, %v5266_v57  ;;  %v523_v28 = vsel %vm64_vm1, %v5262_v24, %v5267_v18 }
 0x2b0   :  { %v759_v52 = vpop.permute.xlu2 %758  ;;  %v6216_v13 = vpop.permute.xlu1 %716 }
 0x2b1   :  { %v6205_v15 = vpop.permute.xlu0 %702  ;;  %v774_v46 = vsel %vm432_vm4, %v770_v51, %v759_v52 }
 0x2b2   :  { %5027 = vmatpush.xpose.msk.msra.mxu2 %vm529_vm3, %v774_v46 }
 0x2b8   :  { %v5270_v19 = vpop.permute.xlu2 %5269  ;;  %v753_v35 = vpop.permute.xlu1 %752 }
 0x2b9   :  { %v6211_v20 = vpop.permute.xlu0 %704  ;;  %v5272_v12 = vunpack.i.h.bf16 %v5270_v19  ;;  %v5271_v22 = vunpack.i.l.bf16 %v5270_v19 }
 0x2bb   :  { %v528_v27 = vsel %vm432_vm4, %v524_v26, %v5271_v22  ;;  %v527_v29 = vsel %vm432_vm4, %v523_v28, %v5272_v12 }
 0x2bc   :  { %693 = vmatpush.msra.mxu3 %v528_v27 }
 0x2be   :  { %694 = vmatpush.msra.mxu3 %v527_v29 }
 0x2c0   :  { %v739_v40 = vpop.permute.xlu1 %738 }
 0x2c1   :  { %v741_v31 = vpop.permute.xlu0 %740 }
 0x2c2   :  { %v773_v37 = vsel %vm64_vm1, %v741_v31, %v753_v35 }
 0x2c9   :  { %v765_v39 = vpop.permute.xlu0 %764 }
 0x2ca   :  { %v777_v41 = vsel %vm432_vm4, %v773_v37, %v765_v39 }
 0x2cb   :  { %5030 = vmatpush.xpose.msk.msrb.mxu3 %vm529_vm3, %v777_v41 }
 0x2d1   :  { %v751_v36 = vpop.permute.xlu0 %750 }
 0x2d2   :  { %v772_v39 = vsel %vm64_vm1, %v739_v40, %v751_v36 }
 0x30d   :  { %v559_v33 = vpop.f32.mrf.mxu2 }
 0x30e   :  { %v600_v32 = vsel %vm306_vm2, %v559_v33, -inf }
 0x30f   :  { %601 = vmax.xlane.f32.xlu0 %v600_v32 }
 0x315   :  { %v562_v42 = vpop.f32.mrf.mxu2 }
 0x316   :  { %v603_v43 = vsel %vm306_vm2, %v562_v42, -inf }
 0x317   :  { %604 = vmax.xlane.f32.xlu1 %v603_v43 }
 0x31e   :  { %v594_v44 = vpop.f32.mrf.mxu3 }
 0x31f   :  { %v606_v45 = vsel %vm306_vm2, %v594_v44, -inf }
 0x320   :  { %607 = vmax.xlane.f32.xlu2 %v606_v45 }
 0x323   :  { %718 = vrot.lane.b32.xlu0 %v6087_v6, %s5728_s16 }
 0x326   :  { %v597_v47 = vpop.f32.mrf.mxu3 }
 0x327   :  { %v609_v49 = vsel %vm306_vm2, %v597_v47, -inf }
 0x328   :  { %610 = vmax.xlane.f32.xlu2 %v609_v49 }
 0x330   :  { %762 = vrot.lane.b32.xlu1 %v6087_v6, %s5729_s17 }
 0x340   :  { %706 = vrot.lane.b32.xlu2 %v6047_v30, %s5736_s24 }
 0x382   :  { %v602_v50 = vpop.xlane.xlu0 %601 }
 0x383   :  { %v612_v51 = vsub.f32 %v559_v33, %v602_v50 }
 0x385   :  { %v616_v52 = vmul.f32 1.442695, %v612_v51 }
 0x387   :  { %5529 = vpow2.f32 %v616_v52 }
 0x38a   :  { %v605_v46 = vpop.xlane.xlu1 %604 }
 0x38b   :  { %v613_v57 = vsub.f32 %v562_v42, %v605_v46 }
 0x38d   :  { %v6232_v58 = vpop.eup %5529  ;;  %v618_v18 = vmul.f32 1.442695, %v613_v57 }
 0x38e   :  { %v624_v19 = vsel %vm306_vm2, %v6232_v58, 0.0 }
 0x38f   :  { %5531 = vpow2.f32 %v618_v18  ;;  %625 = vadd.xlane.f32.xlu0 %v624_v19 }
 0x393   :  { %v608_v12 = vpop.xlane.xlu2 %607 }
 0x394   :  { %v614_v22 = vsub.f32 %v594_v44, %v608_v12 }
 0x395   :  { %v6236_v24 = vpop.eup %5531  ;;  %v719_v43 = vpop.permute.xlu0 %718 }
 0x396   :  { %v620_v26 = vmul.f32 1.442695, %v614_v22  ;;  %v627_v27 = vsel %vm306_vm2, %v6236_v24, 0.0 }
 0x397   :  { %628 = vadd.xlane.f32.xlu1 %v627_v27 }
 0x398   :  { %5533 = vpow2.f32 %v620_v26 }
 0x39b   :  { %v611_v28 = vpop.xlane.xlu2 %610 }
 0x39c   :  { %v615_v29 = vsub.f32 %v597_v47, %v611_v28 }
 0x39e   :  { %v6240_v31 = vpop.eup %5533  ;;  %v622_v35 = vmul.f32 1.442695, %v615_v29 }
 0x39f   :  { %v630_v37 = vsel %vm306_vm2, %v6240_v31, 0.0 }
 0x3a0   :  { %5535 = vpow2.f32 %v622_v35  ;;  %631 = vadd.xlane.f32.xlu0 %v630_v37 }
 0x3a2   :  { %v763_v41 = vpop.permute.xlu1 %762 }
 0x3a3   :  { %v776_v33 = vsel %vm432_vm4, %v772_v39, %v763_v41  ;;  %v707_v50 = vpop.permute.xlu2 %706 }
 0x3a4   :  { %5031 = vmatpush.xpose.msk.msrb.mxu3 %vm529_vm3, %v776_v33 }
 0x3a6   :  { %v6247_v32 = vpop.eup %5535 }
 0x3a7   :  { %v633_v42 = vsel %vm306_vm2, %v6247_v32, 0.0 }
 0x3a8   :  { %634 = vadd.xlane.f32.xlu2 %v633_v42 }
 0x3b0   :  { %708 = vrot.lane.b32.xlu1 %v6049_v63, %s5736_s24 }
 0x3b4   :  { %720 = vrot.lane.b32.xlu0 %v6059_v0, %s5728_s16 }
 0x3b8   :  { %5274 = vrot.lane.b32.xlu1 %v6107_v8, %s8514_s25 }
 0x3bc   :  { %5284 = vrot.lane.b32.xlu0 %v6117_v10, %s5732_s20 }
 0x3c0   :  { %5279 = vrot.lane.b32.xlu2 %v6103_v7, %s8516_s21  ;;  %1026 = vrot.lane.b32.xlu1 %v6039_v62, %s5735_s23 }
 0x3c4   :  { %5299 = vrot.lane.b32.xlu0 %v6163_v25, %s5732_s20 }
 0x3c8   :  { %1028 = vrot.lane.b32.xlu2 %v6043_v23, %s5735_s23  ;;  %1006 = vrot.lane.b32.xlu1 %v6053_v38, %s5736_s24 }
 0x3cc   :  { %994 = vrot.lane.b32.xlu0 %v6039_v62, %s5730_s18 }
 0x3d0   :  { %1040 = vrot.lane.b32.xlu2 %v6061_v1, %s5734_s22  ;;  %1008 = vrot.lane.b32.xlu1 %v6061_v1, %s5736_s24 }
 0x3d4   :  { %996 = vrot.lane.b32.xlu0 %v6043_v23, %s5730_s18 }
 0x3d8   :  { %1052 = vrot.lane.b32.xlu2 %v6079_v5, %s5727_s27  ;;  %1044 = vrot.lane.b32.xlu1 %v6071_v3, %s5734_s22 }
 0x3dc   :  { %1032 = vrot.lane.b32.xlu0 %v6049_v63, %s5735_s23 }
 0x3e0   :  { %5289 = vrot.lane.b32.xlu2 %v6139_v11, %s8514_s25  ;;  %1030 = vrot.lane.b32.xlu1 %v6047_v30, %s5735_s23 }
 0x3e4   :  { %1056 = vrot.lane.b32.xlu0 %v6059_v0, %s5727_s27 }
 0x3e8   :  { %5294 = vrot.lane.b32.xlu2 %v6149_v21, %s8516_s21  ;;  %1054 = vrot.lane.b32.xlu1 %v6087_v6, %s5727_s27 }
 0x3ec   :  { %1042 = vrot.lane.b32.xlu0 %v6069_v2, %s5734_s22 }
 0x3f0   :  { %1038 = vrot.lane.b32.xlu2 %v6053_v38, %s5734_s22  ;;  %998 = vrot.lane.b32.xlu1 %v6047_v30, %s5730_s18 }
 0x3f4   :  { %1344 = vrot.lane.b32.xlu0 %v6061_v1, %s5735_s23 }
 0x3f8   :  { %1050 = vrot.lane.b32.xlu2 %v6073_v4, %s5727_s27  ;;  %1356 = vrot.lane.b32.xlu1 %v6079_v5, %s5734_s22 }
 0x3fc   :  { %1010 = vrot.lane.b32.xlu0 %v6069_v2, %s5736_s24 }
 0x400   :  { %1332 = vrot.lane.b32.xlu2 %v6043_v23, %s5732_s20  ;;  %1342 = vrot.lane.b32.xlu1 %v6053_v38, %s5735_s23 }
 0x402   :  { %v626_v44 = vpop.xlane.xlu0 %625 }
 0x403   :  { %5537 = vrcp.f32 %v626_v44 }
 0x404   :  { %1330 = vrot.lane.b32.xlu0 %v6039_v62, %s5732_s20 }
 0x408   :  { %1354 = vrot.lane.b32.xlu2 %v6073_v4, %s5734_s22  ;;  %1298 = vrot.lane.b32.xlu1 %v6053_v38, %s5730_s18 }
 0x409   :  { %v5538_v45 = vpop.eup %5537 }
 0x40a   :  { %v629_v47 = vpop.xlane.xlu1 %628  ;;  %v640_v49 = vmul.f32 %v5538_v45, %v6232_v58 }
 0x40b   :  { %5539 = vrcp.f32 %v629_v47 }
 0x40c   :  { %1286 = vrot.lane.b32.xlu0 %v6039_v62, %s5729_s17  ;;  %5022 = vmatmul.msk.f32.vlgmr.msrb.gmra.mxu2 %vm306_vm2, %v640_v49  ;;  %v726_v62 = vsel %vm64_vm1, %v6205_v15, %v6053_v38  ;;  %v727_v15 = vsel %vm64_vm1, %v6211_v20, %v6061_v1 }
 0x40d   :  { %v730_v46 = vsel %vm432_vm4, %v726_v62, %v6209_v48  ;;  %v731_v48 = vsel %vm432_vm4, %v727_v15, %v6216_v13 }
 0x410   :  { %1310 = vrot.lane.b32.xlu2 %v6073_v4, %s5736_s24  ;;  %1012 = vrot.lane.b32.xlu1 %v6071_v3, %s5736_s24 }
 0x411   :  { %v5540_v36 = vpop.eup %5539 }
 0x412   :  { %v641_v40 = vmul.f32 %v5540_v36, %v6236_v24  ;;  %v728_v24 = vsel %vm64_vm1, %v707_v50, %v6069_v2 }
 0x413   :  { %v632_v51 = vpop.xlane.xlu0 %631  ;;  %v732_v20 = vsel %vm432_vm4, %v728_v24, %v719_v43 }
 0x414   :  { %5541 = vrcp.f32 %v632_v51  ;;  %1000 = vrot.lane.b32.xlu0 %v6049_v63, %s5730_s18  ;;  %5023 = vmatmul.msk.f32.gmra.mxu2 %vm306_vm2, %v641_v40 }
 0x418   :  { %1288 = vrot.lane.b32.xlu2 %v6043_v23, %s5729_s17 }
 0x41a   :  { %v5542_v52 = vpop.eup %5541 }
 0x41b   :  { %v642_v57 = vmul.f32 %v5542_v52, %v6240_v31  ;;  %v635_v58 = vpop.xlane.xlu2 %634 }
 0x41c   :  { %5543 = vrcp.f32 %v635_v58  ;;  %1300 = vrot.lane.b32.xlu0 %v6061_v1, %s5730_s18  ;;  %5028 = vmatmul.msk.f32.vlgmr.msra.gmra.mxu2 %vm529_vm3, %v730_v46 }
 0x41d   :  { %5024 = vmatmul.msk.f32.vlgmr.msra.gmra.mxu3 %vm306_vm2, %v642_v57 }
 0x422   :  { %v5544_v23 = vpop.eup %5543  ;;  %v709_v18 = vpop.permute.xlu1 %708 }
 0x423   :  { %v5280_v19 = vpop.permute.xlu2 %5279  ;;  %v643_v12 = vmul.f32 %v5544_v23, %v6247_v32  ;;  %v729_v43 = vsel %vm64_vm1, %v709_v18, %v6071_v3 }
 0x424   :  { %5029 = vmatmul.msk.f32.gmra.mxu2 %vm529_vm3, %v731_v48  ;;  %v5281_v29 = vunpack.i.l.bf16 %v5280_v19  ;;  %v5282_v39 = vunpack.i.h.bf16 %v5280_v19 }
 0x425   :  { %5025 = vmatmul.msk.f32.gmra.mxu3 %vm306_vm2, %v643_v12 }
 0x426   :  { %v721_v22 = vpop.permute.xlu0 %720 }
 0x427   :  { %v733_v47 = vsel %vm432_vm4, %v729_v43, %v721_v22 }
 0x42a   :  { %v5275_v26 = vpop.permute.xlu1 %5274 }
 0x42b   :  { %v1029_v27 = vpop.permute.xlu2 %1028  ;;  %v5276_v28 = vunpack.i.l.bf16 %v5275_v26  ;;  %v5277_v31 = vunpack.i.h.bf16 %v5275_v26 }
 0x42d   :  { %5032 = vmatmul.msk.f32.vlgmr.msrb.gmra.mxu3 %vm529_vm3, %v732_v20  ;;  %v815_v41 = vsel %vm64_vm1, %v5276_v28, %v5281_v29  ;;  %v814_v42 = vsel %vm64_vm1, %v5277_v31, %v5282_v39 }
 0x42e   :  { %v5285_v13 = vpop.permute.xlu0 %5284 }
 0x42f   :  { %v5287_v35 = vunpack.i.h.bf16 %v5285_v13  ;;  %v5286_v37 = vunpack.i.l.bf16 %v5285_v13 }
 0x431   :  { %v819_v33 = vsel %vm432_vm4, %v815_v41, %v5286_v37  ;;  %v818_v45 = vsel %vm432_vm4, %v814_v42, %v5287_v35 }
 0x432   :  { %v1027_v32 = vpop.permute.xlu1 %1026  ;;  %956 = vmatpush.msrb.mxu2 %v819_v33 }
 0x433   :  { %v1041_v44 = vpop.permute.xlu2 %1040 }
 0x434   :  { %957 = vmatpush.msrb.mxu2 %v818_v45  ;;  %v1063_v40 = vsel %vm64_vm1, %v1029_v27, %v1041_v44 }
 0x435   :  { %5033 = vmatmul.msk.f32.gmra.mxu3 %vm529_vm3, %v733_v47 }
 0x436   :  { %v5300_v49 = vpop.permute.xlu0 %5299 }
 0x437   :  { %v5301_v12 = vunpack.i.l.bf16 %v5300_v49  ;;  %v5302_v27 = vunpack.i.h.bf16 %v5300_v49 }
 0x43a   :  { %v6361_v36 = vpop.permute.xlu1 %1006 }
 0x43b   :  { %v1053_v50 = vpop.permute.xlu2 %1052 }
 0x43c   :  { %v1067_v51 = vsel %vm432_vm4, %v1063_v40, %v1053_v50 }
 0x43d   :  { %5038 = vmatpush.xpose.msk.msra.mxu2 %vm529_vm3, %v1067_v51 }
 0x43e   :  { %v6366_v62 = vpop.permute.xlu0 %994 }
 0x442   :  { %v6368_v52 = vpop.permute.xlu1 %1008 }
 0x443   :  { %v5290_v46 = vpop.permute.xlu2 %5289 }
 0x444   :  { %v5292_v23 = vunpack.i.h.bf16 %v5290_v46  ;;  %v5291_v18 = vunpack.i.l.bf16 %v5290_v46 }
 0x446   :  { %v6370_v57 = vpop.permute.xlu0 %996 }
 0x44a   :  { %v1045_v58 = vpop.permute.xlu1 %1044 }
 0x44b   :  { %v5295_v15 = vpop.permute.xlu2 %5294 }
 0x44c   :  { %v5297_v19 = vunpack.i.h.bf16 %v5295_v15  ;;  %v5296_v48 = vunpack.i.l.bf16 %v5295_v15 }
 0x44e   :  { %v1033_v22 = vpop.permute.xlu0 %1032  ;;  %v817_v24 = vsel %vm64_vm1, %v5291_v18, %v5296_v48  ;;  %v816_v26 = vsel %vm64_vm1, %v5292_v23, %v5297_v19 }
 0x44f   :  { %v821_v20 = vsel %vm432_vm4, %v817_v24, %v5301_v12  ;;  %v820_v28 = vsel %vm432_vm4, %v816_v26, %v5302_v27  ;;  %v1065_v13 = vsel %vm64_vm1, %v1033_v22, %v1045_v58 }
 0x450   :  { %985 = vmatpush.msra.mxu3 %v821_v20 }
 0x452   :  { %986 = vmatpush.msra.mxu3 %v820_v28  ;;  %v1031_v29 = vpop.permute.xlu1 %1030 }
 0x453   :  { %v1039_v31 = vpop.permute.xlu2 %1038 }
 0x454   :  { %v1062_v41 = vsel %vm64_vm1, %v1027_v32, %v1039_v31 }
 0x456   :  { %v1057_v35 = vpop.permute.xlu0 %1056 }
 0x457   :  { %v1069_v37 = vsel %vm432_vm4, %v1065_v13, %v1057_v35 }
 0x458   :  { %5042 = vmatpush.xpose.msk.msrb.mxu3 %vm529_vm3, %v1069_v37 }
 0x45a   :  { %v1055_v39 = vpop.permute.xlu1 %1054 }
 0x45b   :  { %v1051_v33 = vpop.permute.xlu2 %1050 }
 0x45c   :  { %v1066_v42 = vsel %vm432_vm4, %v1062_v41, %v1051_v33 }
 0x45d   :  { %5039 = vmatpush.xpose.msk.msra.mxu2 %vm529_vm3, %v1066_v42 }
 0x45e   :  { %v1043_v43 = vpop.permute.xlu0 %1042 }
 0x45f   :  { %v1064_v44 = vsel %vm64_vm1, %v1031_v29, %v1043_v43 }
 0x460   :  { %v1068_v45 = vsel %vm432_vm4, %v1064_v44, %v1055_v39 }
 0x461   :  { %5043 = vmatpush.xpose.msk.msrb.mxu3 %vm529_vm3, %v1068_v45 }
 0x462   :  { %v6385_v47 = vpop.permute.xlu1 %998 }
 0x463   :  { %v1333_v40 = vpop.permute.xlu2 %1332 }
 0x466   :  { %v1345_v49 = vpop.permute.xlu0 %1344 }
 0x467   :  { %v1367_v50 = vsel %vm64_vm1, %v1333_v40, %v1345_v49 }
 0x46a   :  { %v1357_v51 = vpop.permute.xlu1 %1356 }
 0x46b   :  { %v1371_v32 = vsel %vm432_vm4, %v1367_v50, %v1357_v51  ;;  %v1355_v15 = vpop.permute.xlu2 %1354 }
 0x46c   :  { %5050 = vmatpush.xpose.msk.msrb.mxu0 %vm529_vm3, %v1371_v32 }
 0x46e   :  { %v6390_v46 = vpop.permute.xlu0 %1010 }
 0x472   :  { %v1343_v58 = vpop.permute.xlu1 %1342 }
 0x473   :  { %v1311_v22 = vpop.permute.xlu2 %1310 }
 0x476   :  { %v1331_v23 = vpop.permute.xlu0 %1330 }
 0x477   :  { %v1366_v18 = vsel %vm64_vm1, %v1331_v23, %v1343_v58 }
 0x478   :  { %v1370_v19 = vsel %vm432_vm4, %v1366_v18, %v1355_v15 }
 0x479   :  { %5051 = vmatpush.xpose.msk.msrb.mxu0 %vm529_vm3, %v1370_v19 }
 0x47a   :  { %v1299_v48 = vpop.permute.xlu1 %1298 }
 0x47e   :  { %v1287_v12 = vpop.permute.xlu0 %1286 }
 0x47f   :  { %v1322_v24 = vsel %vm64_vm1, %v1287_v12, %v1299_v48 }
 0x480   :  { %v1326_v26 = vsel %vm432_vm4, %v1322_v24, %v1311_v22 }
 0x481   :  { %5052 = vmatmul.msk.f32.vlgmr.msrb.gmra.mxu0 %vm529_vm3, %v1326_v26 }
 0x482   :  { %v6420_v44 = vpop.permute.xlu1 %1012 }
 0x486   :  { %v6418_v43 = vpop.permute.xlu0 %1000 }
 0x48e   :  { %v1301_v45 = vpop.permute.xlu0 %1300 }
 0x48f   :  { %v6398_v27 = vpop.f32.mrf.mxu2 }
 0x497   :  { %v6400_v20 = vpop.f32.mrf.mxu2 }
 0x49f   :  { %v851_v28 = vpop.f32.mrf.mxu2 }
 0x4a0   :  { %v6402_v29 = vpop.f32.mrf.mxu3  ;;  %v892_v31 = vsel %vm306_vm2, %v851_v28, -inf }
 0x4a1   :  { %893 = vmax.xlane.f32.xlu1 %v892_v31 }
 0x4a7   :  { %v854_v13 = vpop.f32.mrf.mxu2 }
 0x4a8   :  { %v6405_v35 = vpop.f32.mrf.mxu3  ;;  %v895_v37 = vsel %vm306_vm2, %v854_v13, -inf }
 0x4a9   :  { %896 = vmax.xlane.f32.xlu0 %v895_v37 }
 0x4b0   :  { %v886_v39 = vpop.f32.mrf.mxu3 }
 0x4b1   :  { %v898_v41 = vsel %vm306_vm2, %v886_v39, -inf }
 0x4b2   :  { %899 = vmax.xlane.f32.xlu2 %v898_v41 }
 0x4b8   :  { %v889_v33 = vpop.f32.mrf.mxu3 }
 0x4b9   :  { %v901_v42 = vsel %vm306_vm2, %v889_v33, -inf }
 0x4ba   :  { %902 = vmax.xlane.f32.xlu1 %v901_v42 }
 0x4ca   :  { %1336 = vrot.lane.b32.xlu2 %v6049_v63, %s5732_s20 }
 0x4d2   :  { %1334 = vrot.lane.b32.xlu2 %v6047_v30, %s5732_s20 }
 0x4d3   :  { %1312 = vrot.lane.b32.xlu1 %v6079_v5, %s5736_s24 }
 0x4da   :  { %1290 = vrot.lane.b32.xlu2 %v6047_v30, %s5729_s17 }
 0x514   :  { %v894_v49 = vpop.xlane.xlu1 %893 }
 0x515   :  { %v904_v40 = vsub.f32 %v851_v28, %v894_v49  ;;  %v1289_v28 = vpop.permute.xlu2 %1288 }
 0x516   :  { %v1323_v31 = vsel %vm64_vm1, %v1289_v28, %v1301_v45 }
 0x517   :  { %v908_v50 = vmul.f32 1.442695, %v904_v40  ;;  %v6446_v40 = vpop.f32.mrf.mxu0 }
 0x519   :  { %5545 = vpow2.f32 %v908_v50 }
 0x51c   :  { %v897_v51 = vpop.xlane.xlu0 %896 }
 0x51d   :  { %v905_v32 = vsub.f32 %v854_v13, %v897_v51 }
 0x51f   :  { %v5546_v58 = vpop.eup %5545  ;;  %v910_v15 = vmul.f32 1.442695, %v905_v32 }
 0x520   :  { %v916_v23 = vsel %vm306_vm2, %v5546_v58, 0.0 }
 0x521   :  { %5547 = vpow2.f32 %v910_v15  ;;  %917 = vadd.xlane.f32.xlu0 %v916_v23 }
 0x525   :  { %v900_v41 = vpop.xlane.xlu2 %899 }
 0x527   :  { %v5548_v18 = vpop.eup %5547 }
 0x528   :  { %v919_v19 = vsel %vm306_vm2, %v5548_v18, 0.0 }
 0x529   :  { %920 = vadd.xlane.f32.xlu1 %v919_v19 }
 0x52d   :  { %v903_v48 = vpop.xlane.xlu1 %902 }
 0x52e   :  { %v907_v12 = vsub.f32 %v889_v33, %v903_v48  ;;  %v906_v33 = vsub.f32 %v886_v39, %v900_v41  ;;  %v1488_v39 = vsel %vm306_vm2, %v6446_v40, -inf  ;;  %v1018_v48 = vsel %vm64_vm1, %v6366_v62, %v6361_v36 }
 0x530   :  { %v914_v22 = vmul.f32 1.442695, %v907_v12  ;;  %v912_v42 = vmul.f32 1.442695, %v906_v33  ;;  %v1022_v12 = vsel %vm432_vm4, %v1018_v48, %v6073_v4 }
 0x532   :  { %5549 = vpow2.f32 %v914_v22 }
 0x533   :  { %5551 = vpow2.f32 %v912_v42 }
 0x535   :  { %1348 = vrot.lane.b32.xlu0 %v6071_v3, %s5735_s23 }
 0x538   :  { %v6426_v24 = vpop.eup %5549 }
 0x539   :  { %v925_v26 = vsel %vm306_vm2, %v6426_v24, 0.0  ;;  %v5552_v45 = vpop.eup %5551 }
 0x53a   :  { %926 = vadd.xlane.f32.xlu2 %v925_v26  ;;  %v922_v49 = vsel %vm306_vm2, %v5552_v45, 0.0  ;;  %v1337_v26 = vpop.permute.xlu2 %1336 }
 0x542   :  { %1360 = vrot.lane.b32.xlu1 %v6059_v0, %s5734_s22  ;;  %v1335_v36 = vpop.permute.xlu2 %1334 }
 0x545   :  { %v1313_v13 = vpop.permute.xlu1 %1312 }
 0x546   :  { %v1327_v37 = vsel %vm432_vm4, %v1323_v31, %v1313_v13 }
 0x547   :  { %5053 = vmatmul.msk.f32.gmra.mxu0 %vm529_vm3, %v1327_v37 }
 0x54a   :  { %1358 = vrot.lane.b32.xlu1 %v6087_v6, %s5734_s22 }
 0x552   :  { %1292 = vrot.lane.b32.xlu2 %v6049_v63, %s5729_s17  ;;  %1314 = vrot.lane.b32.xlu1 %v6087_v6, %s5736_s24 }
 0x55a   :  { %1316 = vrot.lane.b32.xlu1 %v6059_v0, %s5736_s24 }
 0x55f   :  { %923 = vadd.xlane.f32.xlu0 %v922_v49 }
 0x573   :  { %1346 = vrot.lane.b32.xlu0 %v6069_v2, %s5735_s23 }
 0x57b   :  { %1489 = vmax.xlane.f32.xlu2 %v1488_v39  ;;  %1302 = vrot.lane.b32.xlu0 %v6069_v2, %s5730_s18 }
 0x583   :  { %1304 = vrot.lane.b32.xlu0 %v6071_v3, %s5730_s18 }
 0x594   :  { %v918_v50 = vpop.xlane.xlu0 %917 }
 0x595   :  { %5553 = vrcp.f32 %v918_v50 }
 0x59b   :  { %v5554_v51 = vpop.eup %5553 }
 0x59c   :  { %v932_v32 = vmul.f32 %v5554_v51, %v5546_v58  ;;  %v921_v15 = vpop.xlane.xlu1 %920  ;;  %v1019_v58 = vsel %vm64_vm1, %v6370_v57, %v6368_v52  ;;  %v1291_v57 = vpop.permute.xlu2 %1290 }
 0x59d   :  { %5555 = vrcp.f32 %v921_v15  ;;  %v1023_v13 = vsel %vm432_vm4, %v1019_v58, %v6079_v5 }
 0x59e   :  { %5034 = vmatmul.msk.f32.vlgmr.msrb.gmra.mxu2 %vm306_vm2, %v932_v32 }
 0x5a3   :  { %v5556_v23 = vpop.eup %5555 }
 0x5a4   :  { %v933_v19 = vmul.f32 %v5556_v23, %v5548_v18 }
 0x5a6   :  { %5035 = vmatmul.msk.f32.gmra.mxu2 %vm306_vm2, %v933_v19 }
 0x5a7   :  { %v1349_v22 = vpop.permute.xlu0 %1348 }
 0x5a8   :  { %v1369_v28 = vsel %vm64_vm1, %v1337_v26, %v1349_v22 }
 0x5ad   :  { %v927_v41 = vpop.xlane.xlu2 %926 }
 0x5ae   :  { %5040 = vmatmul.msk.f32.vlgmr.msra.gmra.mxu2 %vm529_vm3, %v1022_v12 }
 0x5b4   :  { %v1361_v18 = vpop.permute.xlu1 %1360 }
 0x5b5   :  { %v1373_v31 = vsel %vm432_vm4, %v1369_v28, %v1361_v18 }
 0x5b6   :  { %5041 = vmatmul.msk.f32.gmra.mxu2 %vm529_vm3, %v1023_v13  ;;  %5054 = vmatpush.xpose.msk.msra.mxu0 %vm529_vm3, %v1373_v31 }
 0x5b7   :  { %5219 = vmatpush.xpose.msk.msrb.mxu1 %vm529_vm3, %v1373_v31 }
 0x5bc   :  { %v1359_v39 = vpop.permute.xlu1 %1358 }
 0x5c4   :  { %v6472_v62 = vpop.f32.mrf.mxu0 }
 0x5c5   :  { %v1491_v52 = vsel %vm306_vm2, %v6472_v62, -inf }
 0x5c6   :  { %1492 = vmax.xlane.f32.xlu2 %v1491_v52 }
 0x5d2   :  { %v924_v37 = vpop.xlane.xlu0 %923 }
 0x5d3   :  { %5557 = vrcp.f32 %v924_v37 }
 0x5d4   :  { %5559 = vrcp.f32 %v927_v41 }
 0x5d9   :  { %v5558_v33 = vpop.eup %5557 }
 0x5da   :  { %v934_v42 = vmul.f32 %v5558_v33, %v5552_v45  ;;  %v5560_v49 = vpop.eup %5559  ;;  %v1020_v45 = vsel %vm64_vm1, %v6385_v47, %v6390_v46  ;;  %v1021_v47 = vsel %vm64_vm1, %v6418_v43, %v6420_v44 }
 0x5db   :  { %v935_v50 = vmul.f32 %v5560_v49, %v6426_v24  ;;  %v1024_v23 = vsel %vm432_vm4, %v1020_v45, %v6087_v6  ;;  %v1315_v24 = vpop.permute.xlu1 %1314  ;;  %v1025_v22 = vsel %vm432_vm4, %v1021_v47, %v6059_v0  ;;  %v5318_v49 = vpack.i.bf16 %v6061_v1, %v6049_v63 }
 0x5dc   :  { %5036 = vmatmul.msk.f32.vlgmr.msra.gmra.mxu3 %vm306_vm2, %v934_v42  ;;  %v5323_v42 = vpack.i.bf16 %v6079_v5, %v6071_v3 }
 0x5de   :  { %5314 = vrot.lane.b32.xlu2 %v6117_v10, %s8516_s21  ;;  %v1293_v10 = vpop.permute.xlu2 %1292 }
 0x5e3   :  { %v1317_v26 = vpop.permute.xlu1 %1316 }
 0x5e4   :  { %5037 = vmatmul.msk.f32.gmra.mxu3 %vm306_vm2, %v935_v50 }
 0x5e5   :  { %v1347_v51 = vpop.permute.xlu0 %1346 }
 0x5e6   :  { %v1368_v32 = vsel %vm64_vm1, %v1335_v36, %v1347_v51 }
 0x5e7   :  { %v1372_v15 = vsel %vm432_vm4, %v1368_v32, %v1359_v39 }
 0x5e8   :  { %5055 = vmatpush.xpose.msk.msra.mxu0 %vm529_vm3, %v1372_v15  ;;  %5220 = vmatpush.xpose.msk.msrb.mxu1 %vm529_vm3, %v1372_v15 }
 0x5ec   :  { %5044 = vmatmul.msk.f32.vlgmr.msrb.gmra.mxu3 %vm529_vm3, %v1024_v23 }
 0x5ed   :  { %v1303_v19 = vpop.permute.xlu0 %1302 }
 0x5ee   :  { %v1324_v48 = vsel %vm64_vm1, %v1291_v57, %v1303_v19  ;;  %v1490_v46 = vpop.xlane.xlu2 %1489  ;;  %v5338_v19 = vpack.i.bf16 %v6053_v38, %v6047_v30 }
 0x5ef   :  { %v1328_v12 = vsel %vm432_vm4, %v1324_v48, %v1315_v24  ;;  %v1500_v6 = vsub.f32 %v6446_v40, %v1490_v46  ;;  %v5343_v48 = vpack.i.bf16 %v6073_v4, %v6069_v2 }
 0x5f0   :  { %5056 = vmatmul.msk.f32.vlgmr.msra.gmra.mxu0 %vm529_vm3, %v1328_v12 }
 0x5f1   :  { %v1504_v31 = vmul.f32 1.442695, %v1500_v6 }
 0x5f3   :  { %5561 = vpow2.f32 %v1504_v31 }
 0x5f4   :  { %5045 = vmatmul.msk.f32.gmra.mxu3 %vm529_vm3, %v1025_v22 }
 0x5f5   :  { %v1305_v58 = vpop.permute.xlu0 %1304 }
 0x5f6   :  { %v1325_v28 = vsel %vm64_vm1, %v1293_v10, %v1305_v58 }
 0x5f7   :  { %v1329_v18 = vsel %vm432_vm4, %v1325_v28, %v1317_v26 }
 0x5f8   :  { %5057 = vmatmul.msk.f32.vlgmr.msrb.gmra.mxu1 %vm529_vm3, %v1329_v18 }
 0x5f9   :  { %v6504_v43 = vpop.eup %5561 }
 0x5fa   :  { %v1512_v44 = vsel %vm306_vm2, %v6504_v43, 0.0 }
 0x607   :  { %1513 = vadd.xlane.f32.xlu2 %v1512_v44 }
 0x621   :  { %v6508_v0 = vpop.f32.mrf.mxu2 }
 0x629   :  { %v6510_v13 = vpop.f32.mrf.mxu2 }
 0x631   :  { %v1143_v40 = vpop.f32.mrf.mxu2 }
 0x632   :  { %v1184_v36 = vsel %vm306_vm2, %v1143_v40, -inf }
 0x633   :  { %1185 = vmax.xlane.f32.xlu2 %v1184_v36 }
 0x639   :  { %v1493_v33 = vpop.xlane.xlu2 %1492  ;;  %v6546_v45 = vpop.f32.mrf.mxu2 }
 0x63a   :  { %v1187_v10 = vsel %vm306_vm2, %v6546_v45, -inf  ;;  %v1501_v12 = vsub.f32 %v6472_v62, %v1493_v33 }
 0x63c   :  { %v1506_v47 = vmul.f32 1.442695, %v1501_v12 }
 0x641   :  { %v5315_v39 = vpop.permute.xlu2 %5314 }
 0x642   :  { %v5316_v62 = vunpack.i.l.bf16 %v5315_v39  ;;  %v5317_v36 = vunpack.i.h.bf16 %v5315_v39 }
 0x64b   :  { %5329 = vrot.lane.b32.xlu2 %v6107_v8, %s8507_s1 }
 0x66d   :  { %v1482_v52 = vpop.f32.mrf.mxu0 }
 0x66e   :  { %v1494_v57 = vsel %vm306_vm2, %v1482_v52, -inf }
 0x66f   :  { %1495 = vmax.xlane.f32.xlu1 %v1494_v57 }
 0x675   :  { %v6516_v37 = vpop.f32.mrf.mxu1 }
 0x676   :  { %v1497_v41 = vsel %vm306_vm2, %v6516_v37, -inf }
 0x677   :  { %1498 = vmax.xlane.f32.xlu0 %v1497_v41 }
 0x67a   :  { %v6532_v50 = vpop.xlane.xlu2 %1513 }
 0x688   :  { %5304 = vrot.lane.b32.xlu1 %v6107_v8, %s8512_s26  ;;  %v6534_v8 = vpop.f32.mrf.mxu3 }
 0x68b   :  { %5309 = vrot.lane.b32.xlu0 %v6103_v7, %s8514_s25 }
 0x690   :  { %5324 = vrot.lane.b32.xlu1 %v5323_v42, %s8514_s25  ;;  %v6536_v3 = vpop.f32.mrf.mxu3 }
 0x693   :  { %5319 = vrot.lane.b32.xlu0 %v5318_v49, %s8512_s26 }
 0x698   :  { %v6542_v1 = vpop.f32.mrf.mxu3 }
 0x699   :  { %v1190_v15 = vsel %vm306_vm2, %v6542_v1, -inf }
 0x69b   :  { %5334 = vrot.lane.b32.xlu0 %v6163_v25, %s8516_s21 }
 0x6a0   :  { %v6550_v23 = vpop.f32.mrf.mxu3 }
 0x6a1   :  { %v1193_v24 = vsel %vm306_vm2, %v6550_v23, -inf }
 0x6a6   :  { %v1186_v7 = vpop.xlane.xlu2 %1185 }
 0x6a7   :  { %v1196_v51 = vsub.f32 %v1143_v40, %v1186_v7 }
 0x6a9   :  { %v1200_v32 = vmul.f32 1.442695, %v1196_v51 }
 0x6ab   :  { %5563 = vpow2.f32 %v1200_v32 }
 0x6ac   :  { %5565 = vpow2.f32 %v1506_v47 }
 0x6ae   :  { %v5330_v57 = vpop.permute.xlu2 %5329 }
 0x6af   :  { %v5331_v49 = vunpack.i.l.bf16 %v5330_v57 }
 0x6b1   :  { %v6538_v5 = vpop.eup %5563 }
 0x6b2   :  { %v1208_v63 = vsel %vm306_vm2, %v6538_v5, 0.0  ;;  %v6563_v6 = vpop.eup %5565 }
 0x6b3   :  { %1209 = vadd.xlane.f32.xlu2 %v1208_v63  ;;  %v1515_v30 = vsel %vm306_vm2, %v6563_v6, 0.0 }
 0x6ba   :  { %1191 = vmax.xlane.f32.xlu1 %v1190_v15 }
 0x6c5   :  { %1188 = vmax.xlane.f32.xlu0 %v1187_v10 }
 0x6cd   :  { %1194 = vmax.xlane.f32.xlu0 %v1193_v24 }
 0x6d3   :  { %5339 = vrot.lane.b32.xlu1 %v5338_v19, %s8512_s26 }
 0x6e1   :  { %5344 = vrot.lane.b32.xlu0 %v5343_v48, %s8514_s25 }
 0x6e2   :  { %v1496_v46 = vpop.xlane.xlu1 %1495 }
 0x6e3   :  { %v1502_v58 = vsub.f32 %v1482_v52, %v1496_v46 }
 0x6e5   :  { %v1508_v38 = vmul.f32 1.442695, %v1502_v58 }
 0x6e7   :  { %5567 = vpow2.f32 %v1508_v38 }
 0x6ea   :  { %v6561_v22 = vpop.xlane.xlu0 %1498 }
 0x6ed   :  { %v6571_v51 = vpop.eup %5567 }
 0x6ee   :  { %v1518_v39 = vsel %vm306_vm2, %v6571_v51, 0.0 }
 0x6fa   :  { %v5305_v26 = vpop.permute.xlu1 %5304 }
 0x6fb   :  { %v5307_v2 = vunpack.i.h.bf16 %v5305_v26  ;;  %v5306_v4 = vunpack.i.l.bf16 %v5305_v26 }
 0x6fd   :  { %1516 = vadd.xlane.f32.xlu1 %v1515_v30  ;;  %v5310_v28 = vpop.permute.xlu0 %5309 }
 0x6fe   :  { %v5312_v18 = vunpack.i.h.bf16 %v5310_v28  ;;  %v5311_v31 = vunpack.i.l.bf16 %v5310_v28 }
 0x700   :  { %v1107_v44 = vsel %vm64_vm1, %v5306_v4, %v5311_v31  ;;  %v1106_v40 = vsel %vm64_vm1, %v5307_v2, %v5312_v18 }
 0x701   :  { %v1111_v52 = vsel %vm432_vm4, %v1107_v44, %v5316_v62  ;;  %v1110_v41 = vsel %vm432_vm4, %v1106_v40, %v5317_v36 }
 0x702   :  { %1248 = vmatpush.msrb.mxu2 %v1111_v52  ;;  %v5325_v33 = vpop.permute.xlu1 %5324 }
 0x703   :  { %v5327_v32 = vunpack.i.h.bf16 %v5325_v33  ;;  %v5326_v24 = vunpack.i.l.bf16 %v5325_v33 }
 0x704   :  { %1249 = vmatpush.msrb.mxu2 %v1110_v41 }
 0x705   :  { %v5320_v42 = vpop.permute.xlu0 %5319 }
 0x706   :  { %v5322_v7 = vunpack.i.h.bf16 %v5320_v42  ;;  %v5321_v10 = vunpack.i.l.bf16 %v5320_v42  ;;  %v5332_v42 = vunpack.i.h.bf16 %v5330_v57 }
 0x708   :  { %v1411_v63 = vsel %vm64_vm1, %v5331_v49, %v5322_v7  ;;  %v1109_v12 = vsel %vm64_vm1, %v5321_v10, %v5326_v24 }
 0x709   :  { %v1415_v15 = vsel %vm432_vm4, %v1411_v63, %v5327_v32 }
 0x70a   :  { %1552 = vmatpush.msra.mxu2 %v1415_v15 }
 0x70b   :  { %1519 = vadd.xlane.f32.xlu0 %v1518_v39 }
 0x70d   :  { %v5335_v19 = vpop.permute.xlu0 %5334 }
 0x70e   :  { %v5336_v48 = vunpack.i.l.bf16 %v5335_v19  ;;  %v5337_v63 = vunpack.i.h.bf16 %v5335_v19 }
 0x710   :  { %v1113_v47 = vsel %vm432_vm4, %v1109_v12, %v5336_v48 }
 0x711   :  { %1277 = vmatpush.msra.mxu3 %v1113_v47 }
 0x726   :  { %v1210_v46 = vpop.xlane.xlu2 %1209 }
 0x727   :  { %5569 = vrcp.f32 %v1210_v46 }
 0x72d   :  { %v5570_v58 = vpop.eup %5569  ;;  %v1192_v26 = vpop.xlane.xlu1 %1191 }
 0x72e   :  { %v1224_v30 = vmul.f32 %v5570_v58, %v6538_v5  ;;  %v1198_v38 = vsub.f32 %v6542_v1, %v1192_v26 }
 0x730   :  { %v1204_v28 = vmul.f32 1.442695, %v1198_v38  ;;  %5046 = vmatmul.msk.f32.vlgmr.msrb.gmra.mxu2 %vm306_vm2, %v1224_v30 }
 0x732   :  { %5571 = vpow2.f32 %v1204_v28 }
 0x738   :  { %v5572_v2 = vpop.eup %5571  ;;  %v1189_v4 = vpop.xlane.xlu0 %1188 }
 0x739   :  { %v1197_v18 = vsub.f32 %v6546_v45, %v1189_v4  ;;  %v1214_v31 = vsel %vm306_vm2, %v5572_v2, 0.0 }
 0x73a   :  { %1215 = vadd.xlane.f32.xlu1 %v1214_v31 }
 0x73b   :  { %v1202_v62 = vmul.f32 1.442695, %v1197_v18 }
 0x73d   :  { %5573 = vpow2.f32 %v1202_v62 }
 0x740   :  { %v1195_v44 = vpop.xlane.xlu0 %1194 }
 0x741   :  { %v1199_v40 = vsub.f32 %v6550_v23, %v1195_v44 }
 0x743   :  { %v5574_v36 = vpop.eup %5573  ;;  %v1206_v5 = vmul.f32 1.442695, %v1199_v40 }
 0x744   :  { %v1211_v1 = vsel %vm306_vm2, %v5574_v36, 0.0 }
 0x745   :  { %5575 = vpow2.f32 %v1206_v5  ;;  %1212 = vadd.xlane.f32.xlu0 %v1211_v1  ;;  %v5340_v33 = vpop.permute.xlu1 %5339 }
 0x746   :  { %v5342_v45 = vunpack.i.h.bf16 %v5340_v33  ;;  %v5341_v7 = vunpack.i.l.bf16 %v5340_v33 }
 0x748   :  { %v1410_v15 = vsel %vm64_vm1, %v5332_v42, %v5342_v45 }
 0x74b   :  { %v5576_v52 = vpop.eup %5575 }
 0x74c   :  { %v1217_v41 = vsel %vm306_vm2, %v5576_v52, 0.0 }
 0x74d   :  { %1218 = vadd.xlane.f32.xlu2 %v1217_v41 }
 0x753   :  { %5354 = vrot.lane.b32.xlu1 %v6149_v21, %s8512_s26  ;;  %v5345_v49 = vpop.permute.xlu0 %5344  ;;  %v1503_v21 = vsub.f32 %v6516_v37, %v6561_v22 }
 0x754   :  { %v5347_v32 = vunpack.i.h.bf16 %v5345_v49  ;;  %v5346_v23 = vunpack.i.l.bf16 %v5345_v49 }
 0x755   :  { %v1510_v57 = vmul.f32 1.442695, %v1503_v21 }
 0x756   :  { %v1414_v39 = vsel %vm432_vm4, %v1410_v15, %v5347_v32  ;;  %v1108_v10 = vsel %vm64_vm1, %v5341_v7, %v5346_v23  ;;  %v6628_v15 = vld [vmem:[%s8493_s2 + $0x10] sm:$0xff] }
 0x757   :  { %1553 = vmatpush.msra.mxu2 %v1414_v39  ;;  %v1112_v24 = vsel %vm432_vm4, %v1108_v10, %v5337_v63  ;;  %5577 = vpow2.f32 %v1510_v57 }
 0x758   :  { %1278 = vmatpush.msra.mxu3 %v1112_v24 }
 0x759   :  { %5359 = vrot.lane.b32.xlu0 %v6163_v25, %s8514_s25 }
 0x75d   :  { %v5578_v19 = vpop.eup %5577 }
 0x75e   :  { %v1521_v48 = vsel %vm306_vm2, %v5578_v19, 0.0 }
 0x761   :  { %1594 = vrot.lane.b32.xlu0 %v6508_v0, %s5728_s16 }
 0x765   :  { %5349 = vrot.lane.b32.xlu2 %v6139_v11, %s8507_s1  ;;  %s8511_s1 = smov 80  }
 0x769   :  { %1596 = vrot.lane.b32.xlu0 %v6510_v13, %s5728_s16 }
 0x770   :  { %v1517_v12 = vpop.xlane.xlu1 %1516 }
 0x77e   :  { %v1520_v47 = vpop.xlane.xlu0 %1519 }
 0x78e   :  { %1522 = vadd.xlane.f32.xlu2 %v1521_v48 }
 0x7a6   :  { %1600 = vrot.lane.b32.xlu2 %v6536_v3, %s5728_s16 }
 0x7ad   :  { %v1216_v25 = vpop.xlane.xlu1 %1215 }
 0x7ae   :  { %5579 = vrcp.f32 %v1216_v25 }
 0x7b3   :  { %v6606_v11 = vpop.f32.mrf.mxu2 }
 0x7b4   :  { %v5580_v46 = vpop.eup %5579  ;;  %1610 = vrot.lane.b32.xlu0 %v6606_v11, %s8520_s19 }
 0x7b5   :  { %v1226_v37 = vmul.f32 %v5580_v46, %v5572_v2 }
 0x7b7   :  { %5048 = vmatmul.msk.f32.vlgmr.msra.gmra.mxu3 %vm306_vm2, %v1226_v37 }
 0x7b8   :  { %v1213_v22 = vpop.xlane.xlu0 %1212 }
 0x7b9   :  { %5581 = vrcp.f32 %v1213_v22 }
 0x7ba   :  { %5583 = vrcp.f32 %v6532_v50 }
 0x7bf   :  { %v5582_v58 = vpop.eup %5581 }
 0x7c0   :  { %v1219_v26 = vpop.xlane.xlu2 %1218  ;;  %v1225_v30 = vmul.f32 %v5582_v58, %v5574_v36  ;;  %v5584_v38 = vpop.eup %5583 }
 0x7c1   :  { %5585 = vrcp.f32 %v1219_v26  ;;  %v1528_v4 = vmul.f32 %v5584_v38, %v6504_v43 }
 0x7c2   :  { %5047 = vmatmul.msk.f32.gmra.mxu2 %vm306_vm2, %v1225_v30  ;;  %5587 = vrcp.f32 %v1517_v12 }
 0x7c3   :  { %5589 = vrcp.f32 %v1520_v47 }
 0x7c5   :  { %v5355_v18 = vpop.permute.xlu1 %5354 }
 0x7c6   :  { %v5356_v50 = vunpack.i.l.bf16 %v5355_v18  ;;  %v5357_v33 = vunpack.i.h.bf16 %v5355_v18 }
 0x7c7   :  { %v5586_v28 = vpop.eup %5585 }
 0x7c8   :  { %v5350_v2 = vpop.permute.xlu2 %5349  ;;  %v1227_v31 = vmul.f32 %v5586_v28, %v5576_v52  ;;  %v5588_v36 = vpop.eup %5587 }
 0x7c9   :  { %v5351_v62 = vunpack.i.l.bf16 %v5350_v2  ;;  %v5352_v44 = vunpack.i.h.bf16 %v5350_v2  ;;  %v5590_v41 = vpop.eup %5589  ;;  %v1529_v7 = vmul.f32 %v5588_v36, %v6563_v6  ;;  %v6633_v6 = vld [vmem:[%s8493_s2] sm:$0xff]  ;;  %v305_v36 = vld [vmem:[%s8493_s2 + $0x18] sm:$0xff] }
 0x7ca   :  { %5049 = vmatmul.msk.f32.gmra.mxu3 %vm306_vm2, %v1227_v31  ;;  %5058 = vmatmul.msk.f32.vlgmr.msra.gmra.mxu2 %vm306_vm2, %v1528_v4  ;;  %v1530_v42 = vmul.f32 %v5590_v41, %v6571_v51  ;;  %v5363_v51 = vpack.i.bf16 %v6633_v6, %v6628_v15 }
 0x7cb   :  { %v5360_v40 = vpop.permute.xlu0 %5359  ;;  %v1413_v45 = vsel %vm64_vm1, %v5351_v62, %v5356_v50  ;;  %v1412_v52 = vsel %vm64_vm1, %v5352_v44, %v5357_v33  ;;  %v304_v44 = vld [vmem:[%s8493_s2 + $0x8] sm:$0xff]  ;;  %s8561_s2 = smov 88  }
 0x7cc   :  { %v5362_v5 = vunpack.i.h.bf16 %v5360_v40  ;;  %v5361_v1 = vunpack.i.l.bf16 %v5360_v40  ;;  %5364 = vrot.lane.b32.xlu1 %v5363_v51, %s8511_s1  ;;  %s8518_s1 = smov 64  }
 0x7ce   :  { %v1417_v43 = vsel %vm432_vm4, %v1413_v45, %v5361_v1  ;;  %v1416_v49 = vsel %vm432_vm4, %v1412_v52, %v5362_v5  ;;  %v5373_v5 = vpack.i.bf16 %v304_v44, %v6633_v6 }
 0x7cf   :  { %1581 = vmatpush.msrb.mxu3 %v1417_v43 }
 0x7d1   :  { %1582 = vmatpush.msrb.mxu3 %v1416_v49 }
 0x7d2   :  { %5059 = vmatmul.msk.f32.gmra.mxu2 %vm306_vm2, %v1529_v7  ;;  %5060 = vmatmul.msk.f32.vlgmr.msrb.gmra.mxu3 %vm306_vm2, %v1530_v42 }
 0x7d3   :  { %v1595_v46 = vpop.permute.xlu0 %1594 }
 0x7d4   :  { %v1638_v26 = vsel %vm64_vm1, %v6398_v27, %v1595_v46 }
 0x7db   :  { %v1597_v37 = vpop.permute.xlu0 %1596 }
 0x7dc   :  { %v1639_v18 = vsel %vm64_vm1, %v6400_v20, %v1597_v37 }
 0x801   :  { %v1523_v32 = vpop.xlane.xlu2 %1522 }
 0x802   :  { %5591 = vrcp.f32 %v1523_v32 }
 0x808   :  { %v5592_v23 = vpop.eup %5591 }
 0x809   :  { %v1531_v63 = vmul.f32 %v5592_v23, %v5578_v19  ;;  %v1601_v45 = vpop.permute.xlu2 %1600 }
 0x80a   :  { %v1641_v52 = vsel %vm64_vm1, %v6405_v35, %v1601_v45 }
 0x80b   :  { %5061 = vmatmul.msk.f32.gmra.mxu3 %vm306_vm2, %v1531_v63 }
 0x826   :  { %v1611_v58 = vpop.permute.xlu0 %1610 }
 0x827   :  { %v1642_v30 = vsel %vm432_vm4, %v1638_v26, %v1611_v58 }
 0x83a   :  { %v6638_v39 = vpop.f32.mrf.mxu3 }
 0x83b   :  { %1614 = vrot.lane.b32.xlu0 %v6638_v39, %s8520_s19 }
 0x83e   :  { %v5365_v12 = vpop.permute.xlu1 %5364 }
 0x83f   :  { %v5367_v25 = vunpack.i.h.bf16 %v5365_v12  ;;  %v5366_v47 = vunpack.i.l.bf16 %v5365_v12 }
 0x841   :  { %1808 = vmatpush.msrb.mxu0 %v5366_v47 }
 0x843   :  { %1809 = vmatpush.msrb.mxu0 %v5367_v25 }
 0x845   :  { %v6642_v10 = vpop.f32.mrf.mxu2 }
 0x846   :  { %1668 = vrot.lane.b32.xlu2 %v6642_v10, %s5728_s16  ;;  %1612 = vrot.lane.b32.xlu1 %v6642_v10, %s8520_s19 }
 0x84d   :  { %v1555_v24 = vpop.f32.mrf.mxu2  ;;  %v6651_v21 = vpop.f32.mrf.mxu3 }
 0x84e   :  { %1670 = vrot.lane.b32.xlu2 %v6638_v39, %s5728_s16  ;;  %1626 = vrot.lane.b32.xlu1 %v1555_v24, %s8509_s0 }
 0x855   :  { %v1558_v57 = vpop.f32.mrf.mxu2  ;;  %v1584_v19 = vpop.f32.mrf.mxu3 }
 0x856   :  { %1672 = vrot.lane.b32.xlu2 %v6651_v21, %s5728_s16  ;;  %1598 = vrot.lane.b32.xlu1 %v6534_v8, %s5728_s16 }
 0x857   :  { %1628 = vrot.lane.b32.xlu0 %v1558_v57, %s8509_s0 }
 0x85e   :  { %1714 = vrot.lane.b32.xlu2 %v6508_v0, %s5736_s24  ;;  %1630 = vrot.lane.b32.xlu1 %v1584_v19, %s8509_s0 }
 0x85f   :  { %1616 = vrot.lane.b32.xlu0 %v6651_v21, %s8520_s19 }
 0x866   :  { %1716 = vrot.lane.b32.xlu2 %v6510_v13, %s5736_s24 }
 0x867   :  { %1654 = vrot.lane.b32.xlu0 %v6398_v27, %s5736_s24 }
 0x86e   :  { %1718 = vrot.lane.b32.xlu2 %v6534_v8, %s5736_s24 }
 0x86f   :  { %1678 = vrot.lane.b32.xlu0 %v1555_v24, %s8520_s19 }
 0x876   :  { %1720 = vrot.lane.b32.xlu2 %v6536_v3, %s5736_s24 }
 0x877   :  { %1680 = vrot.lane.b32.xlu0 %v1558_v57, %s8520_s19 }
 0x87e   :  { %5374 = vrot.lane.b32.xlu2 %v5373_v5, %s8518_s1 }
 0x87f   :  { %1682 = vrot.lane.b32.xlu0 %v1584_v19, %s8520_s19 }
 0x88e   :  { %v1587_v48 = vpop.f32.mrf.mxu3 }
 0x88f   :  { %1632 = vrot.lane.b32.xlu1 %v1587_v48, %s8509_s0  ;;  %1684 = vrot.lane.b32.xlu0 %v1587_v48, %s8520_s19  ;;  %s8562_s0 = smov 84  }
 0x897   :  { %1666 = vrot.lane.b32.xlu1 %v6606_v11, %s5728_s16  ;;  %1726 = vrot.lane.b32.xlu0 %v1555_v24, %s5728_s16 }
 0x89f   :  { %1656 = vrot.lane.b32.xlu1 %v6400_v20, %s5736_s24  ;;  %1728 = vrot.lane.b32.xlu0 %v1558_v57, %s5728_s16 }
 0x8a0   :  { %v1669_v42 = vpop.permute.xlu2 %1668 }
 0x8a7   :  { %1658 = vrot.lane.b32.xlu1 %v6402_v29, %s5736_s24  ;;  %1730 = vrot.lane.b32.xlu0 %v1584_v19, %s5728_s16 }
 0x8a8   :  { %v1671_v51 = vpop.permute.xlu2 %1670 }
 0x8ad   :  { %v1615_v28 = vpop.permute.xlu0 %1614 }
 0x8af   :  { %1660 = vrot.lane.b32.xlu1 %v6405_v35, %s5736_s24  ;;  %1732 = vrot.lane.b32.xlu0 %v1587_v48, %s5728_s16 }
 0x8b0   :  { %v1673_v25 = vpop.permute.xlu2 %1672 }
 0x8b7   :  { %1702 = vrot.lane.b32.xlu1 %v6398_v27, %s5730_s18 }
 0x8b8   :  { %v1613_v22 = vpop.permute.xlu1 %1612 }
 0x8b9   :  { %v1643_v27 = vsel %vm432_vm4, %v1639_v18, %v1613_v22 }
 0x8bf   :  { %1704 = vrot.lane.b32.xlu1 %v6400_v20, %s5730_s18 }
 0x8c0   :  { %v1627_v38 = vpop.permute.xlu1 %1626 }
 0x8c1   :  { %v1646_v4 = vsel %vm529_vm3, %v1642_v30, %v1627_v38 }
 0x8c2   :  { %5062 = vmatmul.msk.f32.vlgmr.msrb.gmra.mxu0 %vm306_vm2, %v1646_v4 }
 0x8c7   :  { %1706 = vrot.lane.b32.xlu1 %v6402_v29, %s5730_s18 }
 0x8c8   :  { %v1599_v2 = vpop.permute.xlu1 %1598 }
 0x8c9   :  { %v1629_v31 = vpop.permute.xlu0 %1628  ;;  %v1640_v50 = vsel %vm64_vm1, %v6402_v29, %v1599_v2  ;;  %v5368_v29 = vpack.i.bf16 %v305_v36, %v6628_v15 }
 0x8ca   :  { %v1647_v62 = vsel %vm529_vm3, %v1643_v27, %v1629_v31  ;;  %v1644_v20 = vsel %vm432_vm4, %v1640_v50, %v1615_v28 }
 0x8cb   :  { %5063 = vmatmul.msk.f32.gmra.mxu0 %vm306_vm2, %v1647_v62 }
 0x8cf   :  { %1708 = vrot.lane.b32.xlu1 %v6405_v35, %s5730_s18 }
 0x8d0   :  { %v1631_v40 = vpop.permute.xlu1 %1630 }
 0x8d1   :  { %v1648_v1 = vsel %vm529_vm3, %v1644_v20, %v1631_v40  ;;  %v1617_v41 = vpop.permute.xlu0 %1616 }
 0x8d2   :  { %v1645_v49 = vsel %vm432_vm4, %v1641_v52, %v1617_v41 }
 0x8d3   :  { %5064 = vmatmul.msk.f32.gmra.mxu0 %vm306_vm2, %v1648_v1 }
 0x8d7   :  { %5369 = vrot.lane.b32.xlu1 %v5368_v29, %s8518_s1 }
 0x8d9   :  { %v1655_v33 = vpop.permute.xlu0 %1654 }
 0x8da   :  { %v1690_v23 = vsel %vm64_vm1, %v1655_v33, %v6508_v0 }
 0x8e1   :  { %v1679_v43 = vpop.permute.xlu0 %1678 }
 0x8e9   :  { %v1681_v63 = vpop.permute.xlu0 %1680 }
 0x8f1   :  { %v1683_v19 = vpop.permute.xlu0 %1682 }
 0x901   :  { %v1633_v7 = vpop.permute.xlu1 %1632  ;;  %v1685_v46 = vpop.permute.xlu0 %1684 }
 0x902   :  { %v1649_v32 = vsel %vm529_vm3, %v1645_v49, %v1633_v7 }
 0x903   :  { %5065 = vmatmul.msk.f32.gmra.mxu0 %vm306_vm2, %v1649_v32 }
 0x909   :  { %v1667_v15 = vpop.permute.xlu1 %1666  ;;  %v1727_v28 = vpop.permute.xlu0 %1726 }
 0x90a   :  { %v1694_v6 = vsel %vm432_vm4, %v1690_v23, %v1667_v15 }
 0x90b   :  { %v1698_v24 = vsel %vm529_vm3, %v1694_v6, %v1679_v43 }
 0x90c   :  { %5066 = vmatmul.msk.f32.gmra.mxu0 %vm306_vm2, %v1698_v24 }
 0x911   :  { %v1657_v35 = vpop.permute.xlu1 %1656  ;;  %v1729_v31 = vpop.permute.xlu0 %1728 }
 0x912   :  { %v1691_v57 = vsel %vm64_vm1, %v1657_v35, %v6510_v13  ;;  %v1715_v13 = vpop.permute.xlu2 %1714 }
 0x913   :  { %v1695_v48 = vsel %vm432_vm4, %v1691_v57, %v1669_v42 }
 0x914   :  { %v1699_v12 = vsel %vm529_vm3, %v1695_v48, %v1681_v63 }
 0x915   :  { %5067 = vmatmul.msk.f32.gmra.mxu0 %vm306_vm2, %v1699_v12 }
 0x919   :  { %v1659_v0 = vpop.permute.xlu1 %1658  ;;  %v1731_v20 = vpop.permute.xlu0 %1730 }
 0x91a   :  { %v1692_v47 = vsel %vm64_vm1, %v1659_v0, %v6534_v8  ;;  %v1717_v8 = vpop.permute.xlu2 %1716 }
 0x91b   :  { %v1696_v37 = vsel %vm432_vm4, %v1692_v47, %v1671_v51 }
 0x91c   :  { %v1700_v22 = vsel %vm529_vm3, %v1696_v37, %v1683_v19 }
 0x91d   :  { %5068 = vmatmul.msk.f32.gmra.mxu0 %vm306_vm2, %v1700_v22 }
 0x921   :  { %v1661_v58 = vpop.permute.xlu1 %1660 }
 0x922   :  { %v1693_v26 = vsel %vm64_vm1, %v1661_v58, %v6536_v3  ;;  %v1719_v50 = vpop.permute.xlu2 %1718 }
 0x923   :  { %v1697_v30 = vsel %vm432_vm4, %v1693_v26, %v1673_v25 }
 0x924   :  { %v1701_v38 = vsel %vm529_vm3, %v1697_v30, %v1685_v46 }
 0x925   :  { %5069 = vmatmul.msk.f32.gmra.mxu0 %vm306_vm2, %v1701_v38 }
 0x929   :  { %v1703_v4 = vpop.permute.xlu1 %1702 }
 0x92a   :  { %v1738_v18 = vsel %vm64_vm1, %v1703_v4, %v1715_v13  ;;  %v1721_v29 = vpop.permute.xlu2 %1720 }
 0x92b   :  { %v1742_v2 = vsel %vm432_vm4, %v1738_v18, %v6606_v11 }
 0x92c   :  { %v1746_v27 = vsel %vm529_vm3, %v1742_v2, %v1727_v28 }
 0x92d   :  { %5070 = vmatmul.msk.f32.gmra.mxu0 %vm306_vm2, %v1746_v27 }
 0x931   :  { %v1705_v3 = vpop.permute.xlu1 %1704 }
 0x932   :  { %v1739_v62 = vsel %vm64_vm1, %v1705_v3, %v1717_v8  ;;  %v5375_v52 = vpop.permute.xlu2 %5374 }
 0x933   :  { %v1743_v44 = vsel %vm432_vm4, %v1739_v62, %v6642_v10  ;;  %v1733_v10 = vpop.permute.xlu0 %1732  ;;  %v5377_v49 = vunpack.i.h.bf16 %v5375_v52 }
 0x934   :  { %v1747_v40 = vsel %vm529_vm3, %v1743_v44, %v1729_v31 }
 0x935   :  { %5071 = vmatmul.msk.f32.gmra.mxu0 %vm306_vm2, %v1747_v40 }
 0x939   :  { %v1707_v36 = vpop.permute.xlu1 %1706 }
 0x93a   :  { %v1740_v11 = vsel %vm64_vm1, %v1707_v36, %v1719_v50 }
 0x93b   :  { %v1744_v5 = vsel %vm432_vm4, %v1740_v11, %v6638_v39  ;;  %v5376_v39 = vunpack.i.l.bf16 %v5375_v52 }
 0x93c   :  { %v1748_v1 = vsel %vm529_vm3, %v1744_v5, %v1731_v20 }
 0x93d   :  { %5072 = vmatmul.msk.f32.gmra.mxu0 %vm306_vm2, %v1748_v1  ;;  %v1870_v15 = vsel %vm1869_vm5, %v5376_v39, %v5377_v49 }
 0x93f   :  { %v1811_v42 = vpop.f32.mrf.mxu0 }
 0x940   :  { %v6769_v6 = vadd.f32 %v1811_v42, %v5971_v9 }
 0x941   :  { %v1709_v41 = vpop.permute.xlu1 %1708 }
 0x942   :  { %v1741_v33 = vsel %vm64_vm1, %v1709_v41, %v1721_v29 }
 0x943   :  { %v1745_v45 = vsel %vm432_vm4, %v1741_v33, %v6651_v21 }
 0x944   :  { %v1749_v43 = vsel %vm529_vm3, %v1745_v45, %v1733_v10 }
 0x945   :  { %5073 = vmatmul.msk.f32.gmra.mxu0 %vm306_vm2, %v1749_v43 }
 0x948   :  { %v1814_v21 = vpop.f32.mrf.mxu0 }
 0x949   :  { %v5370_v7 = vpop.permute.xlu1 %5369  ;;  %v6774_v51 = vadd.f32 %v1814_v21, %v5981_v34  ;;  %v2117_v21 = vld [vmem:[%s8494_s3 + $0x30] sm:$0xff] }
 0x94a   :  { %v5372_v32 = vunpack.i.h.bf16 %v5370_v7  ;;  %v5371_v23 = vunpack.i.l.bf16 %v5370_v7 }
 0x94c   :  { %v1871_v63 = vsel %vm1869_vm5, %v5371_v23, %v5372_v32 }
 0x94d   :  { %1924 = vmatpush.msra.mxu1 %v1871_v63 }
 0x94f   :  { %1925 = vmatpush.msra.mxu1 %v1870_v15  ;;  %v2118_v15 = vld [vmem:[%s8494_s3 + $0x38] sm:$0xff] }
 0x950   :  { %5074 = vmatmul.msk.f32.vlgmr.msra.gmra.mxu1 %vm306_vm2, %v6769_v6  ;;  %v1817_v24 = vpop.f32.mrf.mxu0  ;;  %2163 = vmatpush.msrb.mxu2 %v2118_v15 }
 0x951   :  { %v6779_v35 = vadd.f32 %v1817_v24, %v5989_v14  ;;  %v2116_v24 = vld [vmem:[%s8494_s3 + $0x28] sm:$0xff] }
 0x952   :  { %2164 = vmatpush.msrb.mxu2 %v2117_v21 }
 0x954   :  { %2165 = vmatpush.msrb.mxu2 %v2116_v24 }
 0x958   :  { %5075 = vmatmul.msk.f32.gmra.mxu1 %vm306_vm2, %v6774_v51 }
 0x960   :  { %5076 = vmatmul.msk.f32.gmra.mxu1 %vm306_vm2, %v6779_v35 }
 0x980   :  { %v1820_v9 = vpop.f32.mrf.mxu0 }
 0x981   :  { %v6784_v57 = vadd.f32 %v1820_v9, %v5994_v53  ;;  %v2115_v9 = vld [vmem:[%s8494_s3 + $0x20] sm:$0xff] }
 0x982   :  { %2166 = vmatpush.msrb.mxu2 %v2115_v9 }
 0x983   :  { %5077 = vmatmul.msk.f32.gmra.mxu1 %vm306_vm2, %v6784_v57 }
 0x989   :  { %v1823_v19 = vpop.f32.mrf.mxu0 }
 0x98a   :  { %v6789_v34 = vadd.f32 %v1823_v19, %v6004_v55  ;;  %v2114_v19 = vld [vmem:[%s8494_s3 + $0x18] sm:$0xff] }
 0x98b   :  { %2167 = vmatpush.msrb.mxu2 %v2114_v19 }
 0x98c   :  { %5078 = vmatmul.msk.f32.gmra.mxu1 %vm306_vm2, %v6789_v34 }
 0x992   :  { %v1826_v48 = vpop.f32.mrf.mxu0 }
 0x993   :  { %v6794_v14 = vadd.f32 %v1826_v48, %v6009_v16  ;;  %v2113_v48 = vld [vmem:[%s8494_s3 + $0x10] sm:$0xff] }
 0x994   :  { %2168 = vmatpush.msrb.mxu2 %v2113_v48 }
 0x995   :  { %5079 = vmatmul.msk.f32.gmra.mxu1 %vm306_vm2, %v6794_v14 }
 0x99a   :  { %v1829_v12 = vpop.f32.mrf.mxu0 }
 0x99b   :  { %v6799_v53 = vadd.f32 %v1829_v12, %v6014_v59  ;;  %v2112_v12 = vld [vmem:[%s8494_s3 + $0x8] sm:$0xff] }
 0x99c   :  { %2169 = vmatpush.msrb.mxu2 %v2112_v12 }
 0x99d   :  { %5080 = vmatmul.msk.f32.gmra.mxu1 %vm306_vm2, %v6799_v53 }
 0x9a2   :  { %v1832_v25 = vpop.f32.mrf.mxu0 }
 0x9a3   :  { %v6804_v55 = vadd.f32 %v1832_v25, %v6019_v17  ;;  %v2111_v25 = vld [vmem:[%s8494_s3] sm:$0xff]  ;;  %s8574_s3 = smov 64  }
 0x9a4   :  { %2170 = vmatpush.msrb.mxu2 %v2111_v25 }
 0x9a5   :  { %5081 = vmatmul.msk.f32.gmra.mxu1 %vm306_vm2, %v6804_v55 }
 0x9aa   :  { %v1835_v0 = vpop.f32.mrf.mxu0 }
 0x9ab   :  { %v6809_v16 = vadd.f32 %v1835_v0, %v6025_v56 }
 0x9ad   :  { %5082 = vmatmul.msk.f32.gmra.mxu1 %vm306_vm2, %v6809_v16 }
 0x9b2   :  { %v1838_v47 = vpop.f32.mrf.mxu0 }
 0x9b3   :  { %v6814_v59 = vadd.f32 %v1838_v47, %v6030_v60 }
 0x9b5   :  { %5083 = vmatmul.msk.f32.gmra.mxu1 %vm306_vm2, %v6814_v59 }
 0x9ba   :  { %v1841_v46 = vpop.f32.mrf.mxu0 }
 0x9bb   :  { %v6819_v17 = vadd.f32 %v1841_v46, %v6035_v61 }
 0x9bd   :  { %5084 = vmatmul.msk.f32.gmra.mxu1 %vm306_vm2, %v6819_v17 }
 0x9c2   :  { %v1844_v37 = vpop.f32.mrf.mxu0 }
 0x9c3   :  { %v6824_v56 = vadd.f32 %v1844_v37, %v5997_v54 }
 0x9c5   :  { %5085 = vmatmul.msk.f32.gmra.mxu1 %vm306_vm2, %v6824_v56 }
 0x9cd   :  { %v6828_v22 = vpop.f32.mrf.mxu1 }
 0x9ce   :  { %1967 = vrot.lane.b32.xlu0 %v6828_v22, %s8518_s1  ;;  %v2031_v28 = vmul.f32 %v6828_v22, %v6828_v22 }
 0x9d5   :  { %v6832_v60 = vpop.f32.mrf.mxu1 }
 0x9d6   :  { %1969 = vrot.lane.b32.xlu0 %v6832_v60, %s8518_s1  ;;  %v2032_v3 = vmul.f32 %v6832_v60, %v6832_v60 }
 0x9dd   :  { %v6836_v61 = vpop.f32.mrf.mxu1 }
 0x9de   :  { %v2033_v5 = vmul.f32 %v6836_v61, %v6836_v61 }
 0xa00   :  { %v6838_v13 = vpop.f32.mrf.mxu1 }
 0xa01   :  { %v2034_v52 = vmul.f32 %v6838_v13, %v6838_v13 }
 0xa09   :  { %v6840_v58 = vpop.f32.mrf.mxu1 }
 0xa0a   :  { %1987 = vrot.lane.b32.xlu1 %v6840_v58, %s8518_s1  ;;  %v2035_v38 = vmul.f32 %v6840_v58, %v6840_v58 }
 0xa0c   :  { %v2039_v4 = vadd.f32 %v2035_v38, %v2031_v28 }
 0xa12   :  { %v6844_v54 = vpop.f32.mrf.mxu1 }
 0xa13   :  { %1989 = vrot.lane.b32.xlu1 %v6844_v54, %s8518_s1  ;;  %v2036_v27 = vmul.f32 %v6844_v54, %v6844_v54 }
 0xa15   :  { %v2040_v50 = vadd.f32 %v2036_v27, %v2032_v3 }
 0xa1a   :  { %v6848_v26 = vpop.f32.mrf.mxu1 }
 0xa1b   :  { %1971 = vrot.lane.b32.xlu1 %v6836_v61, %s8518_s1  ;;  %1991 = vrot.lane.b32.xlu2 %v6848_v26, %s8518_s1  ;;  %v2037_v36 = vmul.f32 %v6848_v26, %v6848_v26 }
 0xa1d   :  { %v2041_v29 = vadd.f32 %v2037_v36, %v2033_v5 }
 0xa22   :  { %v6854_v30 = vpop.f32.mrf.mxu1 }
 0xa23   :  { %v2038_v45 = vmul.f32 %v6854_v30, %v6854_v30 }
 0xa25   :  { %v2042_v49 = vadd.f32 %v2038_v45, %v2034_v52 }
 0xa2a   :  { %v6860_v8 = vpop.f32.mrf.mxu1 }
 0xa2b   :  { %v2043_v18 = vmul.f32 %v6860_v8, %v6860_v8  ;;  %2011 = vrot.lane.b32.xlu2 %v6860_v8, %s8518_s1 }
 0xa2d   :  { %v2047_v2 = vadd.f32 %v2043_v18, %v2039_v4 }
 0xa2f   :  { %v2051_v31 = vadd.f32 1e-06, %v2047_v2 }
 0xa31   :  { %5593 = vrcp.f32 %v2051_v31 }
 0xa32   :  { %v6870_v62 = vpop.f32.mrf.mxu1 }
 0xa33   :  { %v2044_v44 = vmul.f32 %v6870_v62, %v6870_v62  ;;  %2013 = vrot.lane.b32.xlu2 %v6870_v62, %s8518_s1 }
 0xa35   :  { %v2048_v40 = vadd.f32 %v2044_v44, %v2040_v50 }
 0xa37   :  { %v5594_v20 = vpop.eup %5593  ;;  %v2052_v11 = vadd.f32 1e-06, %v2048_v40 }
 0xa38   :  { %2071 = vrot.lane.b32.xlu0 %v5594_v20, %s8518_s1 }
 0xa39   :  { %5595 = vrcp.f32 %v2052_v11 }
 0xa3a   :  { %v6881_v1 = vpop.f32.mrf.mxu1 }
 0xa3b   :  { %v2045_v41 = vmul.f32 %v6881_v1, %v6881_v1  ;;  %1973 = vrot.lane.b32.xlu2 %v6838_v13, %s8518_s1 }
 0xa3d   :  { %v2049_v33 = vadd.f32 %v2045_v41, %v2041_v29 }
 0xa3f   :  { %v5596_v10 = vpop.eup %5595  ;;  %v2053_v43 = vadd.f32 1e-06, %v2049_v33 }
 0xa40   :  { %2073 = vrot.lane.b32.xlu1 %v5596_v10, %s8518_s1  ;;  %2015 = vrot.lane.b32.xlu0 %v6881_v1, %s8518_s1  ;;  %v1968_v46 = vpop.permute.xlu0 %1967 }
 0xa41   :  { %5597 = vrcp.f32 %v2053_v43  ;;  %v1979_v28 = vmul.f32 %v1968_v46, %v6828_v22 }
 0xa42   :  { %v6894_v42 = vpop.f32.mrf.mxu1 }
 0xa43   :  { %v2046_v39 = vmul.f32 %v6894_v42, %v6894_v42 }
 0xa45   :  { %v2050_v7 = vadd.f32 %v2046_v39, %v2042_v49 }
 0xa47   :  { %v5598_v32 = vpop.eup %5597  ;;  %v2054_v23 = vadd.f32 1e-06, %v2050_v7 }
 0xa48   :  { %1993 = vrot.lane.b32.xlu0 %v6854_v30, %s8518_s1  ;;  %2075 = vrot.lane.b32.xlu2 %v5598_v32, %s8518_s1  ;;  %v1970_v31 = vpop.permute.xlu0 %1969 }
 0xa49   :  { %5599 = vrcp.f32 %v2054_v23  ;;  %2017 = vrot.lane.b32.xlu1 %v6894_v42, %s8518_s1  ;;  %v1980_v44 = vmul.f32 %v1970_v31, %v6832_v60 }
 0xa4f   :  { %v5600_v63 = vpop.eup %5599 }
 0xa50   :  { %2077 = vrot.lane.b32.xlu0 %v5600_v63, %s8518_s1 }
 0xa75   :  { %v6928_v0 = vpop.permute.xlu2 %1991 }
 0xa76   :  { %v2001_v49 = vmul.f32 %v6928_v0, %v6848_v26 }
 0xa7c   :  { %v1988_v47 = vpop.permute.xlu1 %1987 }
 0xa7d   :  { %v1999_v38 = vmul.f32 %v1988_v47, %v6840_v58 }
 0xa7f   :  { %v2003_v18 = vadd.f32 %v1999_v38, %v1979_v28 }
 0xa85   :  { %v6930_v37 = vpop.permute.xlu2 %2011  ;;  %v1990_v2 = vpop.permute.xlu1 %1989 }
 0xa86   :  { %v2023_v4 = vmul.f32 %v6930_v37, %v6860_v8  ;;  %v2000_v50 = vmul.f32 %v1990_v2, %v6844_v54 }
 0xa88   :  { %v2027_v27 = vadd.f32 %v2023_v4, %v2003_v18  ;;  %v2004_v36 = vadd.f32 %v2000_v50, %v1980_v44 }
 0xa8a   :  { %v2055_v20 = vmin.f32 %v2027_v27, 0.0 }
 0xa8c   :  { %v2059_v11 = vmul.f32 0.8, %v2055_v20 }
 0xa8d   :  { %v6936_v3 = vpop.permute.xlu2 %2013  ;;  %v1972_v29 = vpop.permute.xlu1 %1971 }
 0xa8e   :  { %v2024_v40 = vmul.f32 %v6936_v3, %v6870_v62  ;;  %v1981_v43 = vmul.f32 %v1972_v29, %v6836_v61 }
 0xa90   :  { %v2028_v5 = vadd.f32 %v2024_v40, %v2004_v36  ;;  %v2005_v63 = vadd.f32 %v2001_v49, %v1981_v43 }
 0xa92   :  { %v2056_v45 = vmin.f32 %v2028_v5, 0.0 }
 0xa94   :  { %v2060_v7 = vmul.f32 0.8, %v2056_v45 }
 0xa95   :  { %v1974_v39 = vpop.permute.xlu2 %1973 }
 0xaaa   :  { %v2072_v41 = vpop.permute.xlu0 %2071 }
 0xaab   :  { %v2083_v33 = vmul.f32 %v2072_v41, %v2059_v11 }
 0xaad   :  { %v2087_v10 = vmul.f32 %v2083_v33, %v1968_v46  ;;  %v1982_v46 = vmul.f32 %v1974_v39, %v6838_v13  ;;  %v2095_v41 = vmul.f32 %v2083_v33, %v1988_v47 }
 0xaaf   :  { %v2091_v52 = vsub.f32 %v6828_v22, %v2087_v10  ;;  %v2076_v22 = vpop.permute.xlu2 %2075  ;;  %v2099_v10 = vsub.f32 %v6840_v58, %v2095_v41  ;;  %v2103_v58 = vmul.f32 %v2083_v33, %v6930_v37 }
 0xab1   :  { %5086 = vmatmul.msk.f32.vlgmr.msrb.gmra.mxu2 %vm1869_vm5, %v2091_v52  ;;  %v2107_v47 = vsub.f32 %v6860_v8, %v2103_v58  ;;  %v6979_v8 = vld [vmem:[%s8495_s4 + $0x10] sm:$0xff] }
 0xab2   :  { %v2074_v32 = vpop.permute.xlu1 %2073  ;;  %v2016_v23 = vpop.permute.xlu0 %2015  ;;  %8538 = vst [vmem:[#allocation5_spill] sm:$0xff] %v6979_v8  ;;  %2274 = vmatpush.msra.mxu3 %v6979_v8 }
 0xab3   :  { %v2084_v15 = vmul.f32 %v2074_v32, %v2060_v7  ;;  %v2025_v21 = vmul.f32 %v2016_v23, %v6881_v1 }
 0xab5   :  { %v2029_v24 = vadd.f32 %v2025_v21, %v2005_v63  ;;  %v2088_v9 = vmul.f32 %v2084_v15, %v1970_v31 }
 0xab7   :  { %v2057_v19 = vmin.f32 %v2029_v24, 0.0  ;;  %v2092_v48 = vsub.f32 %v6832_v60, %v2088_v9 }
 0xab9   :  { %v2061_v12 = vmul.f32 0.8, %v2057_v19  ;;  %5087 = vmatmul.msk.f32.gmra.mxu2 %vm1869_vm5, %v2092_v48 }
 0xaba   :  { %v1994_v25 = vpop.permute.xlu0 %1993 }
 0xabb   :  { %v2085_v38 = vmul.f32 %v2076_v22, %v2061_v12  ;;  %v2018_v28 = vpop.permute.xlu1 %2017  ;;  %v2002_v4 = vmul.f32 %v1994_v25, %v6854_v30 }
 0xabc   :  { %v2026_v18 = vmul.f32 %v2018_v28, %v6894_v42 }
 0xabd   :  { %v2006_v27 = vadd.f32 %v2002_v4, %v1982_v46  ;;  %v2089_v50 = vmul.f32 %v2085_v38, %v1972_v29  ;;  %v2096_v29 = vmul.f32 %v2084_v15, %v1990_v2  ;;  %v2097_v45 = vmul.f32 %v2085_v38, %v6928_v0 }
 0xabf   :  { %v2093_v31 = vsub.f32 %v6836_v61, %v2089_v50  ;;  %v2030_v44 = vadd.f32 %v2026_v18, %v2006_v27  ;;  %v2100_v61 = vsub.f32 %v6844_v54, %v2096_v29  ;;  %v2101_v43 = vsub.f32 %v6848_v26, %v2097_v45 }
 0xac0   :  { %v2104_v54 = vmul.f32 %v2084_v15, %v6936_v3  ;;  %v2105_v26 = vmul.f32 %v2085_v38, %v2016_v23 }
 0xac1   :  { %5088 = vmatmul.msk.f32.gmra.mxu2 %vm1869_vm5, %v2093_v31  ;;  %v2058_v60 = vmin.f32 %v2030_v44, 0.0 }
 0xac2   :  { %v2078_v20 = vpop.permute.xlu0 %2077  ;;  %v2108_v2 = vsub.f32 %v6870_v62, %v2104_v54  ;;  %v2109_v0 = vsub.f32 %v6881_v1, %v2105_v26  ;;  %v6985_v62 = vld [vmem:[%s8495_s4] sm:$0xff] }
 0xac3   :  { %v2062_v40 = vmul.f32 0.8, %v2058_v60  ;;  %8539 = vst [vmem:[#allocation6_spill] sm:$0xff] %v6985_v62  ;;  %2275 = vmatpush.msra.mxu3 %v6985_v62 }
 0xac5   :  { %v2086_v36 = vmul.f32 %v2078_v20, %v2062_v40 }
 0xac7   :  { %v2090_v11 = vmul.f32 %v2086_v36, %v1974_v39  ;;  %v2098_v52 = vmul.f32 %v2086_v36, %v1994_v25 }
 0xac9   :  { %v2094_v5 = vsub.f32 %v6838_v13, %v2090_v11  ;;  %v2102_v13 = vsub.f32 %v6854_v30, %v2098_v52  ;;  %v2106_v30 = vmul.f32 %v2086_v36, %v2018_v28 }
 0xacb   :  { %5089 = vmatmul.msk.f32.gmra.mxu2 %vm1869_vm5, %v2094_v5  ;;  %v2110_v49 = vsub.f32 %v6894_v42, %v2106_v30 }
 0xad3   :  { %5090 = vmatmul.msk.f32.gmra.mxu2 %vm1869_vm5, %v2099_v10 }
 0xadb   :  { %5091 = vmatmul.msk.f32.gmra.mxu2 %vm1869_vm5, %v2100_v61 }
 0xae3   :  { %5092 = vmatmul.msk.f32.gmra.mxu2 %vm1869_vm5, %v2101_v43 }
 0xaeb   :  { %5093 = vmatmul.msk.f32.gmra.mxu2 %vm1869_vm5, %v2102_v13 }
 0xaf3   :  { %5094 = vmatmul.msk.f32.gmra.mxu2 %vm1869_vm5, %v2107_v47 }
 0xafb   :  { %5095 = vmatmul.msk.f32.gmra.mxu2 %vm1869_vm5, %v2108_v2 }
 0xb03   :  { %5096 = vmatmul.msk.f32.gmra.mxu2 %vm1869_vm5, %v2109_v0 }
 0xb0b   :  { %5097 = vmatmul.msk.f32.gmra.mxu2 %vm1869_vm5, %v2110_v49 }
 0xb34   :  { %v2172_v42 = vpop.f32.mrf.mxu2 }
 0xb35   :  { %v6991_v37 = vadd.f32 %v2172_v42, %v6769_v6 }
 0xb37   :  { %8540 = vst [vmem:[#allocation7_spill] sm:$0xff] %v6991_v37  ;;  %5098 = vmatmul.msk.f32.vlgmr.msra.gmra.mxu3 %vm306_vm2, %v6991_v37 }
 0xb3c   :  { %v2175_v3 = vpop.f32.mrf.mxu2 }
 0xb3d   :  { %v6996_v33 = vadd.f32 %v2175_v3, %v6774_v51 }
 0xb3f   :  { %8541 = vst [vmem:[#allocation8_spill] sm:$0xff] %v6996_v33  ;;  %5099 = vmatmul.msk.f32.gmra.mxu3 %vm306_vm2, %v6996_v33 }
 0xb44   :  { %v2178_v39 = vpop.f32.mrf.mxu2 }
 0xb45   :  { %v7001_v7 = vadd.f32 %v2178_v39, %v6779_v35 }
 0xb47   :  { %8542 = vst [vmem:[#allocation9_spill] sm:$0xff] %v7001_v7  ;;  %5100 = vmatmul.msk.f32.gmra.mxu3 %vm306_vm2, %v7001_v7 }
 0xb4e   :  { %v2181_v32 = vpop.f32.mrf.mxu2 }
 0xb4f   :  { %v7006_v6 = vadd.f32 %v2181_v32, %v6784_v57 }
 0xb51   :  { %8543 = vst [vmem:[#allocation10_spill] sm:$0xff] %v7006_v6  ;;  %5101 = vmatmul.msk.f32.gmra.mxu3 %vm306_vm2, %v7006_v6 }
 0xb56   :  { %v2184_v23 = vpop.f32.mrf.mxu2 }
 0xb57   :  { %v7011_v51 = vadd.f32 %v2184_v23, %v6789_v34 }
 0xb59   :  { %8544 = vst [vmem:[#allocation11_spill] sm:$0xff] %v7011_v51  ;;  %5102 = vmatmul.msk.f32.gmra.mxu3 %vm306_vm2, %v7011_v51 }
 0xb5e   :  { %v2187_v63 = vpop.f32.mrf.mxu2 }
 0xb5f   :  { %v7016_v35 = vadd.f32 %v2187_v63, %v6794_v14 }
 0xb61   :  { %8545 = vst [vmem:[#allocation12_spill] sm:$0xff] %v7016_v35  ;;  %5103 = vmatmul.msk.f32.gmra.mxu3 %vm306_vm2, %v7016_v35 }
 0xb66   :  { %v2190_v15 = vpop.f32.mrf.mxu2 }
 0xb67   :  { %v7021_v57 = vadd.f32 %v2190_v15, %v6799_v53 }
 0xb69   :  { %8546 = vst [vmem:[#allocation13_spill] sm:$0xff] %v7021_v57  ;;  %5104 = vmatmul.msk.f32.gmra.mxu3 %vm306_vm2, %v7021_v57 }
 0xb6e   :  { %v2193_v21 = vpop.f32.mrf.mxu2 }
 0xb6f   :  { %v7026_v34 = vadd.f32 %v2193_v21, %v6804_v55 }
 0xb71   :  { %8547 = vst [vmem:[#allocation14_spill] sm:$0xff] %v7026_v34  ;;  %5105 = vmatmul.msk.f32.gmra.mxu3 %vm306_vm2, %v7026_v34 }
 0xb76   :  { %v2196_v24 = vpop.f32.mrf.mxu2 }
 0xb77   :  { %v7031_v14 = vadd.f32 %v2196_v24, %v6809_v16 }
 0xb79   :  { %8548 = vst [vmem:[#allocation15_spill] sm:$0xff] %v7031_v14  ;;  %5106 = vmatmul.msk.f32.gmra.mxu3 %vm306_vm2, %v7031_v14 }
 0xb7e   :  { %v2199_v9 = vpop.f32.mrf.mxu2 }
 0xb7f   :  { %v7036_v53 = vadd.f32 %v2199_v9, %v6814_v59 }
 0xb81   :  { %8549 = vst [vmem:[#allocation16_spill] sm:$0xff] %v7036_v53  ;;  %5107 = vmatmul.msk.f32.gmra.mxu3 %vm306_vm2, %v7036_v53 }
 0xb86   :  { %v2202_v19 = vpop.f32.mrf.mxu2 }
 0xb87   :  { %v7041_v55 = vadd.f32 %v2202_v19, %v6819_v17 }
 0xb89   :  { %8550 = vst [vmem:[#allocation17_spill] sm:$0xff] %v7041_v55  ;;  %5108 = vmatmul.msk.f32.gmra.mxu3 %vm306_vm2, %v7041_v55 }
 0xb8e   :  { %v2205_v48 = vpop.f32.mrf.mxu2 }
 0xb8f   :  { %v7046_v16 = vadd.f32 %v2205_v48, %v6824_v56 }
 0xb91   :  { %8551 = vst [vmem:[#allocation18_spill] sm:$0xff] %v7046_v16  ;;  %5109 = vmatmul.msk.f32.gmra.mxu3 %vm306_vm2, %v7046_v16 }
 0xbba   :  { %v7050_v12 = vpop.f32.mrf.mxu3 }
 0xbbb   :  { %2909 = vrot.lane.b32.xlu2 %v7050_v12, %s5730_s18  ;;  %2617 = vrot.lane.b32.xlu0 %v7050_v12, %s5736_s24 }
 0xbbc   :  { %2357 = vrot.lane.b32.xlu1 %v7050_v12, %s5727_s27 }
 0xbc2   :  { %v7064_v59 = vpop.f32.mrf.mxu3 }
 0xbc3   :  { %3245 = vrot.lane.b32.xlu2 %v7050_v12, %s5732_s20  ;;  %2941 = vrot.lane.b32.xlu0 %v7050_v12, %s5735_s23  ;;  %v5378_v7 = vpack.i.bf16 %v7050_v12, %v7064_v59 }
 0xbc4   :  { %2649 = vrot.lane.b32.xlu1 %v7050_v12, %s5734_s22 }
 0xbca   :  { %v7072_v17 = vpop.f32.mrf.mxu3 }
 0xbcb   :  { %3247 = vrot.lane.b32.xlu2 %v7064_v59, %s5732_s20  ;;  %2943 = vrot.lane.b32.xlu0 %v7064_v59, %s5735_s23 }
 0xbcc   :  { %2359 = vrot.lane.b32.xlu1 %v7064_v59, %s5727_s27 }
 0xbd3   :  { %2911 = vrot.lane.b32.xlu0 %v7064_v59, %s5730_s18  ;;  %2361 = vrot.lane.b32.xlu2 %v7072_v17, %s5727_s27 }
 0xbd4   :  { %2651 = vrot.lane.b32.xlu1 %v7064_v59, %s5734_s22  ;;  %v7080_v56 = vpop.f32.mrf.mxu3 }
 0xbdb   :  { %2945 = vrot.lane.b32.xlu0 %v7072_v17, %s5735_s23  ;;  %2363 = vrot.lane.b32.xlu2 %v7080_v56, %s5727_s27 }
 0xbdc   :  { %2619 = vrot.lane.b32.xlu1 %v7064_v59, %s5736_s24  ;;  %v7094_v22 = vpop.f32.mrf.mxu3 }
 0xbe3   :  { %2947 = vrot.lane.b32.xlu0 %v7080_v56, %s5735_s23  ;;  %2623 = vrot.lane.b32.xlu2 %v7080_v56, %s5736_s24 }
 0xbe4   :  { %2653 = vrot.lane.b32.xlu1 %v7072_v17, %s5734_s22  ;;  %v7108_v25 = vpop.f32.mrf.mxu3 }
 0xbe5   :  { %v5383_v51 = vpack.i.bf16 %v7094_v22, %v7108_v25  ;;  %v5393_v62 = vpack.i.bf16 %v7108_v25, %v7080_v56 }
 0xbeb   :  { %2921 = vrot.lane.b32.xlu0 %v7094_v22, %s5736_s24  ;;  %2369 = vrot.lane.b32.xlu2 %v7094_v22, %s5729_s17 }
 0xbec   :  { %2621 = vrot.lane.b32.xlu1 %v7072_v17, %s5736_s24  ;;  %v7122_v46 = vpop.f32.mrf.mxu3 }
 0xbf3   :  { %3257 = vrot.lane.b32.xlu0 %v7094_v22, %s5735_s23  ;;  %2661 = vrot.lane.b32.xlu2 %v7094_v22, %s5727_s27 }
 0xbf4   :  { %2655 = vrot.lane.b32.xlu1 %v7080_v56, %s5734_s22  ;;  %v7130_v38 = vpop.f32.mrf.mxu3 }
 0xbf5   :  { %8552 = vst [vmem:[#allocation19_spill] sm:$0xff] %v7130_v38 }
 0xbfb   :  { %2319 = vrot.lane.b32.xlu0 %v7108_v25, %s5728_s16  ;;  %2371 = vrot.lane.b32.xlu2 %v7108_v25, %s5729_s17 }
 0xbfc   :  { %2317 = vrot.lane.b32.xlu1 %v7094_v22, %s5728_s16  ;;  %v7148_v18 = vpop.f32.mrf.mxu3 }
 0xc03   :  { %3259 = vrot.lane.b32.xlu0 %v7108_v25, %s5735_s23  ;;  %2663 = vrot.lane.b32.xlu2 %v7108_v25, %s5727_s27 }
 0xc04   :  { %2953 = vrot.lane.b32.xlu1 %v7094_v22, %s5734_s22  ;;  %v7170_v60 = vpop.f32.mrf.mxu3 }
 0xc05   :  { %v5388_v6 = vpack.i.bf16 %v7148_v18, %v7170_v60 }
 0xc0b   :  { %2321 = vrot.lane.b32.xlu2 %v7122_v46, %s5728_s16  ;;  %2373 = vrot.lane.b32.xlu0 %v7122_v46, %s5729_s17 }
 0xc0c   :  { %2955 = vrot.lane.b32.xlu1 %v7108_v25, %s5734_s22  ;;  %v7196_v10 = vpop.f32.mrf.mxu3 }
 0xc13   :  { %2665 = vrot.lane.b32.xlu2 %v7122_v46, %s5727_s27  ;;  %2375 = vrot.lane.b32.xlu0 %v7130_v38, %s5729_s17 }
 0xc14   :  { %2923 = vrot.lane.b32.xlu1 %v7108_v25, %s5736_s24  ;;  %v7222_v58 = vpop.f32.mrf.mxu3 }
 0xc15   :  { %v7138_v28 = vpop.permute.xlu2 %2909 }
 0xc1b   :  { %2667 = vrot.lane.b32.xlu2 %v7130_v38, %s5727_s27  ;;  %2323 = vrot.lane.b32.xlu0 %v7130_v38, %s5728_s16 }
 0xc1c   :  { %2957 = vrot.lane.b32.xlu1 %v7122_v46, %s5734_s22 }
 0xc1d   :  { %v7146_v4 = vpop.permute.xlu2 %3245 }
 0xc23   :  { %2333 = vrot.lane.b32.xlu2 %v7148_v18, %s8553_s30  ;;  %2381 = vrot.lane.b32.xlu0 %v7148_v18, %s5730_s18 }
 0xc24   :  { %2959 = vrot.lane.b32.xlu1 %v7130_v38, %s5734_s22 }
 0xc25   :  { %v7156_v27 = vpop.permute.xlu2 %3247 }
 0xc2b   :  { %2629 = vrot.lane.b32.xlu2 %v7148_v18, %s5728_s16  ;;  %2965 = vrot.lane.b32.xlu0 %v7148_v18, %s5727_s27 }
 0xc2c   :  { %2673 = vrot.lane.b32.xlu1 %v7148_v18, %s5729_s17 }
 0xc2d   :  { %v7164_v50 = vpop.permute.xlu2 %2361  ;;  %v7166_v31 = vpop.permute.xlu0 %2617 }
 0xc2e   :  { %v7168_v44 = vpop.permute.xlu1 %2357 }
 0xc33   :  { %3269 = vrot.lane.b32.xlu2 %v7148_v18, %s5734_s22  ;;  %2383 = vrot.lane.b32.xlu0 %v7170_v60, %s5730_s18 }
 0xc34   :  { %2335 = vrot.lane.b32.xlu1 %v7170_v60, %s8553_s30 }
 0xc35   :  { %v7178_v40 = vpop.permute.xlu2 %2363  ;;  %v7180_v20 = vpop.permute.xlu0 %2941 }
 0xc36   :  { %v7182_v36 = vpop.permute.xlu1 %2649 }
 0xc3b   :  { %3271 = vrot.lane.b32.xlu2 %v7170_v60, %s5734_s22  ;;  %2631 = vrot.lane.b32.xlu0 %v7170_v60, %s5728_s16 }
 0xc3c   :  { %2675 = vrot.lane.b32.xlu1 %v7170_v60, %s5729_s17 }
 0xc3d   :  { %v7190_v11 = vpop.permute.xlu2 %2623  ;;  %v7192_v5 = vpop.permute.xlu0 %2943 }
 0xc3e   :  { %8554 = vst [vmem:[#allocation20_spill] sm:$0xff] %v7190_v11  ;;  %v7194_v41 = vpop.permute.xlu1 %2359  ;;  %v7353_v11 = vpack.i.bf16 %v7148_v18, %v7122_v46 }
 0xc43   :  { %2967 = vrot.lane.b32.xlu0 %v7170_v60, %s5727_s27  ;;  %2677 = vrot.lane.b32.xlu2 %v7196_v10, %s5729_s17 }
 0xc44   :  { %2337 = vrot.lane.b32.xlu1 %v7196_v10, %s8553_s30 }
 0xc45   :  { %v7204_v29 = vpop.permute.xlu2 %2369  ;;  %v7206_v61 = vpop.permute.xlu0 %2911 }
 0xc46   :  { %v7208_v45 = vpop.permute.xlu1 %2651 }
 0xc4b   :  { %3201 = vrot.lane.b32.xlu2 %v7050_v12, %s5729_s17  ;;  %2385 = vrot.lane.b32.xlu0 %v7196_v10, %s5730_s18 }
 0xc4c   :  { %2633 = vrot.lane.b32.xlu1 %v7196_v10, %s5728_s16 }
 0xc4d   :  { %v7216_v43 = vpop.permute.xlu2 %2661  ;;  %v7218_v52 = vpop.permute.xlu0 %2945 }
 0xc4e   :  { %8555 = vst [vmem:[#allocation21_spill] sm:$0xff] %v7218_v52  ;;  %v7220_v13 = vpop.permute.xlu1 %2619  ;;  %v5398_v52 = vpack.i.bf16 %v7170_v60, %v7130_v38 }
 0xc53   :  { %2915 = vrot.lane.b32.xlu2 %v7080_v56, %s5730_s18  ;;  %2387 = vrot.lane.b32.xlu0 %v7222_v58, %s5730_s18 }
 0xc54   :  { %2969 = vrot.lane.b32.xlu1 %v7196_v10, %s5727_s27 }
 0xc55   :  { %v7230_v47 = vpop.permute.xlu2 %2371  ;;  %v7232_v54 = vpop.permute.xlu0 %2947 }
 0xc56   :  { %8556 = vst [vmem:[#allocation22_spill] sm:$0xff] %v7232_v54  ;;  %v7234_v2 = vpop.permute.xlu1 %2653 }
 0xc5b   :  { %3215 = vrot.lane.b32.xlu2 %v7108_v25, %s5730_s18  ;;  %2913 = vrot.lane.b32.xlu0 %v7072_v17, %s5730_s18 }
 0xc5c   :  { %2925 = vrot.lane.b32.xlu1 %v7122_v46, %s5736_s24 }
 0xc5d   :  { %v7242_v26 = vpop.permute.xlu2 %2663  ;;  %v7244_v0 = vpop.permute.xlu0 %2921 }
 0xc5e   :  { %v7246_v30 = vpop.permute.xlu1 %2621 }
 0xc63   :  { %3263 = vrot.lane.b32.xlu2 %v7130_v38, %s5735_s23  ;;  %3213 = vrot.lane.b32.xlu0 %v7094_v22, %s5730_s18 }
 0xc64   :  { %3225 = vrot.lane.b32.xlu1 %v7148_v18, %s5736_s24 }
 0xc65   :  { %v7254_v49 = vpop.permute.xlu2 %2321  ;;  %v7256_v42 = vpop.permute.xlu0 %3257 }
 0xc66   :  { %v7258_v3 = vpop.permute.xlu1 %2655 }
 0xc6b   :  { %3261 = vrot.lane.b32.xlu2 %v7122_v46, %s5735_s23  ;;  %2927 = vrot.lane.b32.xlu0 %v7130_v38, %s5736_s24 }
 0xc6c   :  { %3203 = vrot.lane.b32.xlu1 %v7064_v59, %s5729_s17 }
 0xc6d   :  { %v7266_v39 = vpop.permute.xlu2 %2665  ;;  %v7268_v32 = vpop.permute.xlu0 %2319 }
 0xc6e   :  { %v2318_v23 = vpop.permute.xlu1 %2317 }
 0xc73   :  { %2339 = vrot.lane.b32.xlu2 %v7222_v58, %s8553_s30  ;;  %3227 = vrot.lane.b32.xlu0 %v7170_v60, %s5736_s24 }
 0xc74   :  { %3251 = vrot.lane.b32.xlu1 %v7080_v56, %s5732_s20 }
 0xc75   :  { %v7276_v63 = vpop.permute.xlu2 %2667  ;;  %v7278_v15 = vpop.permute.xlu0 %3259 }
 0xc76   :  { %v7280_v21 = vpop.permute.xlu1 %2953 }
 0xc7b   :  { %2679 = vrot.lane.b32.xlu2 %v7222_v58, %s5729_s17  ;;  %3273 = vrot.lane.b32.xlu0 %v7196_v10, %s5734_s22 }
 0xc7c   :  { %3249 = vrot.lane.b32.xlu1 %v7072_v17, %s5732_s20 }
 0xc7d   :  { %v2334_v24 = vpop.permute.xlu2 %2333  ;;  %v7288_v9 = vpop.permute.xlu0 %2373 }
 0xc7e   :  { %v7290_v19 = vpop.permute.xlu1 %2955 }
 0xc83   :  { %3217 = vrot.lane.b32.xlu2 %v7122_v46, %s5730_s18  ;;  %3275 = vrot.lane.b32.xlu0 %v7222_v58, %s5734_s22  ;;  %s8559_s22 = smov 96  }
 0xc84   :  { %3205 = vrot.lane.b32.xlu1 %v7072_v17, %s5729_s17 }
 0xc85   :  { %v7298_v48 = vpop.permute.xlu2 %2629  ;;  %v7300_v1 = vpop.permute.xlu0 %2375 }
 0xc86   :  { %v7302_v16 = vpop.permute.xlu1 %2923 }
 0xc8b   :  { %2635 = vrot.lane.b32.xlu2 %v7222_v58, %s5728_s16  ;;  %3229 = vrot.lane.b32.xlu0 %v7196_v10, %s5736_s24 }
 0xc8c   :  { %2971 = vrot.lane.b32.xlu1 %v7222_v58, %s5727_s27 }
 0xc8d   :  { %v7310_v55 = vpop.permute.xlu2 %3269  ;;  %v7312_v53 = vpop.permute.xlu0 %2323 }
 0xc8e   :  { %v7314_v14 = vpop.permute.xlu1 %2957 }
 0xc8f   :  { %8557 = vst [vmem:[#allocation23_spill] sm:$0xff] %v7314_v14 }
 0xc93   :  { %3219 = vrot.lane.b32.xlu2 %v7130_v38, %s5730_s18  ;;  %3231 = vrot.lane.b32.xlu0 %v7222_v58, %s5736_s24  ;;  %v7357_v38 = vpack.i.bf16 %v7094_v22, %v7072_v17 }
 0xc94   :  { %3207 = vrot.lane.b32.xlu1 %v7080_v56, %s5729_s17  ;;  %s8560_s17 = smov 92  }
 0xc95   :  { %v7322_v34 = vpop.permute.xlu2 %3271  ;;  %v2382_v57 = vpop.permute.xlu0 %2381 }
 0xc96   :  { %v7324_v35 = vpop.permute.xlu1 %2959 }
 0xc97   :  { %8558 = vst [vmem:[#allocation24_spill] sm:$0xff] %v7324_v35 }
 0xc9b   :  { %5384 = vrot.lane.b32.xlu2 %v5383_v51, %s5732_s20  ;;  %5389 = vrot.lane.b32.xlu0 %v5388_v6, %s5735_s23  ;;  %v2394_v6 = vsel %vm64_vm1, %v7194_v41, %v7230_v47  ;;  %v2393_v41 = vsel %vm64_vm1, %v7168_v44, %v7204_v29 }
 0xc9c   :  { %5379 = vrot.lane.b32.xlu1 %v5378_v7, %s8559_s22  ;;  %v2397_v47 = vsel %vm432_vm4, %v2393_v41, %v2382_v57  ;;  %v2686_v57 = vsel %vm64_vm1, %v7208_v45, %v7242_v26  ;;  %v2346_v45 = vsel %vm64_vm1, %v7064_v59, %v7268_v32  ;;  %v2978_v26 = vsel %vm64_vm1, %v7192_v5, %v7290_v19 }
 0xc9d   :  { %v7335_v33 = vpop.permute.xlu2 %2677  ;;  %v2966_v37 = vpop.permute.xlu0 %2965  ;;  %v2641_v5 = vsel %vm64_vm1, %v7166_v31, %v7094_v22  ;;  %v3281_v22 = vsel %vm64_vm1, %v7146_v4, %v7256_v42 }
 0xc9e   :  { %v2674_v8 = vpop.permute.xlu1 %2673  ;;  %v3285_v31 = vsel %vm432_vm4, %v3281_v22, %v7310_v55  ;;  %v8566_v22 = vld [vmem:[#allocation22_spill] sm:$0xff] }
 0xca3   :  { %5394 = vrot.lane.b32.xlu2 %v5393_v62, %s8559_s22  ;;  %5399 = vrot.lane.b32.xlu0 %v5398_v52, %s5732_s20 }
 0xca4   :  { %5404 = vrot.lane.b32.xlu1 %v5378_v7, %s8560_s17 }
 0xca5   :  { %v7347_v51 = vpop.permute.xlu2 %3201  ;;  %v2384_v14 = vpop.permute.xlu0 %2383 }
 0xca6   :  { %v2336_v54 = vpop.permute.xlu1 %2335  ;;  %v2398_v35 = vsel %vm432_vm4, %v2394_v6, %v2384_v14 }
 0xca7   :  { %5110 = vmatpush.xpose.msk.msra.mxu0 %vm529_vm3, %v2398_v35  ;;  %v2345_v35 = vsel %vm64_vm1, %v7050_v12, %v2318_v23  ;;  %v2685_v12 = vsel %vm64_vm1, %v7182_v36, %v7216_v43 }
 0xca8   :  { %v2349_v44 = vsel %vm432_vm4, %v2345_v35, %v2334_v24  ;;  %v2689_v23 = vsel %vm432_vm4, %v2685_v12, %v2674_v8  ;;  %v2350_v8 = vsel %vm432_vm4, %v2346_v45, %v2336_v54  ;;  %v2934_v35 = vsel %vm64_vm1, %v7206_v61, %v7302_v16 }
 0xca9   :  { %v2938_v16 = vsel %vm432_vm4, %v2934_v35, %v7170_v60  ;;  %v2643_v60 = vsel %vm64_vm1, %v7246_v30, %v7122_v46 }
 0xcab   :  { %5414 = vrot.lane.b32.xlu2 %v7353_v11, %s5732_s20  ;;  %5409 = vrot.lane.b32.xlu0 %v7357_v38, %s8559_s22 }
 0xcac   :  { %5429 = vrot.lane.b32.xlu1 %v5378_v7, %s8561_s2  ;;  %5111 = vmatpush.xpose.msk.msra.mxu0 %vm529_vm3, %v2397_v47 }
 0xcad   :  { %v7371_v14 = vpop.permute.xlu2 %2915  ;;  %v2632_v6 = vpop.permute.xlu0 %2631 }
 0xcae   :  { %v2676_v29 = vpop.permute.xlu1 %2675 }
 0xcaf   :  { %v2690_v41 = vsel %vm432_vm4, %v2686_v57, %v2676_v29  ;;  %5112 = vmatmul.msk.f32.vlgmr.msra.gmra.mxu0 %vm529_vm3, %v2349_v44 }
 0xcb0   :  { %5122 = vmatpush.xpose.msk.msrb.mxu0 %vm529_vm3, %v2690_v41 }
 0xcb3   :  { %5424 = vrot.lane.b32.xlu2 %v5398_v52, %s8559_s22  ;;  %5419 = vrot.lane.b32.xlu0 %v5393_v62, %s8560_s17 }
 0xcb4   :  { %5454 = vrot.lane.b32.xlu1 %v5378_v7, %s8562_s0  ;;  %5123 = vmatpush.xpose.msk.msrb.mxu0 %vm529_vm3, %v2689_v23  ;;  %v2977_v7 = vsel %vm64_vm1, %v7180_v20, %v7280_v21  ;;  %v3282_v20 = vsel %vm64_vm1, %v7156_v27, %v7278_v15  ;;  %v2396_v27 = vsel %vm64_vm1, %v7178_v40, %v7300_v1 }
 0xcb5   :  { %v7394_v24 = vpop.permute.xlu2 %3215  ;;  %v2968_v36 = vpop.permute.xlu0 %2967  ;;  %v2981_v59 = vsel %vm432_vm4, %v2977_v7, %v2966_v37  ;;  %v2645_v37 = vsel %vm432_vm4, %v2641_v5, %v7298_v48  ;;  %v3286_v19 = vsel %vm432_vm4, %v3282_v20, %v7322_v34  ;;  %v2642_v34 = vsel %vm64_vm1, %v7220_v13, %v7108_v25 }
 0xcb6   :  { %v2338_v43 = vpop.permute.xlu1 %2337  ;;  %v2982_v47 = vsel %vm432_vm4, %v2978_v26, %v2968_v36  ;;  %v2646_v42 = vsel %vm432_vm4, %v2642_v34, %v2632_v6  ;;  %v7447_v25 = vpack.i.bf16 %v7196_v10, %v7222_v58  ;;  %v2395_v1 = vsel %vm64_vm1, %v7164_v50, %v7288_v9 }
 0xcb7   :  { %5113 = vmatmul.msk.f32.gmra.mxu0 %vm529_vm3, %v2350_v8  ;;  %v2933_v40 = vsel %vm64_vm1, %v7138_v28, %v7244_v0  ;;  %v2347_v13 = vsel %vm64_vm1, %v7072_v17, %v7254_v49  ;;  %v2688_v49 = vsel %vm64_vm1, %v7258_v3, %v7276_v63 }
 0xcb8   :  { %5134 = vmatpush.xpose.msk.msra.mxu0 %vm529_vm3, %v2982_v47  ;;  %v2937_v9 = vsel %vm432_vm4, %v2933_v40, %v7148_v18  ;;  %v2351_v28 = vsel %vm432_vm4, %v2347_v13, %v2338_v43  ;;  %v2348_v18 = vsel %vm64_vm1, %v7080_v56, %v7312_v53  ;;  %v2687_v53 = vsel %vm64_vm1, %v7234_v2, %v7266_v39  ;;  %v8564_v2 = vld [vmem:[#allocation20_spill] sm:$0xff] }
 0xcb9   :  { %v2691_v61 = vsel %vm432_vm4, %v2687_v53, %v7335_v33  ;;  %v8563_v33 = vld [vmem:[#allocation19_spill] sm:$0xff] }
 0xcba   :  { %v2644_v39 = vsel %vm64_vm1, %v8564_v2, %v8563_v33 }
 0xcbb   :  { %5434 = vrot.lane.b32.xlu2 %v7357_v38, %s8560_s17  ;;  %5439 = vrot.lane.b32.xlu0 %v7353_v11, %s8559_s22 }
 0xcbc   :  { %5135 = vmatpush.xpose.msk.msra.mxu0 %vm529_vm3, %v2981_v59 }
 0xcbd   :  { %v7412_v54 = vpop.permute.xlu2 %3263  ;;  %v2386_v32 = vpop.permute.xlu0 %2385 }
 0xcbe   :  { %v2634_v21 = vpop.permute.xlu1 %2633 }
 0xcbf   :  { %5124 = vmatmul.msk.f32.vlgmr.msrb.gmra.mxu0 %vm529_vm3, %v2645_v37  ;;  %v2647_v23 = vsel %vm432_vm4, %v2643_v60, %v2634_v21 }
 0xcc0   :  { %5146 = vmatpush.xpose.msk.msrb.mxu0 %vm529_vm3, %v3286_v19  ;;  %v8565_v19 = vld [vmem:[#allocation24_spill] sm:$0xff] }
 0xcc3   :  { %5444 = vrot.lane.b32.xlu2 %v5393_v62, %s8561_s2  ;;  %5449 = vrot.lane.b32.xlu0 %v5398_v52, %s8560_s17  ;;  %v2399_v52 = vsel %vm432_vm4, %v2395_v1, %v2386_v32 }
 0xcc4   :  { %5147 = vmatpush.xpose.msk.msrb.mxu0 %vm529_vm3, %v3285_v31  ;;  %v2980_v31 = vsel %vm64_vm1, %v8566_v22, %v8565_v19 }
 0xcc5   :  { %v7437_v15 = vpop.permute.xlu2 %3261  ;;  %v2388_v4 = vpop.permute.xlu0 %2387 }
 0xcc6   :  { %v7440_v55 = vpop.permute.xlu1 %2969  ;;  %v2400_v62 = vsel %vm432_vm4, %v2396_v27, %v2388_v4  ;;  %v8567_v4 = vld [vmem:[#allocation23_spill] sm:$0xff] }
 0xcc7   :  { %5125 = vmatmul.msk.f32.gmra.mxu0 %vm529_vm3, %v2646_v42  ;;  %5114 = vmatpush.xpose.msk.msrb.mxu1 %vm529_vm3, %v2400_v62  ;;  %v8568_v42 = vld [vmem:[#allocation21_spill] sm:$0xff] }
 0xcc8   :  { %v2979_v62 = vsel %vm64_vm1, %v8568_v42, %v8567_v4 }
 0xcc9   :  { %v2983_v1 = vsel %vm432_vm4, %v2979_v62, %v7440_v55 }
 0xccb   :  { %5459 = vrot.lane.b32.xlu2 %v7447_v25, %s5735_s23  ;;  %5464 = vrot.lane.b32.xlu0 %v7447_v25, %s5732_s20  ;;  %s8569_s20 = smov 80   ;;  %s8573_s23 = smov 12  }
 0xccc   :  { %5115 = vmatpush.xpose.msk.msrb.mxu1 %vm529_vm3, %v2399_v52 }
 0xccd   :  { %v2340_v48 = vpop.permute.xlu2 %2339  ;;  %v2914_v50 = vpop.permute.xlu0 %2913 }
 0xcce   :  { %v2926_v0 = vpop.permute.xlu1 %2925  ;;  %v2352_v44 = vsel %vm432_vm4, %v2348_v18, %v2340_v48 }
 0xccf   :  { %5116 = vmatmul.msk.f32.vlgmr.msrb.gmra.mxu1 %vm529_vm3, %v2351_v28  ;;  %5136 = vmatmul.msk.f32.vlgmr.msra.gmra.mxu0 %vm529_vm3, %v2937_v9  ;;  %v2935_v40 = vsel %vm64_vm1, %v2914_v50, %v2926_v0 }
 0xcd0   :  { %v2939_v55 = vsel %vm432_vm4, %v2935_v40, %v7196_v10 }
 0xcd3   :  { %5469 = vrot.lane.b32.xlu0 %v7447_v25, %s8559_s22  ;;  %s5748_s22 = smov [#allocation2]  }
 0xcd5   :  { %v2680_v6 = vpop.permute.xlu2 %2679  ;;  %v3214_v57 = vpop.permute.xlu0 %3213 }
 0xcd6   :  { %v3226_v29 = vpop.permute.xlu1 %3225  ;;  %v2692_v41 = vsel %vm432_vm4, %v2688_v49, %v2680_v6  ;;  %v3237_v3 = vsel %vm64_vm1, %v7347_v51, %v3214_v57 }
 0xcd7   :  { %5117 = vmatmul.msk.f32.gmra.mxu1 %vm529_vm3, %v2352_v44  ;;  %5137 = vmatmul.msk.f32.gmra.mxu0 %vm529_vm3, %v2938_v16  ;;  %v3241_v45 = vsel %vm432_vm4, %v3237_v3, %v3226_v29 }
 0xcd8   :  { %5126 = vmatpush.xpose.msk.msra.mxu1 %vm529_vm3, %v2692_v41 }
 0xcdc   :  { %5127 = vmatpush.xpose.msk.msra.mxu1 %vm529_vm3, %v2691_v61 }
 0xcdd   :  { %v3218_v63 = vpop.permute.xlu2 %3217  ;;  %v2928_v12 = vpop.permute.xlu0 %2927 }
 0xcde   :  { %v3204_v26 = vpop.permute.xlu1 %3203  ;;  %v2936_v50 = vsel %vm64_vm1, %v7371_v14, %v2928_v12 }
 0xcdf   :  { %5128 = vmatmul.msk.f32.vlgmr.msra.gmra.mxu1 %vm529_vm3, %v2647_v23  ;;  %5148 = vmatmul.msk.f32.vlgmr.msrb.gmra.mxu0 %vm529_vm3, %v3241_v45  ;;  %v3238_v51 = vsel %vm64_vm1, %v3204_v26, %v7394_v24  ;;  %v2940_v6 = vsel %vm432_vm4, %v2936_v50, %v7222_v58 }
 0xce5   :  { %v2636_v36 = vpop.permute.xlu2 %2635  ;;  %v3228_v30 = vpop.permute.xlu0 %3227 }
 0xce6   :  { %v3252_v8 = vpop.permute.xlu1 %3251  ;;  %v2648_v43 = vsel %vm432_vm4, %v2644_v39, %v2636_v36  ;;  %v3242_v47 = vsel %vm432_vm4, %v3238_v51, %v3228_v30 }
 0xce7   :  { %5129 = vmatmul.msk.f32.gmra.mxu1 %vm529_vm3, %v2648_v43  ;;  %5149 = vmatmul.msk.f32.gmra.mxu0 %vm529_vm3, %v3242_v47  ;;  %v3284_v52 = vsel %vm64_vm1, %v3252_v8, %v7412_v54 }
 0xced   :  { %v3220_v7 = vpop.permute.xlu2 %3219  ;;  %v3274_v59 = vpop.permute.xlu0 %3273 }
 0xcee   :  { %v3250_v5 = vpop.permute.xlu1 %3249 }
 0xcef   :  { %v3283_v48 = vsel %vm64_vm1, %v3250_v5, %v7437_v15 }
 0xcf0   :  { %v3287_v54 = vsel %vm432_vm4, %v3283_v48, %v3274_v59 }
 0xcf5   :  { %v5385_v32 = vpop.permute.xlu2 %5384  ;;  %v3276_v20 = vpop.permute.xlu0 %3275 }
 0xcf6   :  { %v3206_v37 = vpop.permute.xlu1 %3205  ;;  %v3288_v13 = vsel %vm432_vm4, %v3284_v52, %v3276_v20  ;;  %v5387_v57 = vunpack.i.h.bf16 %v5385_v32  ;;  %v5386_v10 = vunpack.i.l.bf16 %v5385_v32 }
 0xcf7   :  { %v3239_v3 = vsel %vm64_vm1, %v3206_v37, %v3218_v63 }
 0xcfd   :  { %v7511_v21 = vpop.permute.xlu2 %5394  ;;  %v3230_v24 = vpop.permute.xlu0 %3229 }
 0xcfe   :  { %v2972_v34 = vpop.permute.xlu1 %2971  ;;  %v3243_v12 = vsel %vm432_vm4, %v3239_v3, %v3230_v24  ;;  %v5397_v26 = vunpack.i.h.bf16 %v7511_v21  ;;  %v5396_v22 = vunpack.i.l.bf16 %v7511_v21 }
 0xcff   :  { %v2984_v27 = vsel %vm432_vm4, %v2980_v31, %v2972_v34 }
 0xd00   :  { %5138 = vmatpush.xpose.msk.msrb.mxu1 %vm529_vm3, %v2984_v27 }
 0xd04   :  { %5139 = vmatpush.xpose.msk.msrb.mxu1 %vm529_vm3, %v2983_v1 }
 0xd05   :  { %v7531_v9 = vpop.permute.xlu2 %5414  ;;  %v3232_v28 = vpop.permute.xlu0 %3231 }
 0xd06   :  { %v3208_v35 = vpop.permute.xlu1 %3207  ;;  %v5417_v5 = vunpack.i.h.bf16 %v7531_v9  ;;  %v5416_v40 = vunpack.i.l.bf16 %v7531_v9 }
 0xd07   :  { %5140 = vmatmul.msk.f32.vlgmr.msrb.gmra.mxu1 %vm529_vm3, %v2939_v55  ;;  %v3240_v36 = vsel %vm64_vm1, %v3208_v35, %v3220_v7 }
 0xd08   :  { %5150 = vmatpush.xpose.msk.msra.mxu1 %vm529_vm3, %v3288_v13  ;;  %v3244_v8 = vsel %vm432_vm4, %v3240_v36, %v3232_v28 }
 0xd0c   :  { %5151 = vmatpush.xpose.msk.msra.mxu1 %vm529_vm3, %v3287_v54 }
 0xd0d   :  { %v7540_v0 = vpop.permute.xlu2 %5424  ;;  %v5390_v15 = vpop.permute.xlu0 %5389 }
 0xd0e   :  { %v5380_v49 = vpop.permute.xlu1 %5379  ;;  %v5391_v18 = vunpack.i.l.bf16 %v5390_v15  ;;  %v5392_v41 = vunpack.i.h.bf16 %v5390_v15  ;;  %v5426_v3 = vunpack.i.l.bf16 %v7540_v0 }
 0xd0f   :  { %v5382_v44 = vunpack.i.h.bf16 %v5380_v49  ;;  %v5381_v29 = vunpack.i.l.bf16 %v5380_v49  ;;  %5141 = vmatmul.msk.f32.gmra.mxu1 %vm529_vm3, %v2940_v6 }
 0xd11   :  { %v2438_v16 = vsel %vm64_vm1, %v5381_v29, %v5386_v10  ;;  %v2437_v53 = vsel %vm64_vm1, %v5382_v44, %v5387_v57 }
 0xd12   :  { %v2442_v14 = vsel %vm432_vm4, %v2438_v16, %v5391_v18  ;;  %v2441_v61 = vsel %vm432_vm4, %v2437_v53, %v5392_v41 }
 0xd13   :  { %2579 = vmatpush.msra.mxu2 %v2442_v14 }
 0xd15   :  { %2580 = vmatpush.msra.mxu2 %v2441_v61  ;;  %v7550_v58 = vpop.permute.xlu2 %5434  ;;  %v5400_v60 = vpop.permute.xlu0 %5399 }
 0xd16   :  { %v5405_v23 = vpop.permute.xlu1 %5404  ;;  %v5402_v45 = vunpack.i.h.bf16 %v5400_v60  ;;  %v5437_v32 = vunpack.i.h.bf16 %v7550_v58  ;;  %v5401_v19 = vunpack.i.l.bf16 %v5400_v60 }
 0xd17   :  { %v5406_v2 = vunpack.i.l.bf16 %v5405_v23  ;;  %5152 = vmatmul.msk.f32.vlgmr.msra.gmra.mxu1 %vm529_vm3, %v3243_v12  ;;  %v5407_v43 = vunpack.i.h.bf16 %v5405_v23 }
 0xd18   :  { %v2440_v52 = vsel %vm64_vm1, %v5396_v22, %v5401_v19 }
 0xd19   :  { %v2730_v39 = vsel %vm64_vm1, %v5406_v2, %v5397_v26  ;;  %v5436_v26 = vunpack.i.l.bf16 %v7550_v58 }
 0xd1a   :  { %v2734_v51 = vsel %vm432_vm4, %v2730_v39, %v5402_v45 }
 0xd1b   :  { %2871 = vmatpush.msrb.mxu2 %v2734_v51 }
 0xd1d   :  { %v5445_v63 = vpop.permute.xlu2 %5444  ;;  %v5410_v30 = vpop.permute.xlu0 %5409 }
 0xd1e   :  { %v5430_v47 = vpop.permute.xlu1 %5429  ;;  %v5412_v59 = vunpack.i.h.bf16 %v5410_v30  ;;  %v5411_v31 = vunpack.i.l.bf16 %v5410_v30  ;;  %v5447_v6 = vunpack.i.h.bf16 %v5445_v63  ;;  %v5446_v44 = vunpack.i.l.bf16 %v5445_v63 }
 0xd1f   :  { %v5432_v20 = vunpack.i.h.bf16 %v5430_v47  ;;  %5153 = vmatmul.msk.f32.gmra.mxu1 %vm529_vm3, %v3244_v8  ;;  %v5431_v4 = vunpack.i.l.bf16 %v5430_v47 }
 0xd20   :  { %v2729_v37 = vsel %vm64_vm1, %v5407_v43, %v5412_v59  ;;  %v2439_v28 = vsel %vm64_vm1, %v5411_v31, %v5416_v40 }
 0xd21   :  { %v2733_v24 = vsel %vm432_vm4, %v2729_v37, %v5417_v5  ;;  %v3021_v7 = vsel %vm64_vm1, %v5432_v20, %v5437_v32 }
 0xd22   :  { %2872 = vmatpush.msrb.mxu2 %v2733_v24 }
 0xd25   :  { %v5460_v34 = vpop.permute.xlu2 %5459  ;;  %v5420_v27 = vpop.permute.xlu0 %5419 }
 0xd26   :  { %v5462_v42 = vunpack.i.h.bf16 %v5460_v34  ;;  %v5461_v62 = vunpack.i.l.bf16 %v5460_v34  ;;  %v5422_v1 = vunpack.i.h.bf16 %v5420_v27  ;;  %v7578_v50 = vpop.permute.xlu1 %5454  ;;  %v5421_v61 = vunpack.i.l.bf16 %v5420_v27 }
 0xd27   :  { %v5456_v49 = vunpack.i.l.bf16 %v7578_v50 }
 0xd28   :  { %v2444_v13 = vsel %vm432_vm4, %v2440_v52, %v5461_v62  ;;  %v7570_v48 = vsel %vm64_vm1, %v5431_v4, %v5422_v1  ;;  %v2443_v21 = vsel %vm432_vm4, %v2439_v28, %v5462_v42  ;;  %v2732_v2 = vsel %vm64_vm1, %v5421_v61, %v5426_v3 }
 0xd29   :  { %2608 = vmatpush.msrb.mxu3 %v2444_v13  ;;  %v3326_v16 = vsel %vm64_vm1, %v5456_v49, %v5447_v6 }
 0xd2b   :  { %2609 = vmatpush.msrb.mxu3 %v2443_v21 }
 0xd2c   :  { %v7574_v55 = vpop.f32.mrf.mxu0 }
 0xd2d   :  { %v2515_v35 = vsel %vm306_vm2, %v7574_v55, -inf  ;;  %v5440_v54 = vpop.permute.xlu0 %5439 }
 0xd2e   :  { %2516 = vmax.xlane.f32.xlu1 %v2515_v35  ;;  %v5442_v9 = vunpack.i.h.bf16 %v5440_v54  ;;  %v5441_v60 = vunpack.i.l.bf16 %v5440_v54 }
 0xd30   :  { %v7581_v15 = vsel %vm432_vm4, %v3021_v7, %v5442_v9  ;;  %v2731_v36 = vsel %vm64_vm1, %v5436_v26, %v5441_v60 }
 0xd34   :  { %v7584_v18 = vpop.f32.mrf.mxu0 }
 0xd35   :  { %v2518_v57 = vsel %vm306_vm2, %v7584_v18, -inf  ;;  %v5450_v10 = vpop.permute.xlu0 %5449 }
 0xd36   :  { %2519 = vmax.xlane.f32.xlu2 %v2518_v57  ;;  %v5452_v29 = vunpack.i.h.bf16 %v5450_v10  ;;  %v5451_v41 = vunpack.i.l.bf16 %v5450_v10 }
 0xd38   :  { %v7590_v53 = vsel %vm64_vm1, %v5446_v44, %v5451_v41  ;;  %v7593_v14 = vsel %vm432_vm4, %v3326_v16, %v5452_v29  ;;  %v5457_v16 = vunpack.i.h.bf16 %v7578_v50 }
 0xd3c   :  { %v7598_v39 = vpop.f32.mrf.mxu0 }
 0xd3d   :  { %v5465_v12 = vpop.permute.xlu0 %5464  ;;  %v2807_v24 = vsel %vm306_vm2, %v7598_v39, -inf }
 0xd3e   :  { %v5467_v23 = vunpack.i.h.bf16 %v5465_v12  ;;  %v5466_v45 = vunpack.i.l.bf16 %v5465_v12 }
 0xd40   :  { %v2736_v51 = vsel %vm432_vm4, %v2732_v2, %v5466_v45  ;;  %v2735_v63 = vsel %vm432_vm4, %v2731_v36, %v5467_v23 }
 0xd41   :  { %2900 = vmatpush.msra.mxu3 %v2736_v51 }
 0xd43   :  { %2901 = vmatpush.msra.mxu3 %v2735_v63 }
 0xd44   :  { %v7605_v30 = vpop.f32.mrf.mxu0 }
 0xd45   :  { %v2810_v59 = vsel %vm306_vm2, %v7605_v30, -inf  ;;  %v7672_v61 = vpop.permute.xlu0 %5469 }
 0xd47   :  { %5479 = vrot.lane.b32.xlu1 %v7353_v11, %s8560_s17 }
 0xd4c   :  { %v7607_v8 = vpop.f32.mrf.mxu1  ;;  %v7613_v43 = vpop.f32.mrf.mxu0 }
 0xd4d   :  { %v2521_v58 = vsel %vm306_vm2, %v7607_v8, -inf  ;;  %v3099_v34 = vsel %vm306_vm2, %v7613_v43, -inf }
 0xd4e   :  { %5474 = vrot.lane.b32.xlu2 %v7357_v38, %s8561_s2  ;;  %2522 = vmax.xlane.f32.xlu0 %v2521_v58 }
 0xd54   :  { %v7615_v47 = vpop.f32.mrf.mxu1  ;;  %v7621_v5 = vpop.f32.mrf.mxu0 }
 0xd55   :  { %v2524_v22 = vsel %vm306_vm2, %v7615_v47, -inf  ;;  %v3102_v27 = vsel %vm306_vm2, %v7621_v5, -inf }
 0xd56   :  { %2811 = vmax.xlane.f32.xlu0 %v2810_v59 }
 0xd5c   :  { %v7619_v11 = vpop.f32.mrf.mxu1  ;;  %v7627_v38 = vpop.f32.mrf.mxu0 }
 0xd5d   :  { %v3403_v37 = vsel %vm306_vm2, %v7627_v38, -inf  ;;  %v2813_v31 = vsel %vm306_vm2, %v7619_v11, -inf }
 0xd64   :  { %v7623_v32 = vpop.f32.mrf.mxu1  ;;  %v7633_v7 = vpop.f32.mrf.mxu0 }
 0xd65   :  { %v2816_v20 = vsel %vm306_vm2, %v7623_v32, -inf  ;;  %v3406_v19 = vsel %vm306_vm2, %v7633_v7, -inf }
 0xd66   :  { %2817 = vmax.xlane.f32.xlu0 %v2816_v20 }
 0xd6e   :  { %3404 = vmax.xlane.f32.xlu0 %v3403_v37 }
 0xd71   :  { %2808 = vmax.xlane.f32.xlu1 %v2807_v24 }
 0xd76   :  { %3407 = vmax.xlane.f32.xlu0 %v3406_v19 }
 0xd77   :  { %2525 = vmax.xlane.f32.xlu2 %v2524_v22 }
 0xd79   :  { %2814 = vmax.xlane.f32.xlu1 %v2813_v31 }
 0xd7f   :  { %3100 = vmax.xlane.f32.xlu2 %v3099_v34 }
 0xd81   :  { %3103 = vmax.xlane.f32.xlu1 %v3102_v27 }
 0xd84   :  { %v7645_v4 = vpop.f32.mrf.mxu1 }
 0xd85   :  { %v3105_v42 = vsel %vm306_vm2, %v7645_v4, -inf }
 0xd87   :  { %3106 = vmax.xlane.f32.xlu2 %v3105_v42 }
 0xd8c   :  { %v7649_v62 = vpop.f32.mrf.mxu1 }
 0xd8d   :  { %v3108_v1 = vsel %vm306_vm2, %v7649_v62, -inf }
 0xd8f   :  { %3109 = vmax.xlane.f32.xlu2 %v3108_v1 }
 0xd94   :  { %v7653_v40 = vpop.f32.mrf.mxu1 }
 0xd95   :  { %v3409_v52 = vsel %vm306_vm2, %v7653_v40, -inf }
 0xd96   :  { %3410 = vmax.xlane.f32.xlu1 %v3409_v52 }
 0xd9c   :  { %v7657_v13 = vpop.f32.mrf.mxu1 }
 0xd9d   :  { %v3412_v28 = vsel %vm306_vm2, %v7657_v13, -inf }
 0xd9e   :  { %3413 = vmax.xlane.f32.xlu1 %v3412_v28 }
 0xda1   :  { %v2517_v21 = vpop.xlane.xlu1 %2516 }
 0xda2   :  { %v2527_v35 = vsub.f32 %v7574_v55, %v2517_v21 }
 0xda4   :  { %v2531_v54 = vmul.f32 1.442695, %v2527_v35 }
 0xda6   :  { %5601 = vpow2.f32 %v2531_v54 }
 0xda9   :  { %v2520_v9 = vpop.xlane.xlu2 %2519 }
 0xdaa   :  { %v2528_v49 = vsub.f32 %v7584_v18, %v2520_v9 }
 0xdac   :  { %v7663_v6 = vpop.eup %5601  ;;  %v2533_v57 = vmul.f32 1.442695, %v2528_v49 }
 0xdad   :  { %v2539_v10 = vsel %vm306_vm2, %v7663_v6, 0.0 }
 0xdae   :  { %5603 = vpow2.f32 %v2533_v57  ;;  %2540 = vadd.xlane.f32.xlu1 %v2539_v10 }
 0xdb1   :  { %v5475_v29 = vpop.permute.xlu2 %5474 }
 0xdb2   :  { %v5477_v55 = vunpack.i.h.bf16 %v5475_v29  ;;  %v5476_v3 = vunpack.i.l.bf16 %v5475_v29 }
 0xdb4   :  { %v7667_v44 = vpop.eup %5603  ;;  %v3325_v23 = vsel %vm64_vm1, %v5457_v16, %v5477_v55 }
 0xdb5   :  { %v2542_v41 = vsel %vm306_vm2, %v7667_v44, 0.0 }
 0xdb6   :  { %2543 = vadd.xlane.f32.xlu0 %v2542_v41 }
 0xdb9   :  { %v5480_v18 = vpop.permute.xlu1 %5479 }
 0xdba   :  { %v5482_v60 = vunpack.i.h.bf16 %v5480_v18  ;;  %v5481_v12 = vunpack.i.l.bf16 %v5480_v18 }
 0xdbc   :  { %v7676_v45 = vsel %vm64_vm1, %v5476_v3, %v5481_v12  ;;  %v7679_v26 = vsel %vm432_vm4, %v3325_v23, %v5482_v60 }
 0xdc1   :  { %v2523_v2 = vpop.xlane.xlu0 %2522 }
 0xdc2   :  { %v2529_v51 = vsub.f32 %v7607_v8, %v2523_v2 }
 0xdc4   :  { %v2535_v36 = vmul.f32 1.442695, %v2529_v51 }
 0xdc6   :  { %5605 = vpow2.f32 %v2535_v36 }
 0xdc9   :  { %v2812_v58 = vpop.xlane.xlu0 %2811 }
 0xdca   :  { %v2820_v24 = vsub.f32 %v7605_v30, %v2812_v58 }
 0xdcc   :  { %v7682_v50 = vpop.eup %5605  ;;  %v2825_v31 = vmul.f32 1.442695, %v2820_v24 }
 0xdcd   :  { %v2545_v63 = vsel %vm306_vm2, %v7682_v50, 0.0 }
 0xdce   :  { %2546 = vadd.xlane.f32.xlu2 %v2545_v63 }
 0xdd9   :  { %v2818_v59 = vpop.xlane.xlu0 %2817 }
 0xde1   :  { %v3405_v22 = vpop.xlane.xlu0 %3404 }
 0xde2   :  { %v3415_v60 = vsub.f32 %v7627_v38, %v3405_v22 }
 0xde4   :  { %v2809_v20 = vpop.xlane.xlu1 %2808  ;;  %v3419_v36 = vmul.f32 1.442695, %v3415_v60 }
 0xde5   :  { %v2819_v37 = vsub.f32 %v7598_v39, %v2809_v20 }
 0xde7   :  { %v2823_v19 = vmul.f32 1.442695, %v2819_v37 }
 0xde9   :  { %5607 = vpow2.f32 %v2823_v19  ;;  %v3408_v21 = vpop.xlane.xlu0 %3407 }
 0xdea   :  { %v2526_v8 = vpop.xlane.xlu2 %2525  ;;  %5609 = vpow2.f32 %v2825_v31  ;;  %v3416_v10 = vsub.f32 %v7633_v7, %v3408_v21  ;;  %v5483_v21 = vpack.i.bf16 %v7072_v17, %v7080_v56  ;;  %v8570_v56 = vld [vmem:[#allocation6_spill] sm:$0xff] }
 0xdeb   :  { %v2530_v34 = vsub.f32 %v7615_v47, %v2526_v8 }
 0xdec   :  { %v2815_v27 = vpop.xlane.xlu1 %2814 }
 0xded   :  { %v2537_v42 = vmul.f32 1.442695, %v2530_v34  ;;  %v2821_v1 = vsub.f32 %v7619_v11, %v2815_v27  ;;  %v2822_v11 = vsub.f32 %v7623_v32, %v2818_v59 }
 0xdef   :  { %v7690_v52 = vpop.eup %5607  ;;  %5611 = vpow2.f32 %v2537_v42  ;;  %v2827_v28 = vmul.f32 1.442695, %v2821_v1  ;;  %v2829_v32 = vmul.f32 1.442695, %v2822_v11 }
 0xdf0   :  { %v2831_v39 = vsel %vm306_vm2, %v7690_v52, 0.0  ;;  %v7695_v54 = vpop.eup %5609 }
 0xdf1   :  { %5613 = vpow2.f32 %v2827_v28  ;;  %2832 = vadd.xlane.f32.xlu0 %v2831_v39  ;;  %v2834_v16 = vsel %vm306_vm2, %v7695_v54, 0.0  ;;  %v5488_v39 = vpack.i.bf16 %v7122_v46, %v8563_v33 }
 0xdf2   :  { %v3101_v30 = vpop.xlane.xlu2 %3100 }
 0xdf3   :  { %v3111_v35 = vsub.f32 %v7613_v43, %v3101_v30 }
 0xdf4   :  { %v3104_v47 = vpop.xlane.xlu1 %3103 }
 0xdf5   :  { %v7697_v9 = vpop.eup %5611  ;;  %v3115_v49 = vmul.f32 1.442695, %v3111_v35  ;;  %v3112_v57 = vsub.f32 %v7621_v5, %v3104_v47  ;;  %v3421_v5 = vmul.f32 1.442695, %v3416_v10  ;;  %v5427_v47 = vunpack.i.h.bf16 %v7540_v0  ;;  %v8571_v0 = vld [vmem:[#allocation5_spill] sm:$0xff] }
 0xdf6   :  { %v2548_v29 = vsel %vm306_vm2, %v7697_v9, 0.0 }
 0xdf7   :  { %v7704_v41 = vpop.eup %5613  ;;  %5615 = vpow2.f32 %v3115_v49  ;;  %v3117_v55 = vmul.f32 1.442695, %v3112_v57  ;;  %2549 = vadd.xlane.f32.xlu1 %v2548_v29  ;;  %v3026_v46 = vsel %vm432_vm4, %v7570_v48, %v5427_v47 }
 0xdf8   :  { %v2837_v43 = vsel %vm306_vm2, %v7704_v41, 0.0 }
 0xdf9   :  { %5617 = vpow2.f32 %v3117_v55  ;;  %2838 = vadd.xlane.f32.xlu2 %v2837_v43  ;;  %2835 = vadd.xlane.f32.xlu0 %v2834_v16 }
 0xdfa   :  { %v3107_v7 = vpop.xlane.xlu2 %3106  ;;  %5619 = vpow2.f32 %v2829_v32 }
 0xdfb   :  { %v3113_v18 = vsub.f32 %v7645_v4, %v3107_v7  ;;  %5621 = vpow2.f32 %v3421_v5 }
 0xdfd   :  { %v7711_v3 = vpop.eup %5615  ;;  %v3119_v12 = vmul.f32 1.442695, %v3113_v18 }
 0xdfe   :  { %v3123_v23 = vsel %vm306_vm2, %v7711_v3, 0.0 }
 0xdff   :  { %v7716_v2 = vpop.eup %5617  ;;  %5623 = vpow2.f32 %v3119_v12  ;;  %3124 = vadd.xlane.f32.xlu1 %v3123_v23 }
 0xe00   :  { %v3126_v51 = vsel %vm306_vm2, %v7716_v2, 0.0  ;;  %v7720_v63 = vpop.eup %5619  ;;  %5625 = vpow2.f32 %v3419_v36 }
 0xe01   :  { %3127 = vadd.xlane.f32.xlu2 %v3126_v51  ;;  %v7723_v38 = vpop.eup %5621  ;;  %v2840_v24 = vsel %vm306_vm2, %v7720_v63, 0.0 }
 0xe02   :  { %v3110_v4 = vpop.xlane.xlu2 %3109  ;;  %v3430_v19 = vsel %vm306_vm2, %v7723_v38, 0.0 }
 0xe03   :  { %v3114_v58 = vsub.f32 %v7649_v62, %v3110_v4 }
 0xe05   :  { %v7725_v59 = vpop.eup %5623  ;;  %v3121_v20 = vmul.f32 1.442695, %v3114_v58 }
 0xe06   :  { %v3129_v37 = vsel %vm306_vm2, %v7725_v59, 0.0  ;;  %v7734_v31 = vpop.eup %5625 }
 0xe07   :  { %5627 = vpow2.f32 %v3121_v20  ;;  %3130 = vadd.xlane.f32.xlu0 %v3129_v37  ;;  %2841 = vadd.xlane.f32.xlu1 %v2840_v24  ;;  %v3427_v42 = vsel %vm306_vm2, %v7734_v31, 0.0 }
 0xe09   :  { %v3411_v22 = vpop.xlane.xlu1 %3410  ;;  %3431 = vadd.xlane.f32.xlu2 %v3430_v19 }
 0xe0a   :  { %v3417_v62 = vsub.f32 %v7653_v40, %v3411_v22 }
 0xe0c   :  { %v3423_v8 = vmul.f32 1.442695, %v3417_v62 }
 0xe0d   :  { %v7736_v34 = vpop.eup %5627 }
 0xe0e   :  { %5629 = vpow2.f32 %v3423_v8  ;;  %v3132_v27 = vsel %vm306_vm2, %v7736_v34, 0.0 }
 0xe0f   :  { %3133 = vadd.xlane.f32.xlu0 %v3132_v27  ;;  %3428 = vadd.xlane.f32.xlu1 %v3427_v42 }
 0xe11   :  { %v3414_v40 = vpop.xlane.xlu1 %3413 }
 0xe12   :  { %v3418_v57 = vsub.f32 %v7657_v13, %v3414_v40 }
 0xe14   :  { %v7742_v1 = vpop.eup %5629  ;;  %v3425_v10 = vmul.f32 1.442695, %v3418_v57 }
 0xe15   :  { %v3433_v28 = vsel %vm306_vm2, %v7742_v1, 0.0 }
 0xe17   :  { %3434 = vadd.xlane.f32.xlu1 %v3433_v28 }
 0xe21   :  { %v2541_v30 = vpop.xlane.xlu1 %2540  ;;  %5489 = vrot.lane.b32.xlu2 %v5488_v39, %s8561_s2 }
 0xe22   :  { %5631 = vrcp.f32 %v2541_v30 }
 0xe23   :  { %5484 = vrot.lane.b32.xlu0 %v5483_v21, %s8562_s0 }
 0xe28   :  { %v5632_v35 = vpop.eup %5631 }
 0xe29   :  { %v2555_v11 = vmul.f32 %v5632_v35, %v7663_v6  ;;  %v2544_v49 = vpop.xlane.xlu0 %2543  ;;  %v8572_v6 = vpack.i.bf16 %v8570_v56, %v8571_v0 }
 0xe2a   :  { %5633 = vrcp.f32 %v2544_v49 }
 0xe2b   :  { %5118 = vmatmul.msk.f32.vlgmr.msra.gmra.mxu2 %vm306_vm2, %v2555_v11 }
 0xe2c   :  { %3163 = vmatpush.msra.mxu2 %v3026_v46 }
 0xe2e   :  { %3164 = vmatpush.msra.mxu2 %v7581_v15  ;;  %v5471_v15 = vunpack.i.l.bf16 %v7672_v61 }
 0xe30   :  { %v5634_v33 = vpop.eup %5633  ;;  %5494 = vrot.lane.b32.xlu1 %v7447_v25, %s8560_s17  ;;  %v3028_v43 = vsel %vm432_vm4, %v7590_v53, %v5471_v15 }
 0xe31   :  { %v2556_v17 = vmul.f32 %v5634_v33, %v7667_v44  ;;  %v5472_v44 = vunpack.i.h.bf16 %v7672_v61 }
 0xe33   :  { %5119 = vmatmul.msk.f32.gmra.mxu2 %vm306_vm2, %v2556_v17  ;;  %v3027_v16 = vsel %vm432_vm4, %v7676_v45, %v5472_v44 }
 0xe38   :  { %5499 = vrot.lane.b32.xlu1 %v8572_v6, %s8569_s20 }
 0xe41   :  { %v2547_v48 = vpop.xlane.xlu2 %2546 }
 0xe42   :  { %5635 = vrcp.f32 %v2547_v48 }
 0xe43   :  { %5637 = vpow2.f32 %v3425_v10 }
 0xe48   :  { %v5636_v29 = vpop.eup %5635 }
 0xe49   :  { %v7768_v55 = vpop.eup %5637  ;;  %v2557_v25 = vmul.f32 %v5636_v29, %v7682_v50 }
 0xe4a   :  { %v3436_v13 = vsel %vm306_vm2, %v7768_v55, 0.0 }
 0xe4b   :  { %5120 = vmatmul.msk.f32.vlgmr.msrb.gmra.mxu3 %vm306_vm2, %v2557_v25 }
 0xe4c   :  { %3192 = vmatpush.msrb.mxu3 %v3028_v43 }
 0xe4d   :  { %3437 = vadd.xlane.f32.xlu0 %v3436_v13 }
 0xe4e   :  { %3193 = vmatpush.msrb.mxu3 %v3027_v16 }
 0xe64   :  { %v2833_v32 = vpop.xlane.xlu0 %2832 }
 0xe65   :  { %5639 = vrcp.f32 %v2833_v32 }
 0xe6a   :  { %v2550_v5 = vpop.xlane.xlu1 %2549 }
 0xe6b   :  { %v5640_v50 = vpop.eup %5639  ;;  %5641 = vrcp.f32 %v2550_v5 }
 0xe6c   :  { %v2847_v61 = vmul.f32 %v5640_v50, %v7690_v52  ;;  %v2836_v7 = vpop.xlane.xlu0 %2835  ;;  %v2839_v18 = vpop.xlane.xlu2 %2838 }
 0xe6d   :  { %5643 = vrcp.f32 %v2836_v7 }
 0xe6e   :  { %5130 = vmatmul.msk.f32.vlgmr.msrb.gmra.mxu2 %vm306_vm2, %v2847_v61  ;;  %5645 = vrcp.f32 %v2839_v18 }
 0xe6f   :  { %3467 = vmatpush.msrb.mxu2 %v7593_v14 }
 0xe71   :  { %v5642_v53 = vpop.eup %5641  ;;  %3468 = vmatpush.msrb.mxu2 %v7679_v26 }
 0xe72   :  { %v3125_v45 = vpop.xlane.xlu1 %3124  ;;  %v2558_v60 = vmul.f32 %v5642_v53, %v7697_v9 }
 0xe73   :  { %v5644_v12 = vpop.eup %5643  ;;  %5647 = vrcp.f32 %v3125_v45  ;;  %v2223_v45 = vld [vmem:[%s8495_s4 + $0x18] sm:$0xff] }
 0xe74   :  { %5121 = vmatmul.msk.f32.gmra.mxu3 %vm306_vm2, %v2558_v60  ;;  %v2848_v52 = vmul.f32 %v5644_v12, %v7695_v54  ;;  %v5646_v23 = vpop.eup %5645  ;;  %v3128_v51 = vpop.xlane.xlu2 %3127  ;;  %v5699_v60 = vld [vmem:[%s8495_s4 + $0x10] sm:$0xff] }
 0xe75   :  { %v2849_v14 = vmul.f32 %v5646_v23, %v7704_v41  ;;  %v5503_v12 = vpack.i.bf16 %v2223_v45, %v5699_v60 }
 0xe76   :  { %5131 = vmatmul.msk.f32.gmra.mxu2 %vm306_vm2, %v2848_v52 }
 0xe79   :  { %v5648_v36 = vpop.eup %5647 }
 0xe7a   :  { %v2842_v4 = vpop.xlane.xlu1 %2841  ;;  %v3131_v26 = vpop.xlane.xlu0 %3130  ;;  %v3139_v9 = vmul.f32 %v5648_v36, %v7711_v3 }
 0xe7b   :  { %5649 = vrcp.f32 %v2842_v4 }
 0xe7c   :  { %5651 = vrcp.f32 %v3128_v51  ;;  %5132 = vmatmul.msk.f32.vlgmr.msra.gmra.mxu3 %vm306_vm2, %v2849_v14  ;;  %v3432_v22 = vpop.xlane.xlu2 %3431 }
 0xe7d   :  { %5653 = vrcp.f32 %v3131_v26 }
 0xe7e   :  { %5142 = vmatmul.msk.f32.vlgmr.msra.gmra.mxu2 %vm306_vm2, %v3139_v9 }
 0xe81   :  { %v5650_v58 = vpop.eup %5649 }
 0xe82   :  { %v5652_v54 = vpop.eup %5651  ;;  %v3429_v20 = vpop.xlane.xlu1 %3428  ;;  %v2850_v37 = vmul.f32 %v5650_v58, %v7720_v63 }
 0xe83   :  { %5655 = vrcp.f32 %v3429_v20  ;;  %v3140_v41 = vmul.f32 %v5652_v54, %v7716_v2  ;;  %v3134_v24 = vpop.xlane.xlu0 %3133  ;;  %v5654_v19 = vpop.eup %5653 }
 0xe84   :  { %5133 = vmatmul.msk.f32.gmra.mxu3 %vm306_vm2, %v2850_v37  ;;  %5657 = vrcp.f32 %v3134_v24  ;;  %v3141_v62 = vmul.f32 %v5654_v19, %v7725_v59  ;;  %v5490_v59 = vpop.permute.xlu2 %5489  ;;  %v2222_v24 = vld [vmem:[%s8495_s4 + $0x8] sm:$0xff]  ;;  %v5700_v19 = vld [vmem:[%s8495_s4] sm:$0xff] }
 0xe85   :  { %5659 = vrcp.f32 %v3432_v22  ;;  %v5491_v30 = vunpack.i.l.bf16 %v5490_v59  ;;  %v5492_v49 = vunpack.i.h.bf16 %v5490_v59  ;;  %v5508_v22 = vpack.i.bf16 %v2222_v24, %v5700_v19 }
 0xe86   :  { %5143 = vmatmul.msk.f32.gmra.mxu2 %vm306_vm2, %v3140_v41 }
 0xe89   :  { %v5656_v3 = vpop.eup %5655 }
 0xe8a   :  { %v3443_v8 = vmul.f32 %v5656_v3, %v7734_v31  ;;  %v5658_v63 = vpop.eup %5657  ;;  %v3435_v28 = vpop.xlane.xlu1 %3434 }
 0xe8b   :  { %v5660_v27 = vpop.eup %5659  ;;  %v3142_v2 = vmul.f32 %v5658_v63, %v7736_v34  ;;  %5661 = vrcp.f32 %v3435_v28 }
 0xe8c   :  { %5144 = vmatmul.msk.f32.vlgmr.msrb.gmra.mxu3 %vm306_vm2, %v3141_v62  ;;  %v3444_v42 = vmul.f32 %v5660_v27, %v7723_v38 }
 0xe8e   :  { %5154 = vmatmul.msk.f32.vlgmr.msrb.gmra.mxu2 %vm306_vm2, %v3443_v8 }
 0xe91   :  { %v5662_v11 = vpop.eup %5661 }
 0xe92   :  { %v3445_v33 = vmul.f32 %v5662_v11, %v7742_v1 }
 0xe94   :  { %5145 = vmatmul.msk.f32.gmra.mxu3 %vm306_vm2, %v3142_v2 }
 0xe95   :  { %v5485_v40 = vpop.permute.xlu0 %5484 }
 0xe96   :  { %5155 = vmatmul.msk.f32.gmra.mxu2 %vm306_vm2, %v3444_v42  ;;  %v5486_v39 = vunpack.i.l.bf16 %v5485_v40  ;;  %v5487_v21 = vunpack.i.h.bf16 %v5485_v40 }
 0xe98   :  { %v3328_v34 = vsel %vm64_vm1, %v5486_v39, %v5491_v30  ;;  %v3327_v38 = vsel %vm64_vm1, %v5487_v21, %v5492_v49 }
 0xea2   :  { %v5495_v31 = vpop.permute.xlu1 %5494 }
 0xea3   :  { %v5497_v35 = vunpack.i.h.bf16 %v5495_v31  ;;  %v5496_v47 = vunpack.i.l.bf16 %v5495_v31 }
 0xea5   :  { %v3332_v46 = vsel %vm432_vm4, %v3328_v34, %v5496_v47  ;;  %v3331_v17 = vsel %vm432_vm4, %v3327_v38, %v5497_v35 }
 0xea6   :  { %3496 = vmatpush.msra.mxu3 %v3332_v46 }
 0xea8   :  { %3497 = vmatpush.msra.mxu3 %v3331_v17 }
 0xea9   :  { %5156 = vmatmul.msk.f32.vlgmr.msra.gmra.mxu3 %vm306_vm2, %v3445_v33 }
 0xeaa   :  { %v5500_v7 = vpop.permute.xlu1 %5499 }
 0xeab   :  { %v5502_v18 = vunpack.i.h.bf16 %v5500_v7  ;;  %v5501_v53 = vunpack.i.l.bf16 %v5500_v7 }
 0xead   :  { %3723 = vmatpush.msra.mxu0 %v5501_v53 }
 0xeae   :  { %v7811_v57 = vpop.f32.mrf.mxu2 }
 0xeaf   :  { %3724 = vmatpush.msra.mxu0 %v5502_v18 }
 0xeb6   :  { %v7813_v10 = vpop.f32.mrf.mxu2 }
 0xec0   :  { %v3438_v56 = vpop.xlane.xlu0 %3437 }
 0xec1   :  { %5663 = vrcp.f32 %v3438_v56 }
 0xec7   :  { %v5664_v0 = vpop.eup %5663 }
 0xec8   :  { %v3446_v6 = vmul.f32 %v5664_v0, %v7768_v55 }
 0xeca   :  { %5157 = vmatmul.msk.f32.gmra.mxu3 %vm306_vm2, %v3446_v6 }
 0xece   :  { %v7815_v48 = vpop.f32.mrf.mxu3 }
 0xef1   :  { %v7817_v15 = vpop.f32.mrf.mxu2 }
 0xef2   :  { %3509 = vrot.lane.b32.xlu2 %v7817_v15, %s5728_s16 }
 0xef7   :  { %v7821_v1 = vpop.f32.mrf.mxu3 }
 0xef9   :  { %v7823_v29 = vpop.f32.mrf.mxu2 }
 0xefa   :  { %3511 = vrot.lane.b32.xlu2 %v7823_v29, %s5728_s16 }
 0xeff   :  { %v7827_v55 = vpop.f32.mrf.mxu3 }
 0xf01   :  { %v7829_v25 = vpop.f32.mrf.mxu2 }
 0xf02   :  { %3525 = vrot.lane.b32.xlu2 %v7829_v25, %s8553_s30 }
 0xf07   :  { %v7833_v44 = vpop.f32.mrf.mxu3 }
 0xf09   :  { %v7835_v43 = vpop.f32.mrf.mxu2 }
 0xf0a   :  { %3527 = vrot.lane.b32.xlu1 %v7835_v43, %s8553_s30 }
 0xf0f   :  { %v7839_v13 = vpop.f32.mrf.mxu3 }
 0xf10   :  { %3529 = vrot.lane.b32.xlu2 %v7839_v13, %s8553_s30 }
 0xf11   :  { %v3470_v16 = vpop.f32.mrf.mxu2 }
 0xf12   :  { %3541 = vrot.lane.b32.xlu1 %v3470_v16, %s8573_s23 }
 0xf17   :  { %v7847_v5 = vpop.f32.mrf.mxu3 }
 0xf19   :  { %v3473_v32 = vpop.f32.mrf.mxu2 }
 0xf1a   :  { %3513 = vrot.lane.b32.xlu1 %v7827_v55, %s5728_s16  ;;  %3543 = vrot.lane.b32.xlu2 %v3473_v32, %s8573_s23 }
 0xf22   :  { %3515 = vrot.lane.b32.xlu1 %v7833_v44, %s5728_s16  ;;  %3531 = vrot.lane.b32.xlu2 %v7847_v5, %s8553_s30 }
 0xf2a   :  { %3569 = vrot.lane.b32.xlu2 %v7811_v57, %s5736_s24 }
 0xf2c   :  { %v3499_v50 = vpop.f32.mrf.mxu3 }
 0xf2d   :  { %3545 = vrot.lane.b32.xlu0 %v3499_v50, %s8573_s23 }
 0xf32   :  { %3593 = vrot.lane.b32.xlu2 %v3470_v16, %s8553_s30 }
 0xf35   :  { %3571 = vrot.lane.b32.xlu0 %v7813_v10, %s5736_s24 }
 0xf3a   :  { %3595 = vrot.lane.b32.xlu2 %v3473_v32, %s8553_s30 }
 0xf3d   :  { %3573 = vrot.lane.b32.xlu0 %v7815_v48, %s5736_s24 }
 0xf42   :  { %3597 = vrot.lane.b32.xlu2 %v3499_v50, %s8553_s30 }
 0xf45   :  { %3575 = vrot.lane.b32.xlu0 %v7821_v1, %s5736_s24 }
 0xf4c   :  { %v3510_v52 = vpop.permute.xlu2 %3509 }
 0xf4d   :  { %v3502_v61 = vpop.f32.mrf.mxu3  ;;  %3617 = vrot.lane.b32.xlu0 %v7811_v57, %s5730_s18  ;;  %v3553_v14 = vsel %vm64_vm1, %v7811_v57, %v3510_v52 }
 0xf4e   :  { %3547 = vrot.lane.b32.xlu1 %v3502_v61, %s8573_s23  ;;  %3599 = vrot.lane.b32.xlu2 %v3502_v61, %s8553_s30 }
 0xf54   :  { %v3512_v23 = vpop.permute.xlu2 %3511 }
 0xf55   :  { %3619 = vrot.lane.b32.xlu0 %v7813_v10, %s5730_s18  ;;  %v3554_v54 = vsel %vm64_vm1, %v7813_v10, %v3512_v23 }
 0xf56   :  { %3581 = vrot.lane.b32.xlu1 %v7829_v25, %s5728_s16  ;;  %3641 = vrot.lane.b32.xlu2 %v3470_v16, %s5728_s16 }
 0xf5c   :  { %v3526_v51 = vpop.permute.xlu2 %3525 }
 0xf5d   :  { %3621 = vrot.lane.b32.xlu0 %v7815_v48, %s5730_s18  ;;  %v3557_v4 = vsel %vm432_vm4, %v3553_v14, %v3526_v51 }
 0xf5e   :  { %3583 = vrot.lane.b32.xlu1 %v7835_v43, %s5728_s16  ;;  %3643 = vrot.lane.b32.xlu2 %v3473_v32, %s5728_s16 }
 0xf65   :  { %3623 = vrot.lane.b32.xlu0 %v7821_v1, %s5730_s18 }
 0xf66   :  { %3585 = vrot.lane.b32.xlu1 %v7839_v13, %s5728_s16  ;;  %3645 = vrot.lane.b32.xlu2 %v3499_v50, %s5728_s16 }
 0xf6a   :  { %v3530_v26 = vpop.permute.xlu2 %3529 }
 0xf6d   :  { %5504 = vrot.lane.b32.xlu0 %v5503_v12, %s8574_s3 }
 0xf6e   :  { %3587 = vrot.lane.b32.xlu1 %v7847_v5, %s5728_s16  ;;  %3647 = vrot.lane.b32.xlu2 %v3502_v61, %s5728_s16 }
 0xf74   :  { %v3544_v37 = vpop.permute.xlu2 %3543 }
 0xf76   :  { %3629 = vrot.lane.b32.xlu1 %v7817_v15, %s5736_s24 }
 0xf7c   :  { %v3528_v36 = vpop.permute.xlu1 %3527  ;;  %v3532_v42 = vpop.permute.xlu2 %3531 }
 0xf7d   :  { %v3558_v20 = vsel %vm432_vm4, %v3554_v54, %v3528_v36 }
 0xf7e   :  { %3631 = vrot.lane.b32.xlu1 %v7823_v29, %s5736_s24  ;;  %v3562_v41 = vsel %vm529_vm3, %v3558_v20, %v3544_v37 }
 0xf84   :  { %v3542_v9 = vpop.permute.xlu1 %3541  ;;  %v3570_v40 = vpop.permute.xlu2 %3569 }
 0xf85   :  { %v3561_v58 = vsel %vm529_vm3, %v3557_v4, %v3542_v9  ;;  %v3605_v49 = vsel %vm64_vm1, %v3570_v40, %v7817_v15  ;;  %v8576_v40 = vld [vmem:[#allocation8_spill] sm:$0xff] }
 0xf86   :  { %3633 = vrot.lane.b32.xlu1 %v7827_v55, %s5736_s24  ;;  %5158 = vmatmul.msk.f32.vlgmr.msra.gmra.mxu0 %vm306_vm2, %v3561_v58 }
 0xf8c   :  { %v3514_v3 = vpop.permute.xlu1 %3513  ;;  %v3594_v21 = vpop.permute.xlu2 %3593 }
 0xf8d   :  { %v3555_v62 = vsel %vm64_vm1, %v7815_v48, %v3514_v3 }
 0xf8e   :  { %3635 = vrot.lane.b32.xlu1 %v7833_v44, %s5736_s24  ;;  %5159 = vmatmul.msk.f32.gmra.mxu0 %vm306_vm2, %v3562_v41  ;;  %v3559_v63 = vsel %vm432_vm4, %v3555_v62, %v3530_v26 }
 0xf94   :  { %v3516_v39 = vpop.permute.xlu1 %3515  ;;  %v3596_v34 = vpop.permute.xlu2 %3595 }
 0xf95   :  { %v3556_v30 = vsel %vm64_vm1, %v7821_v1, %v3516_v39  ;;  %v8577_v39 = vld [vmem:[#allocation9_spill] sm:$0xff] }
 0xf96   :  { %5509 = vrot.lane.b32.xlu1 %v5508_v22, %s8574_s3  ;;  %v3560_v47 = vsel %vm432_vm4, %v3556_v30, %v3532_v42 }
 0xf9c   :  { %v3598_v57 = vpop.permute.xlu2 %3597 }
 0xf9f   :  { %v3546_v8 = vpop.permute.xlu0 %3545 }
 0xfa0   :  { %v3563_v27 = vsel %vm529_vm3, %v3559_v63, %v3546_v8 }
 0xfa1   :  { %5160 = vmatmul.msk.f32.gmra.mxu0 %vm306_vm2, %v3563_v27 }
 0xfa7   :  { %v3572_v2 = vpop.permute.xlu0 %3571 }
 0xfa8   :  { %v3606_v56 = vsel %vm64_vm1, %v3572_v2, %v7823_v29  ;;  %v3600_v32 = vpop.permute.xlu2 %3599 }
 0xfaf   :  { %v3574_v28 = vpop.permute.xlu0 %3573 }
 0xfb0   :  { %v3607_v15 = vsel %vm64_vm1, %v3574_v28, %v7827_v55  ;;  %v3642_v55 = vpop.permute.xlu2 %3641 }
 0xfb7   :  { %v3576_v59 = vpop.permute.xlu0 %3575 }
 0xfb8   :  { %v3608_v61 = vsel %vm64_vm1, %v3576_v59, %v7833_v44  ;;  %v3644_v14 = vpop.permute.xlu2 %3643 }
 0xfbf   :  { %v3618_v31 = vpop.permute.xlu0 %3617 }
 0xfc0   :  { %v3548_v35 = vpop.permute.xlu1 %3547  ;;  %v3646_v54 = vpop.permute.xlu2 %3645 }
 0xfc1   :  { %v3564_v11 = vsel %vm529_vm3, %v3560_v47, %v3548_v35 }
 0xfc2   :  { %5161 = vmatmul.msk.f32.gmra.mxu0 %vm306_vm2, %v3564_v11  ;;  %v8579_v11 = vld [vmem:[#allocation11_spill] sm:$0xff] }
 0xfc7   :  { %v3620_v38 = vpop.permute.xlu0 %3619 }
 0xfc8   :  { %v3582_v46 = vpop.permute.xlu1 %3581  ;;  %v3648_v22 = vpop.permute.xlu2 %3647 }
 0xfc9   :  { %v3609_v33 = vsel %vm432_vm4, %v3605_v49, %v3582_v46  ;;  %v8580_v46 = vld [vmem:[#allocation12_spill] sm:$0xff] }
 0xfca   :  { %v3613_v17 = vsel %vm529_vm3, %v3609_v33, %v3594_v21 }
 0xfcb   :  { %5162 = vmatmul.msk.f32.gmra.mxu0 %vm306_vm2, %v3613_v17  ;;  %v8581_v17 = vld [vmem:[#allocation13_spill] sm:$0xff] }
 0xfcf   :  { %v3622_v48 = vpop.permute.xlu0 %3621 }
 0xfd0   :  { %v3584_v0 = vpop.permute.xlu1 %3583 }
 0xfd1   :  { %v3610_v6 = vsel %vm432_vm4, %v3606_v56, %v3584_v0 }
 0xfd2   :  { %v3614_v10 = vsel %vm529_vm3, %v3610_v6, %v3596_v34  ;;  %v8582_v6 = vld [vmem:[#allocation14_spill] sm:$0xff] }
 0xfd3   :  { %5163 = vmatmul.msk.f32.gmra.mxu0 %vm306_vm2, %v3614_v10 }
 0xfd7   :  { %v3624_v29 = vpop.permute.xlu0 %3623 }
 0xfd8   :  { %v3586_v1 = vpop.permute.xlu1 %3585 }
 0xfd9   :  { %v3611_v16 = vsel %vm432_vm4, %v3607_v15, %v3586_v1 }
 0xfda   :  { %v3615_v50 = vsel %vm529_vm3, %v3611_v16, %v3598_v57  ;;  %v8584_v16 = vld [vmem:[#allocation16_spill] sm:$0xff] }
 0xfdb   :  { %5164 = vmatmul.msk.f32.gmra.mxu0 %vm306_vm2, %v3615_v50 }
 0xfdf   :  { %v5505_v45 = vpop.permute.xlu0 %5504 }
 0xfe0   :  { %v3588_v7 = vpop.permute.xlu1 %3587  ;;  %v5507_v60 = vunpack.i.h.bf16 %v5505_v45  ;;  %v5506_v12 = vunpack.i.l.bf16 %v5505_v45 }
 0xfe1   :  { %v3612_v18 = vsel %vm432_vm4, %v3608_v61, %v3588_v7 }
 0xfe2   :  { %v3616_v53 = vsel %vm529_vm3, %v3612_v18, %v3600_v32  ;;  %v3785_v51 = vsel %vm1869_vm5, %v5506_v12, %v5507_v60  ;;  %v8586_v18 = vld [vmem:[#allocation18_spill] sm:$0xff] }
 0xfe3   :  { %5165 = vmatmul.msk.f32.gmra.mxu0 %vm306_vm2, %v3616_v53  ;;  %3838 = vmatpush.msrb.mxu1 %v3785_v51 }
 0xfe8   :  { %v3630_v52 = vpop.permute.xlu1 %3629 }
 0xfe9   :  { %v3653_v23 = vsel %vm64_vm1, %v3618_v31, %v3630_v52  ;;  %v8578_v31 = vld [vmem:[#allocation10_spill] sm:$0xff] }
 0xfea   :  { %v3657_v36 = vsel %vm432_vm4, %v3653_v23, %v7829_v25 }
 0xfeb   :  { %v3661_v44 = vsel %vm529_vm3, %v3657_v36, %v3642_v55 }
 0xfec   :  { %5166 = vmatmul.msk.f32.gmra.mxu0 %vm306_vm2, %v3661_v44 }
 0xff0   :  { %v3632_v4 = vpop.permute.xlu1 %3631 }
 0xff1   :  { %v3654_v26 = vsel %vm64_vm1, %v3620_v38, %v3632_v4 }
 0xff2   :  { %v3658_v9 = vsel %vm432_vm4, %v3654_v26, %v7835_v43 }
 0xff3   :  { %v3662_v58 = vsel %vm529_vm3, %v3658_v9, %v3644_v14 }
 0xff4   :  { %5167 = vmatmul.msk.f32.gmra.mxu0 %vm306_vm2, %v3662_v58 }
 0xff8   :  { %v3634_v20 = vpop.permute.xlu1 %3633 }
 0xff9   :  { %v3655_v25 = vsel %vm64_vm1, %v3622_v48, %v3634_v20  ;;  %v8583_v48 = vld [vmem:[#allocation15_spill] sm:$0xff] }
 0xffa   :  { %v3659_v37 = vsel %vm432_vm4, %v3655_v25, %v7839_v13  ;;  %v8575_v13 = vld [vmem:[#allocation7_spill] sm:$0xff] }
 0xffb   :  { %v3663_v41 = vsel %vm529_vm3, %v3659_v37, %v3646_v54 }
 0xffc   :  { %5168 = vmatmul.msk.f32.gmra.mxu0 %vm306_vm2, %v3663_v41 }
0x1000   :  { %v3636_v24 = vpop.permute.xlu1 %3635 }
0x1001   :  { %v3656_v19 = vsel %vm64_vm1, %v3624_v29, %v3636_v24  ;;  %v8585_v29 = vld [vmem:[#allocation17_spill] sm:$0xff]  ;;  %vm4749_vm1 = vcmask 1041408  }
0x1002   :  { %v3660_v43 = vsel %vm432_vm4, %v3656_v19, %v7847_v5 }
0x1003   :  { %v3664_v3 = vsel %vm529_vm3, %v3660_v43, %v3648_v22  ;;  %v3726_v62 = vpop.f32.mrf.mxu0  ;;  %vm4971_vm3 = vcmask 41984  }
0x1004   :  { %5169 = vmatmul.msk.f32.gmra.mxu0 %vm306_vm2, %v3664_v3  ;;  %v7971_v2 = vadd.f32 %v3726_v62, %v8575_v13 }
0x1008   :  { %v5510_v8 = vpop.permute.xlu1 %5509 }
0x1009   :  { %v5512_v63 = vunpack.i.h.bf16 %v5510_v8  ;;  %v5511_v27 = vunpack.i.l.bf16 %v5510_v8 }
0x100b   :  { %v3784_v42 = vsel %vm1869_vm5, %v5511_v27, %v5512_v63  ;;  %v3729_v28 = vpop.f32.mrf.mxu0 }
0x100c   :  { %3839 = vmatpush.msrb.mxu1 %v3784_v42  ;;  %v7977_v5 = vadd.f32 %v3729_v28, %v8576_v40 }
0x100d   :  { %5170 = vmatmul.msk.f32.vlgmr.msrb.gmra.mxu1 %vm306_vm2, %v7971_v2 }
0x1015   :  { %5171 = vmatmul.msk.f32.gmra.mxu1 %vm306_vm2, %v7977_v5 }
0x101e   :  { %v3732_v59 = vpop.f32.mrf.mxu0 }
0x101f   :  { %v7982_v30 = vadd.f32 %v3732_v59, %v8577_v39 }
0x1021   :  { %5172 = vmatmul.msk.f32.gmra.mxu1 %vm306_vm2, %v7982_v30 }
0x103f   :  { %v3735_v21 = vpop.f32.mrf.mxu0 }
0x1040   :  { %v7987_v35 = vadd.f32 %v3735_v21, %v8578_v31 }
0x1042   :  { %5173 = vmatmul.msk.f32.gmra.mxu1 %vm306_vm2, %v7987_v35 }
0x1048   :  { %v3738_v47 = vpop.f32.mrf.mxu0 }
0x1049   :  { %v7992_v49 = vadd.f32 %v3738_v47, %v8579_v11 }
0x104b   :  { %5174 = vmatmul.msk.f32.gmra.mxu1 %vm306_vm2, %v7992_v49 }
0x1050   :  { %v3741_v34 = vpop.f32.mrf.mxu0 }
0x1051   :  { %v7997_v38 = vadd.f32 %v3741_v34, %v8580_v46 }
0x1053   :  { %5175 = vmatmul.msk.f32.gmra.mxu1 %vm306_vm2, %v7997_v38 }
0x1058   :  { %v3744_v33 = vpop.f32.mrf.mxu0 }
0x1059   :  { %v8002_v56 = vadd.f32 %v3744_v33, %v8581_v17  ;;  %v4032_v33 = vld [vmem:[%s8496_s5 + $0x38] sm:$0xff]  ;;  %v4031_v17 = vld [vmem:[%s8496_s5 + $0x30] sm:$0xff] }
0x105a   :  { %4077 = vmatpush.msra.mxu2 %v4032_v33 }
0x105b   :  { %5176 = vmatmul.msk.f32.gmra.mxu1 %vm306_vm2, %v8002_v56 }
0x105c   :  { %4078 = vmatpush.msra.mxu2 %v4031_v17 }
0x1060   :  { %v3747_v0 = vpop.f32.mrf.mxu0 }
0x1061   :  { %v8007_v57 = vadd.f32 %v3747_v0, %v8582_v6  ;;  %v4030_v0 = vld [vmem:[%s8496_s5 + $0x28] sm:$0xff]  ;;  %v4029_v6 = vld [vmem:[%s8496_s5 + $0x20] sm:$0xff] }
0x1062   :  { %4079 = vmatpush.msra.mxu2 %v4030_v0 }
0x1063   :  { %5177 = vmatmul.msk.f32.gmra.mxu1 %vm306_vm2, %v8007_v57 }
0x1064   :  { %4080 = vmatpush.msra.mxu2 %v4029_v6 }
0x1069   :  { %v3750_v10 = vpop.f32.mrf.mxu0 }
0x106a   :  { %v8012_v15 = vadd.f32 %v3750_v10, %v8583_v48  ;;  %v4028_v10 = vld [vmem:[%s8496_s5 + $0x18] sm:$0xff]  ;;  %v4027_v48 = vld [vmem:[%s8496_s5 + $0x10] sm:$0xff] }
0x106b   :  { %4081 = vmatpush.msra.mxu2 %v4028_v10 }
0x106c   :  { %5178 = vmatmul.msk.f32.gmra.mxu1 %vm306_vm2, %v8012_v15 }
0x106d   :  { %4082 = vmatpush.msra.mxu2 %v4027_v48 }
0x1071   :  { %v3753_v1 = vpop.f32.mrf.mxu0 }
0x1072   :  { %v8017_v32 = vadd.f32 %v3753_v1, %v8584_v16  ;;  %v4026_v1 = vld [vmem:[%s8496_s5 + $0x8] sm:$0xff]  ;;  %v4025_v16 = vld [vmem:[%s8496_s5] sm:$0xff] }
0x1073   :  { %4083 = vmatpush.msra.mxu2 %v4026_v1 }
0x1074   :  { %5179 = vmatmul.msk.f32.gmra.mxu1 %vm306_vm2, %v8017_v32 }
0x1075   :  { %4084 = vmatpush.msra.mxu2 %v4025_v16 }
0x1079   :  { %v3756_v50 = vpop.f32.mrf.mxu0 }
0x107a   :  { %v8022_v61 = vadd.f32 %v3756_v50, %v8585_v29 }
0x107c   :  { %5180 = vmatmul.msk.f32.gmra.mxu1 %vm306_vm2, %v8022_v61 }
0x1081   :  { %v3759_v7 = vpop.f32.mrf.mxu0 }
0x1082   :  { %v8027_v53 = vadd.f32 %v3759_v7, %v8586_v18 }
0x1084   :  { %5181 = vmatmul.msk.f32.gmra.mxu1 %vm306_vm2, %v8027_v53 }
0x108a   :  { %v8031_v55 = vpop.f32.mrf.mxu1 }
0x108b   :  { %3881 = vrot.lane.b32.xlu2 %v8031_v55, %s8574_s3  ;;  %v3945_v14 = vmul.f32 %v8031_v55, %v8031_v55 }
0x1092   :  { %v8035_v45 = vpop.f32.mrf.mxu1 }
0x1093   :  { %3883 = vrot.lane.b32.xlu2 %v8035_v45, %s8574_s3  ;;  %v3946_v25 = vmul.f32 %v8035_v45, %v8035_v45 }
0x109e   :  { %v8039_v60 = vpop.f32.mrf.mxu1 }
0x109f   :  { %v3947_v62 = vmul.f32 %v8039_v60, %v8039_v60 }
0x10bf   :  { %v8041_v12 = vpop.f32.mrf.mxu1 }
0x10c0   :  { %v3948_v59 = vmul.f32 %v8041_v12, %v8041_v12 }
0x10c8   :  { %v8043_v52 = vpop.f32.mrf.mxu1 }
0x10c9   :  { %3901 = vrot.lane.b32.xlu0 %v8043_v52, %s8574_s3  ;;  %v3949_v44 = vmul.f32 %v8043_v52, %v8043_v52 }
0x10cb   :  { %v3953_v26 = vadd.f32 %v3949_v44, %v3945_v14 }
0x10d0   :  { %v8047_v23 = vpop.f32.mrf.mxu1 }
0x10d1   :  { %3903 = vrot.lane.b32.xlu0 %v8047_v23, %s8574_s3  ;;  %v3950_v54 = vmul.f32 %v8047_v23, %v8047_v23 }
0x10d3   :  { %v3954_v41 = vadd.f32 %v3950_v54, %v3946_v25 }
0x10d8   :  { %v8051_v51 = vpop.f32.mrf.mxu1 }
0x10d9   :  { %3885 = vrot.lane.b32.xlu0 %v8039_v60, %s8574_s3  ;;  %3905 = vrot.lane.b32.xlu1 %v8051_v51, %s8574_s3  ;;  %v3951_v43 = vmul.f32 %v8051_v51, %v8051_v51 }
0x10db   :  { %v3955_v63 = vadd.f32 %v3951_v43, %v3947_v62 }
0x10e0   :  { %v8057_v36 = vpop.f32.mrf.mxu1 }
0x10e1   :  { %v3952_v28 = vmul.f32 %v8057_v36, %v8057_v36 }
0x10e3   :  { %v3956_v21 = vadd.f32 %v3952_v28, %v3948_v59 }
0x10e5   :  { %v3882_v50 = vpop.permute.xlu2 %3881 }
0x10e6   :  { %v3893_v14 = vmul.f32 %v3882_v50, %v8031_v55 }
0x10e9   :  { %v8063_v4 = vpop.f32.mrf.mxu1 }
0x10ea   :  { %v3957_v9 = vmul.f32 %v8063_v4, %v8063_v4  ;;  %3925 = vrot.lane.b32.xlu1 %v8063_v4, %s8574_s3 }
0x10ec   :  { %v3961_v58 = vadd.f32 %v3957_v9, %v3953_v26 }
0x10ed   :  { %v3884_v18 = vpop.permute.xlu2 %3883 }
0x10ee   :  { %v3965_v20 = vadd.f32 1e-06, %v3961_v58 }
0x10f0   :  { %5665 = vrcp.f32 %v3965_v20 }
0x10f1   :  { %v8073_v37 = vpop.f32.mrf.mxu1 }
0x10f2   :  { %v3958_v24 = vmul.f32 %v8073_v37, %v8073_v37  ;;  %3927 = vrot.lane.b32.xlu1 %v8073_v37, %s8574_s3 }
0x10f4   :  { %v3962_v19 = vadd.f32 %v3958_v24, %v3954_v41 }
0x10f6   :  { %v5666_v22 = vpop.eup %5665  ;;  %v3966_v3 = vadd.f32 1e-06, %v3962_v19 }
0x10f7   :  { %3985 = vrot.lane.b32.xlu2 %v5666_v22, %s8574_s3  ;;  %v3894_v22 = vmul.f32 %v3884_v18, %v8035_v45 }
0x10f8   :  { %5667 = vrcp.f32 %v3966_v3 }
0x10f9   :  { %v8084_v8 = vpop.f32.mrf.mxu1 }
0x10fa   :  { %v3959_v27 = vmul.f32 %v8084_v8, %v8084_v8  ;;  %3887 = vrot.lane.b32.xlu1 %v8041_v12, %s8574_s3 }
0x10fc   :  { %v3963_v13 = vadd.f32 %v3959_v27, %v3955_v63 }
0x10fe   :  { %v5668_v42 = vpop.eup %5667  ;;  %v3967_v40 = vadd.f32 1e-06, %v3963_v13 }
0x10ff   :  { %3987 = vrot.lane.b32.xlu0 %v5668_v42, %s8574_s3  ;;  %3929 = vrot.lane.b32.xlu2 %v8084_v8, %s8574_s3 }
0x1100   :  { %5669 = vrcp.f32 %v3967_v40 }
0x1101   :  { %v8097_v39 = vpop.f32.mrf.mxu1 }
0x1102   :  { %v3960_v31 = vmul.f32 %v8097_v39, %v8097_v39 }
0x1104   :  { %v3964_v47 = vadd.f32 %v3960_v31, %v3956_v21 }
0x1106   :  { %v5670_v11 = vpop.eup %5669  ;;  %v3968_v34 = vadd.f32 1e-06, %v3964_v47 }
0x1107   :  { %3907 = vrot.lane.b32.xlu2 %v8057_v36, %s8574_s3  ;;  %3989 = vrot.lane.b32.xlu1 %v5670_v11, %s8574_s3 }
0x1108   :  { %5671 = vrcp.f32 %v3968_v34  ;;  %3931 = vrot.lane.b32.xlu0 %v8097_v39, %s8574_s3 }
0x110e   :  { %v5672_v46 = vpop.eup %5671 }
0x110f   :  { %3991 = vrot.lane.b32.xlu2 %v5672_v46, %s8574_s3 }
0x113b   :  { %v3902_v29 = vpop.permute.xlu0 %3901 }
0x113c   :  { %v3913_v44 = vmul.f32 %v3902_v29, %v8043_v52 }
0x113e   :  { %v3917_v9 = vadd.f32 %v3913_v44, %v3893_v14 }
0x1143   :  { %v3904_v58 = vpop.permute.xlu0 %3903 }
0x1144   :  { %v3914_v24 = vmul.f32 %v3904_v58, %v8047_v23 }
0x1146   :  { %v3918_v63 = vadd.f32 %v3914_v24, %v3894_v22 }
0x114b   :  { %v8131_v7 = vpop.permute.xlu1 %3905  ;;  %v3886_v27 = vpop.permute.xlu0 %3885 }
0x114c   :  { %v3895_v21 = vmul.f32 %v3886_v27, %v8039_v60  ;;  %v3915_v31 = vmul.f32 %v8131_v7, %v8051_v51 }
0x114e   :  { %v3919_v34 = vadd.f32 %v3915_v31, %v3895_v21 }
0x1151   :  { %v3986_v20 = vpop.permute.xlu2 %3985 }
0x1159   :  { %v3930_v40 = vpop.permute.xlu2 %3929 }
0x115a   :  { %v3939_v47 = vmul.f32 %v3930_v40, %v8084_v8 }
0x115c   :  { %v3926_v26 = vpop.permute.xlu1 %3925  ;;  %v3943_v33 = vadd.f32 %v3939_v47, %v3919_v34 }
0x115d   :  { %v3937_v54 = vmul.f32 %v3926_v26, %v8063_v4 }
0x115e   :  { %v3971_v1 = vmin.f32 %v3943_v33, 0.0 }
0x115f   :  { %v3941_v25 = vadd.f32 %v3937_v54, %v3917_v9 }
0x1160   :  { %v3975_v44 = vmul.f32 0.8, %v3971_v1 }
0x1161   :  { %v3969_v41 = vmin.f32 %v3941_v25, 0.0 }
0x1163   :  { %v3973_v19 = vmul.f32 0.8, %v3969_v41 }
0x1164   :  { %v3928_v43 = vpop.permute.xlu1 %3927 }
0x1165   :  { %v3997_v3 = vmul.f32 %v3986_v20, %v3973_v19  ;;  %v3938_v62 = vmul.f32 %v3928_v43, %v8073_v37 }
0x1167   :  { %v4001_v13 = vmul.f32 %v3997_v3, %v3882_v50  ;;  %v4017_v42 = vmul.f32 %v3997_v3, %v3926_v26  ;;  %v3942_v28 = vadd.f32 %v3938_v62, %v3918_v63 }
0x1169   :  { %v4005_v59 = vsub.f32 %v8031_v55, %v4001_v13  ;;  %v3970_v11 = vmin.f32 %v3942_v28, 0.0  ;;  %v3908_v55 = vpop.permute.xlu2 %3907  ;;  %v4009_v28 = vmul.f32 %v3997_v3, %v3902_v29 }
0x116a   :  { %v3916_v14 = vmul.f32 %v3908_v55, %v8057_v36 }
0x116b   :  { %5182 = vmatmul.msk.f32.vlgmr.msra.gmra.mxu2 %vm1869_vm5, %v4005_v59  ;;  %v3974_v46 = vmul.f32 0.8, %v3970_v11  ;;  %v4013_v59 = vsub.f32 %v8043_v52, %v4009_v28  ;;  %v4021_v52 = vsub.f32 %v8063_v4, %v4017_v42  ;;  %v4134_v4 = vld [vmem:[%s8497_s6] sm:$0xff] }
0x116c   :  { %v3888_v17 = vpop.permute.xlu1 %3887 }
0x116d   :  { %v3896_v50 = vmul.f32 %v3888_v17, %v8041_v12 }
0x116f   :  { %v3920_v20 = vadd.f32 %v3916_v14, %v3896_v50 }
0x1171   :  { %v3988_v0 = vpop.permute.xlu0 %3987 }
0x1172   :  { %v3998_v6 = vmul.f32 %v3988_v0, %v3974_v46 }
0x1174   :  { %v4002_v10 = vmul.f32 %v3998_v6, %v3884_v18  ;;  %v4018_v48 = vmul.f32 %v3998_v6, %v3928_v43  ;;  %v3992_v43 = vpop.permute.xlu2 %3991 }
0x1176   :  { %v4006_v16 = vsub.f32 %v8035_v45, %v4002_v10  ;;  %v4022_v29 = vsub.f32 %v8073_v37, %v4018_v48 }
0x1178   :  { %5183 = vmatmul.msk.f32.gmra.mxu2 %vm1869_vm5, %v4006_v16 }
0x1179   :  { %v3990_v26 = vpop.permute.xlu1 %3989 }
0x117a   :  { %v3999_v9 = vmul.f32 %v3990_v26, %v3975_v44  ;;  %v3932_v54 = vpop.permute.xlu0 %3931 }
0x117b   :  { %v3940_v25 = vmul.f32 %v3932_v54, %v8097_v39 }
0x117c   :  { %v4003_v41 = vmul.f32 %v3999_v9, %v3886_v27  ;;  %v4019_v18 = vmul.f32 %v3999_v9, %v3930_v40  ;;  %v4010_v27 = vmul.f32 %v3998_v6, %v3904_v58 }
0x117d   :  { %v3944_v24 = vadd.f32 %v3940_v25, %v3920_v20 }
0x117e   :  { %v4007_v19 = vsub.f32 %v8039_v60, %v4003_v41  ;;  %v4014_v40 = vsub.f32 %v8047_v23, %v4010_v27  ;;  %v4011_v60 = vmul.f32 %v3999_v9, %v8131_v7  ;;  %v4023_v23 = vsub.f32 %v8084_v8, %v4019_v18 }
0x117f   :  { %v3972_v22 = vmin.f32 %v3944_v24, 0.0 }
0x1180   :  { %5184 = vmatmul.msk.f32.gmra.mxu2 %vm1869_vm5, %v4007_v19  ;;  %v4015_v21 = vsub.f32 %v8051_v51, %v4011_v60 }
0x1181   :  { %v3976_v45 = vmul.f32 0.8, %v3972_v22 }
0x1183   :  { %v4000_v62 = vmul.f32 %v3992_v43, %v3976_v45 }
0x1185   :  { %v4004_v63 = vmul.f32 %v4000_v62, %v3888_v17  ;;  %v4012_v31 = vmul.f32 %v4000_v62, %v3908_v55  ;;  %v4020_v51 = vmul.f32 %v4000_v62, %v3932_v54 }
0x1187   :  { %v4008_v13 = vsub.f32 %v8041_v12, %v4004_v63  ;;  %v4016_v12 = vsub.f32 %v8057_v36, %v4012_v31  ;;  %v4024_v7 = vsub.f32 %v8097_v39, %v4020_v51  ;;  %v4135_v36 = vld [vmem:[%s8497_s6 + $0x8] sm:$0xff] }
0x1188   :  { %4186 = vmatpush.msrb.mxu3 %v4135_v36 }
0x1189   :  { %5185 = vmatmul.msk.f32.gmra.mxu2 %vm1869_vm5, %v4008_v13 }
0x118a   :  { %4187 = vmatpush.msrb.mxu3 %v4134_v4 }
0x1191   :  { %5186 = vmatmul.msk.f32.gmra.mxu2 %vm1869_vm5, %v4013_v59 }
0x1199   :  { %5187 = vmatmul.msk.f32.gmra.mxu2 %vm1869_vm5, %v4014_v40 }
0x11a1   :  { %5188 = vmatmul.msk.f32.gmra.mxu2 %vm1869_vm5, %v4015_v21 }
0x11a9   :  { %5189 = vmatmul.msk.f32.gmra.mxu2 %vm1869_vm5, %v4016_v12 }
0x11b1   :  { %5190 = vmatmul.msk.f32.gmra.mxu2 %vm1869_vm5, %v4021_v52 }
0x11b9   :  { %5191 = vmatmul.msk.f32.gmra.mxu2 %vm1869_vm5, %v4022_v29 }
0x11c1   :  { %5192 = vmatmul.msk.f32.gmra.mxu2 %vm1869_vm5, %v4023_v23 }
0x11c9   :  { %5193 = vmatmul.msk.f32.gmra.mxu2 %vm1869_vm5, %v4024_v7 }
0x11ee   :  { %v4086_v37 = vpop.f32.mrf.mxu2 }
0x11ef   :  { %v4122_v8 = vadd.f32 %v4086_v37, %v7971_v2 }
0x11f1   :  { %5194 = vmatmul.msk.f32.vlgmr.msrb.gmra.mxu3 %vm306_vm2, %v4122_v8 }
0x11fb   :  { %v4089_v58 = vpop.f32.mrf.mxu2 }
0x11fc   :  { %v4123_v39 = vadd.f32 %v4089_v58, %v7977_v5 }
0x11fe   :  { %5195 = vmatmul.msk.f32.gmra.mxu3 %vm306_vm2, %v4123_v39  ;;  %4519 = vmatpush.msrb.mxu0 %v4123_v39 }
0x1200   :  { %4520 = vmatpush.msrb.mxu0 %v4122_v8 }
0x1203   :  { %v4092_v3 = vpop.f32.mrf.mxu2 }
0x1204   :  { %v4124_v42 = vadd.f32 %v4092_v3, %v7982_v30 }
0x1206   :  { %5196 = vmatmul.msk.f32.gmra.mxu3 %vm306_vm2, %v4124_v42 }
0x120c   :  { %v4095_v47 = vpop.f32.mrf.mxu2 }
0x120d   :  { %v4125_v11 = vadd.f32 %v4095_v47, %v7987_v35 }
0x120f   :  { %5197 = vmatmul.msk.f32.gmra.mxu3 %vm306_vm2, %v4125_v11  ;;  %4552 = vmatpush.msra.mxu1 %v4125_v11 }
0x1211   :  { %4553 = vmatpush.msra.mxu1 %v4124_v42 }
0x1214   :  { %v4098_v2 = vpop.f32.mrf.mxu2 }
0x1215   :  { %v4126_v34 = vadd.f32 %v4098_v2, %v7992_v49 }
0x1217   :  { %5198 = vmatmul.msk.f32.gmra.mxu3 %vm306_vm2, %v4126_v34 }
0x121c   :  { %v4101_v5 = vpop.f32.mrf.mxu2 }
0x121d   :  { %v4127_v46 = vadd.f32 %v4101_v5, %v7997_v38 }
0x121f   :  { %5199 = vmatmul.msk.f32.gmra.mxu3 %vm306_vm2, %v4127_v46  ;;  %4572 = vmatpush.msrb.mxu2 %v4127_v46 }
0x1221   :  { %4573 = vmatpush.msrb.mxu2 %v4126_v34 }
0x1224   :  { %v4104_v30 = vpop.f32.mrf.mxu2 }
0x1225   :  { %v4128_v33 = vadd.f32 %v4104_v30, %v8002_v56 }
0x1227   :  { %5200 = vmatmul.msk.f32.gmra.mxu3 %vm306_vm2, %v4128_v33 }
0x122c   :  { %v4107_v35 = vpop.f32.mrf.mxu2 }
0x122d   :  { %v4129_v17 = vadd.f32 %v4107_v35, %v8007_v57 }
0x122f   :  { %5201 = vmatmul.msk.f32.gmra.mxu3 %vm306_vm2, %v4129_v17 }
0x1230   :  { %4592 = vmatpush.msra.mxu3 %v4129_v17 }
0x1232   :  { %4593 = vmatpush.msra.mxu3 %v4128_v33 }
0x1234   :  { %v4110_v49 = vpop.f32.mrf.mxu2 }
0x1235   :  { %v4130_v0 = vadd.f32 %v4110_v49, %v8012_v15 }
0x1237   :  { %5202 = vmatmul.msk.f32.gmra.mxu3 %vm306_vm2, %v4130_v0 }
0x123c   :  { %v4113_v38 = vpop.f32.mrf.mxu2 }
0x123d   :  { %v4131_v6 = vadd.f32 %v4113_v38, %v8017_v32 }
0x123f   :  { %5203 = vmatmul.msk.f32.gmra.mxu3 %vm306_vm2, %v4131_v6  ;;  %4612 = vmatpush.msra.mxu0 %v4131_v6 }
0x1241   :  { %4613 = vmatpush.msra.mxu0 %v4130_v0 }
0x1244   :  { %v4116_v56 = vpop.f32.mrf.mxu2 }
0x1245   :  { %v4132_v10 = vadd.f32 %v4116_v56, %v8022_v61 }
0x1247   :  { %5204 = vmatmul.msk.f32.gmra.mxu3 %vm306_vm2, %v4132_v10 }
0x124c   :  { %v4119_v57 = vpop.f32.mrf.mxu2 }
0x124d   :  { %v4133_v48 = vadd.f32 %v4119_v57, %v8027_v53 }
0x124f   :  { %5205 = vmatmul.msk.f32.gmra.mxu3 %vm306_vm2, %v4133_v48  ;;  %4632 = vmatpush.msrb.mxu1 %v4133_v48 }
0x1251   :  { %4633 = vmatpush.msrb.mxu1 %v4132_v10 }
0x1274   :  { %v8201_v15 = vpop.f32.mrf.mxu3 }
0x1275   :  { %4229 = vrot.lane.b32.xlu0 %v8201_v15, %s5727_s27  ;;  %v4293_v14 = vmul.f32 %v8201_v15, %v8201_v15 }
0x1281   :  { %v8205_v32 = vpop.f32.mrf.mxu3 }
0x1282   :  { %4231 = vrot.lane.b32.xlu1 %v8205_v32, %s5727_s27  ;;  %v4294_v18 = vmul.f32 %v8205_v32, %v8205_v32 }
0x1289   :  { %v8209_v61 = vpop.f32.mrf.mxu3 }
0x128a   :  { %4233 = vrot.lane.b32.xlu2 %v8209_v61, %s5727_s27  ;;  %v4295_v63 = vmul.f32 %v8209_v61, %v8209_v61 }
0x1292   :  { %v8213_v53 = vpop.f32.mrf.mxu3 }
0x1293   :  { %4235 = vrot.lane.b32.xlu0 %v8213_v53, %s5727_s27  ;;  %v4296_v31 = vmul.f32 %v8213_v53, %v8213_v53 }
0x129a   :  { %v8217_v1 = vpop.f32.mrf.mxu3 }
0x129b   :  { %4249 = vrot.lane.b32.xlu1 %v8217_v1, %s5727_s27  ;;  %v4297_v44 = vmul.f32 %v8217_v1, %v8217_v1 }
0x129d   :  { %v4301_v9 = vadd.f32 %v4297_v44, %v4293_v14 }
0x12a2   :  { %v8221_v55 = vpop.f32.mrf.mxu3 }
0x12a3   :  { %4251 = vrot.lane.b32.xlu2 %v8221_v55, %s5727_s27  ;;  %v4298_v25 = vmul.f32 %v8221_v55, %v8221_v55 }
0x12a5   :  { %v4302_v19 = vadd.f32 %v4298_v25, %v4294_v18 }
0x12aa   :  { %v8225_v16 = vpop.f32.mrf.mxu3 }
0x12ab   :  { %4253 = vrot.lane.b32.xlu0 %v8225_v16, %s5727_s27  ;;  %v4299_v43 = vmul.f32 %v8225_v16, %v8225_v16 }
0x12ad   :  { %v4303_v59 = vadd.f32 %v4299_v43, %v4295_v63  ;;  %v4373_v43 = vld [vmem:[%s8498_s7] sm:$0xff] }
0x12b2   :  { %v8229_v50 = vpop.f32.mrf.mxu3 }
0x12b3   :  { %4255 = vrot.lane.b32.xlu1 %v8229_v50, %s5727_s27  ;;  %v4300_v60 = vmul.f32 %v8229_v50, %v8229_v50 }
0x12b5   :  { %v4304_v29 = vadd.f32 %v4300_v60, %v4296_v31  ;;  %v4381_v31 = vld [vmem:[%s8498_s7 + $0x40] sm:$0xff] }
0x12ba   :  { %v8237_v26 = vpop.f32.mrf.mxu3 }
0x12bb   :  { %v4305_v54 = vmul.f32 %v8237_v26, %v8237_v26  ;;  %4273 = vrot.lane.b32.xlu2 %v8237_v26, %s5727_s27 }
0x12bd   :  { %v4309_v20 = vadd.f32 %v4305_v54, %v4301_v9 }
0x12bf   :  { %v4313_v41 = vadd.f32 1e-06, %v4309_v20 }
0x12c1   :  { %5673 = vrcp.f32 %v4313_v41 }
0x12c2   :  { %v8247_v24 = vpop.f32.mrf.mxu3 }
0x12c3   :  { %v4306_v22 = vmul.f32 %v8247_v24, %v8247_v24  ;;  %4275 = vrot.lane.b32.xlu0 %v8247_v24, %s5727_s27 }
0x12c5   :  { %v4310_v45 = vadd.f32 %v4306_v22, %v4302_v19 }
0x12c7   :  { %v4314_v62 = vadd.f32 1e-06, %v4310_v45  ;;  %v5674_v13 = vpop.eup %5673 }
0x12c9   :  { %5675 = vrcp.f32 %v4314_v62  ;;  %v4377_v62 = vld [vmem:[%s8498_s7 + $0x20] sm:$0xff] }
0x12ca   :  { %v8257_v28 = vpop.f32.mrf.mxu3 }
0x12cb   :  { %v4307_v27 = vmul.f32 %v8257_v28, %v8257_v28  ;;  %4333 = vrot.lane.b32.xlu0 %v5674_v13, %s5727_s27  ;;  %4277 = vrot.lane.b32.xlu1 %v8257_v28, %s5727_s27 }
0x12cd   :  { %v4311_v40 = vadd.f32 %v4307_v27, %v4303_v59 }
0x12cf   :  { %v4315_v21 = vadd.f32 1e-06, %v4311_v40  ;;  %v5676_v12 = vpop.eup %5675 }
0x12d1   :  { %5677 = vrcp.f32 %v4315_v21 }
0x12d2   :  { %v8268_v52 = vpop.f32.mrf.mxu3 }
0x12d3   :  { %v4308_v23 = vmul.f32 %v8268_v52, %v8268_v52  ;;  %4335 = vrot.lane.b32.xlu1 %v5676_v12, %s5727_s27  ;;  %4279 = vrot.lane.b32.xlu2 %v8268_v52, %s5727_s27 }
0x12d5   :  { %v4312_v51 = vadd.f32 %v4308_v23, %v4304_v29 }
0x12d7   :  { %v4316_v7 = vadd.f32 1e-06, %v4312_v51  ;;  %v5678_v36 = vpop.eup %5677 }
0x12d9   :  { %5679 = vrcp.f32 %v4316_v7 }
0x12db   :  { %4337 = vrot.lane.b32.xlu2 %v5678_v36, %s5727_s27 }
0x12df   :  { %v5680_v4 = vpop.eup %5679 }
0x12e0   :  { %4339 = vrot.lane.b32.xlu0 %v5680_v4, %s5727_s27 }
0x12e4   :  { %v4234_v37 = vpop.permute.xlu2 %4233 }
0x12e5   :  { %v4243_v48 = vmul.f32 %v4234_v37, %v8209_v61 }
0x12e7   :  { %v4230_v8 = vpop.permute.xlu0 %4229 }
0x12e8   :  { %v4241_v34 = vmul.f32 %v4230_v8, %v8201_v15 }
0x12f4   :  { %v4232_v58 = vpop.permute.xlu1 %4231 }
0x12f5   :  { %v4242_v49 = vmul.f32 %v4232_v58, %v8205_v32 }
0x12fd   :  { %v4252_v39 = vpop.permute.xlu2 %4251 }
0x12fe   :  { %v4262_v33 = vmul.f32 %v4252_v39, %v8221_v55 }
0x1300   :  { %v4266_v6 = vadd.f32 %v4262_v33, %v4242_v49  ;;  %v4374_v49 = vld [vmem:[%s8498_s7 + $0x8] sm:$0xff] }
0x1305   :  { %v8277_v3 = vpop.permute.xlu0 %4235 }
0x1306   :  { %v4244_v23 = vmul.f32 %v8277_v3, %v8213_v53 }
0x130d   :  { %v4250_v42 = vpop.permute.xlu1 %4249 }
0x130e   :  { %v4261_v2 = vmul.f32 %v4250_v42, %v8217_v1 }
0x1310   :  { %v4265_v46 = vadd.f32 %v4261_v2, %v4241_v34 }
0x1315   :  { %v4274_v47 = vpop.permute.xlu2 %4273 }
0x1316   :  { %v4285_v5 = vmul.f32 %v4274_v47, %v8237_v26 }
0x1318   :  { %v4289_v30 = vadd.f32 %v4285_v5, %v4265_v46 }
0x131a   :  { %v4317_v38 = vmin.f32 %v4289_v30, 0.0 }
0x131c   :  { %v4321_v44 = vmul.f32 0.8, %v4317_v38  ;;  %v4379_v38 = vld [vmem:[%s8498_s7 + $0x30] sm:$0xff] }
0x131d   :  { %v4254_v11 = vpop.permute.xlu0 %4253 }
0x131e   :  { %v4263_v56 = vmul.f32 %v4254_v11, %v8225_v16 }
0x1320   :  { %v4267_v54 = vadd.f32 %v4263_v56, %v4243_v48 }
0x1325   :  { %v8283_v35 = vpop.permute.xlu1 %4255 }
0x1326   :  { %v4264_v27 = vmul.f32 %v8283_v35, %v8229_v50 }
0x132d   :  { %v8288_v10 = vpop.permute.xlu2 %4279 }
0x1335   :  { %v4276_v17 = vpop.permute.xlu0 %4275 }
0x1336   :  { %v4286_v0 = vmul.f32 %v4276_v17, %v8247_v24 }
0x1338   :  { %v4290_v57 = vadd.f32 %v4286_v0, %v4266_v6  ;;  %v4375_v0 = vld [vmem:[%s8498_s7 + $0x10] sm:$0xff] }
0x133a   :  { %v4318_v41 = vmin.f32 %v4290_v57, 0.0 }
0x133c   :  { %v4322_v21 = vmul.f32 0.8, %v4318_v41 }
0x133d   :  { %v4334_v14 = vpop.permute.xlu0 %4333  ;;  %v4278_v9 = vpop.permute.xlu1 %4277 }
0x133e   :  { %v4345_v20 = vmul.f32 %v4334_v14, %v4321_v44  ;;  %v4287_v25 = vmul.f32 %v4278_v9, %v8257_v28 }
0x1340   :  { %v4349_v18 = vmul.f32 %v4345_v20, %v4230_v8  ;;  %v4357_v19 = vmul.f32 %v4345_v20, %v4250_v42  ;;  %v4365_v22 = vmul.f32 %v4345_v20, %v4274_v47  ;;  %v4291_v45 = vadd.f32 %v4287_v25, %v4267_v54 }
0x1342   :  { %v4353_v63 = vsub.f32 %v8201_v15, %v4349_v18  ;;  %v4361_v13 = vsub.f32 %v8217_v1, %v4357_v19  ;;  %v4319_v59 = vmin.f32 %v4291_v45, 0.0  ;;  %v4369_v40 = vsub.f32 %v8237_v26, %v4365_v22  ;;  %v4338_v1 = vpop.permute.xlu2 %4337 }
0x1343   :  { %v4288_v15 = vmul.f32 %v8288_v10, %v8268_v52  ;;  %v4268_v26 = vadd.f32 %v4264_v27, %v4244_v23  ;;  %v4421_v23 = vlaneseq }
0x1344   :  { %v4323_v60 = vmul.f32 0.8, %v4319_v59  ;;  %v4385_v12 = vmul.f32 %v4373_v43, %v4353_v63  ;;  %v4389_v29 = vmul.f32 %v4377_v62, %v4361_v13  ;;  %v4393_v8 = vmul.f32 %v4381_v31, %v4369_v40  ;;  %v4376_v13 = vld [vmem:[%s8498_s7 + $0x18] sm:$0xff] }
0x1345   :  { %v4336_v51 = vpop.permute.xlu1 %4335  ;;  %v4292_v33 = vadd.f32 %v4288_v15, %v4268_v26  ;;  %v4380_v59 = vld [vmem:[%s8498_s7 + $0x38] sm:$0xff] }
0x1346   :  { %v4347_v7 = vmul.f32 %v4338_v1, %v4323_v60  ;;  %v4346_v36 = vmul.f32 %v4336_v51, %v4322_v21  ;;  %v4397_v4 = vadd.f32 %v4389_v29, %v4385_v12  ;;  %v8353_v1 = vand.u32 127, %v4421_v23 }
0x1347   :  { %v4320_v14 = vmin.f32 %v4292_v33, 0.0 }
0x1348   :  { %v4351_v42 = vmul.f32 %v4347_v7, %v4234_v37  ;;  %v4359_v47 = vmul.f32 %v4347_v7, %v4254_v11  ;;  %v4367_v2 = vmul.f32 %v4347_v7, %v4278_v9  ;;  %v4350_v34 = vmul.f32 %v4346_v36, %v4232_v58 }
0x1349   :  { %v4358_v5 = vmul.f32 %v4346_v36, %v4252_v39  ;;  %v4366_v46 = vmul.f32 %v4346_v36, %v4276_v17  ;;  %v4401_v30 = vadd.f32 %v4397_v4, %v4393_v8  ;;  %v4378_v39 = vld [vmem:[%s8498_s7 + $0x28] sm:$0xff]  ;;  %v4324_v25 = vmul.f32 0.8, %v4320_v14 }
0x134a   :  { %v4371_v37 = vsub.f32 %v8257_v28, %v4367_v2  ;;  %v4354_v58 = vsub.f32 %v8205_v32, %v4350_v34  ;;  %v4355_v11 = vsub.f32 %v8209_v61, %v4351_v42  ;;  %v4363_v17 = vsub.f32 %v8225_v16, %v4359_v47  ;;  %v4383_v28 = vld [vmem:[%s8498_s7 + $0x50] sm:$0xff]  ;;  %v4382_v32 = vld [vmem:[%s8498_s7 + $0x48] sm:$0xff] }
0x134b   :  { %v4362_v6 = vsub.f32 %v8221_v55, %v4358_v5  ;;  %v4370_v56 = vsub.f32 %v8247_v24, %v4366_v46  ;;  %v4405_v57 = vsel %vm306_vm2, %v4401_v30, 0.0  ;;  %v5743_v34 = vmov 0  }
0x134c   :  { %4406 = vadd.xlane.f32.xlu1 %v4405_v57  ;;  %v4386_v48 = vmul.f32 %v4374_v49, %v4354_v58  ;;  %v4387_v44 = vmul.f32 %v4375_v0, %v4355_v11  ;;  %v4391_v61 = vmul.f32 %v4379_v38, %v4363_v17  ;;  %v4395_v9 = vmul.f32 %v4383_v28, %v4371_v37 }
0x134d   :  { %v4390_v16 = vmul.f32 %v4378_v39, %v4362_v6  ;;  %v4394_v54 = vmul.f32 %v4382_v32, %v4370_v56  ;;  %5515 = vset.pattern.permute.xlu2 %v5743_v34  ;;  %5514 = vset.pattern.permute.xlu1 %v5743_v34 }
0x134e   :  { %v4399_v55 = vadd.f32 %v4391_v61, %v4387_v44  ;;  %5513 = vset.pattern.permute.xlu0 %v5743_v34 }
0x134f   :  { %v4398_v24 = vadd.f32 %v4390_v16, %v4386_v48 }
0x1350   :  { %v4403_v20 = vadd.f32 %v4399_v55, %v4395_v9 }
0x1351   :  { %v4402_v41 = vadd.f32 %v4398_v24, %v4394_v54 }
0x1352   :  { %v4340_v18 = vpop.permute.xlu0 %4339  ;;  %v4411_v19 = vsel %vm306_vm2, %v4403_v20, 0.0 }
0x1353   :  { %v4348_v22 = vmul.f32 %v4340_v18, %v4324_v25  ;;  %v4408_v45 = vsel %vm306_vm2, %v4402_v41, 0.0  ;;  %4412 = vadd.xlane.f32.xlu0 %v4411_v19 }
0x1354   :  { %4409 = vadd.xlane.f32.xlu2 %v4408_v45 }
0x1355   :  { %v4352_v43 = vmul.f32 %v4348_v22, %v8277_v3  ;;  %v4360_v62 = vmul.f32 %v4348_v22, %v8283_v35  ;;  %v4368_v63 = vmul.f32 %v4348_v22, %v8288_v10  ;;  %v4384_v3 = vld [vmem:[%s8498_s7 + $0x58] sm:$0xff] }
0x1357   :  { %v4356_v27 = vsub.f32 %v8213_v53, %v4352_v43  ;;  %v4364_v40 = vsub.f32 %v8229_v50, %v4360_v62  ;;  %v4372_v60 = vsub.f32 %v8268_v52, %v4368_v63  ;;  %v8356_v53 = vadd.s32 4294967288, %v8353_v1 }
0x1359   :  { %v4388_v35 = vmul.f32 %v4376_v13, %v4356_v27  ;;  %v4392_v10 = vmul.f32 %v4380_v59, %v4364_v40  ;;  %v4396_v21 = vmul.f32 %v4384_v3, %v4372_v60 }
0x135b   :  { %v4400_v31 = vadd.f32 %v4392_v10, %v4388_v35 }
0x135d   :  { %v4404_v12 = vadd.f32 %v4400_v31, %v4396_v21  ;;  %v4675_v31 = vld [vmem:[%s8499_s8 + $0x18] sm:$0xff] }
0x135e   :  { %4692 = vmatpush.msra.mxu2 %v4675_v31 }
0x135f   :  { %v4414_v29 = vsel %vm306_vm2, %v4404_v12, 0.0  ;;  %v4674_v12 = vld [vmem:[%s8499_s8 + $0x10] sm:$0xff] }
0x1360   :  { %4415 = vadd.xlane.f32.xlu1 %v4414_v29  ;;  %4693 = vmatpush.msra.mxu2 %v4674_v12 }
0x13bf   :  { %v4407_v15 = vpop.xlane.xlu1 %4406 }
0x13c0   :  { %v4423_v36 = vperm.slane %v4407_v15, %v8353_v1 }
0x13c6   :  { %v4413_v52 = vpop.xlane.xlu0 %4412 }
0x13c7   :  { %v4410_v50 = vpop.xlane.xlu2 %4409  ;;  %v4428_v4 = vperm.slane %v4413_v52, %v8353_v1 }
0x13c8   :  { %v4425_v51 = vperm.slane %v4410_v50, %v8356_v53 }
0x13ca   :  { %v4427_v8 = vsel %vm4426_vm6, %v4425_v51, %v4423_v36 }
0x13d3   :  { %v4416_v7 = vpop.xlane.xlu1 %4415 }
0x13d4   :  { %v4429_v26 = vperm.slane %v4416_v7, %v8356_v53 }
0x13d6   :  { %v4430_v42 = vsel %vm4426_vm6, %v4429_v26, %v4428_v4 }
0x13d7   :  { %v4432_v47 = vsel %vm4431_vm7, %v4430_v42, %v4427_v8 }
0x13d8   :  { %v4435_v2 = vsel %vm4434_vm8, %v4432_v47, -inf }
0x13d9   :  { %4436 = vmax.xlane.f32.xlu2 %v4435_v2 }
0x144c   :  { %v4437_v5 = vpop.xlane.xlu2 %4436 }
0x144d   :  { %v4439_v46 = vperm.slane %v4437_v5, 0  ;;  %v4440_v30 = vperm.slane %v4437_v5, 1 }
0x144f   :  { %v4443_v33 = vsub.f32 %v4407_v15, %v4439_v46  ;;  %v4444_v49 = vsub.f32 %v4410_v50, %v4439_v46  ;;  %v4445_v0 = vsub.f32 %v4413_v52, %v4440_v30  ;;  %v4446_v39 = vsub.f32 %v4416_v7, %v4440_v30  ;;  %v4673_v46 = vld [vmem:[%s8499_s8 + $0x8] sm:$0xff]  ;;  %v4672_v30 = vld [vmem:[%s8499_s8] sm:$0xff] }
0x1450   :  { %4694 = vmatpush.msra.mxu2 %v4673_v46 }
0x1451   :  { %v4447_v38 = vmul.f32 1.442695, %v4443_v33  ;;  %v4449_v37 = vmul.f32 1.442695, %v4444_v49  ;;  %v4451_v58 = vmul.f32 1.442695, %v4445_v0 }
0x1452   :  { %v4453_v17 = vmul.f32 1.442695, %v4446_v39  ;;  %v5744_v33 = vmov 16.0   ;;  %4695 = vmatpush.msra.mxu2 %v4672_v30 }
0x1453   :  { %5681 = vpow2.f32 %v4447_v38 }
0x1454   :  { %5683 = vpow2.f32 %v4449_v37 }
0x1455   :  { %5685 = vpow2.f32 %v4451_v58 }
0x1456   :  { %5687 = vpow2.f32 %v4453_v17 }
0x1459   :  { %v5682_v11 = vpop.eup %5681 }
0x145a   :  { %v5684_v6 = vpop.eup %5683  ;;  %4460 = vperm.xlu0 %5513, %v5682_v11  }
0x145b   :  { %v5686_v56 = vpop.eup %5685  ;;  %4463 = vperm.xlu1 %5514, %v5684_v6  }
0x145c   :  { %4466 = vperm.xlu2 %5515, %v5686_v56   ;;  %v5688_v57 = vpop.eup %5687 }
0x1464   :  { %4469 = vperm.xlu2 %5515, %v5688_v57  }
0x14b6   :  { %v4467_v28 = vpop.permute.xlu2 %4466 }
0x14b7   :  { %v4474_v16 = vperm.slane %v4467_v28, %v8353_v1 }
0x14be   :  { %v4470_v32 = vpop.permute.xlu2 %4469 }
0x14bf   :  { %v4475_v48 = vperm.slane %v4470_v32, %v8356_v53 }
0x14c1   :  { %v4476_v54 = vsel %vm4426_vm6, %v4475_v48, %v4474_v16 }
0x14cc   :  { %v4461_v44 = vpop.permute.xlu0 %4460 }
0x14cd   :  { %v4464_v61 = vpop.permute.xlu1 %4463  ;;  %v4471_v14 = vperm.slane %v4461_v44, %v8353_v1 }
0x14ce   :  { %v4472_v9 = vperm.slane %v4464_v61, %v8356_v53 }
0x14d0   :  { %v4473_v55 = vsel %vm4426_vm6, %v4472_v9, %v4471_v14 }
0x14d1   :  { %v4477_v24 = vsel %vm4431_vm7, %v4476_v54, %v4473_v55  ;;  %v4753_v54 = vld [vmem:[%s8500_s9 + $0x8] sm:$0xff] }
0x14d2   :  { %v4479_v20 = vsel %vm4434_vm8, %v4477_v24, 0.0  ;;  %v4752_v24 = vld [vmem:[%s8500_s9] sm:$0xff]  ;;  %4771 = vmatpush.msrb.mxu3 %v4753_v54 }
0x14d3   :  { %4480 = vadd.xlane.f32.xlu1 %v4479_v20 }
0x14d4   :  { %4772 = vmatpush.msrb.mxu3 %v4752_v24 }
0x1546   :  { %v4481_v25 = vpop.xlane.xlu1 %4480 }
0x1547   :  { %5689 = vrcp.f32 %v4481_v25 }
0x1548   :  { %5691 = vrcp.f32 %v5744_v33 }
0x154d   :  { %v5690_v41 = vpop.eup %5689 }
0x154e   :  { %v4484_v18 = vperm.slane %v5690_v41, 0  ;;  %v4485_v45 = vperm.slane %v5690_v41, 1  ;;  %v5692_v49 = vpop.eup %5691 }
0x154f   :  { %v4664_v0 = vmul.f32 16.0, %v5692_v49  ;;  %vm4668_vm14 = vweird.f32 %v5692_v49 }
0x1550   :  { %v4489_v19 = vmul.f32 %v5684_v6, %v4484_v18  ;;  %v4488_v22 = vmul.f32 %v5682_v11, %v4484_v18  ;;  %v4491_v43 = vmul.f32 %v5688_v57, %v4485_v45  ;;  %v4490_v62 = vmul.f32 %v5686_v56, %v4485_v45 }
0x1551   :  { %v4665_v38 = vsub.f32 1.0, %v4664_v0 }
0x1552   :  { %4498 = vperm.xlu0 %5513, %v4489_v19   ;;  %4495 = vperm.xlu2 %5515, %v4488_v22  }
0x1553   :  { %v4666_v37 = vmul.f32 %v5692_v49, %v4665_v38 }
0x1555   :  { %v4667_v58 = vadd.f32 %v5692_v49, %v4666_v37 }
0x1557   :  { %v4669_v39 = vsel %vm4668_vm14, %v5692_v49, %v4667_v58 }
0x155a   :  { %4531 = vperm.xlu0 %5513, %v4491_v43   ;;  %4528 = vperm.xlu2 %5515, %v4490_v62  }
0x15ac   :  { %v4496_v63 = vpop.permute.xlu2 %4495 }
0x15ad   :  { %v4500_v59 = vperm.slane %v4496_v63, %v8353_v1 }
0x15b4   :  { %v4529_v60 = vpop.permute.xlu2 %4528 }
0x15b5   :  { %v4533_v35 = vperm.slane %v4529_v60, %v8353_v1 }
0x15c4   :  { %v4499_v13 = vpop.permute.xlu0 %4498 }
0x15c5   :  { %v4501_v27 = vperm.slane %v4499_v13, %v8356_v53 }
0x15c7   :  { %v4502_v40 = vsel %vm4426_vm6, %v4501_v27, %v4500_v59 }
0x15c8   :  { %5206 = vmatmul.msk.f32.vlgmr.msrb.gmra.mxu0 %vm306_vm2, %v4502_v40  ;;  %5208 = vmatmul.msk.f32.vlgmr.msrb.gmra.mxu2 %vm306_vm2, %v4502_v40 }
0x15cc   :  { %v4532_v3 = vpop.permute.xlu0 %4531 }
0x15cd   :  { %v4534_v10 = vperm.slane %v4532_v3, %v8356_v53 }
0x15cf   :  { %v4535_v21 = vsel %vm4426_vm6, %v4534_v10, %v4533_v35 }
0x15d0   :  { %5207 = vmatmul.msk.f32.vlgmr.msra.gmra.mxu1 %vm306_vm2, %v4535_v21  ;;  %5209 = vmatmul.msk.f32.vlgmr.msra.gmra.mxu3 %vm306_vm2, %v4535_v21 }
0x15d1   :  { %5210 = vmatmul.msk.f32.vlgmr.msra.gmra.mxu0 %vm306_vm2, %v4502_v40 }
0x15d8   :  { %5211 = vmatmul.msk.f32.vlgmr.msrb.gmra.mxu1 %vm306_vm2, %v4535_v21 }
0x1645   :  { %v4522_v29 = vpop.f32.mrf.mxu0 }
0x164b   :  { %v4575_v1 = vpop.f32.mrf.mxu2 }
0x164c   :  { %v4646_v52 = vrot.slane %v4575_v1, 6 }
0x164d   :  { %v4555_v23 = vpop.f32.mrf.mxu1 }
0x164e   :  { %v4644_v15 = vrot.slane %v4555_v23, 7  ;;  %v4615_v50 = vpop.f32.mrf.mxu0 }
0x164f   :  { %v4652_v36 = vrot.slane %v4615_v50, 4 }
0x1650   :  { %v4645_v53 = vsel %vm4431_vm7, %v4644_v15, %v4522_v29 }
0x1651   :  { %v4648_v4 = vsel %vm4647_vm9, %v4646_v52, %v4645_v53 }
0x1653   :  { %v4595_v51 = vpop.f32.mrf.mxu3 }
0x1654   :  { %v4649_v7 = vrot.slane %v4595_v51, 5 }
0x1655   :  { %v4635_v26 = vpop.f32.mrf.mxu1 }
0x1656   :  { %v4651_v8 = vsel %vm4650_vm10, %v4649_v7, %v4648_v4  ;;  %v4655_v42 = vrot.slane %v4635_v26, 3  ;;  %v4828_v26 = vld [vmem:[%s8501_s10] sm:$0xff]  ;;  %s5747_s10 = smov 32  }
0x1657   :  { %v4654_v47 = vsel %vm4653_vm11, %v4652_v36, %v4651_v8  ;;  %4847 = vmatpush.msrb.mxu0 %v4828_v26 }
0x1658   :  { %v4657_v2 = vsel %vm4656_vm12, %v4655_v42, %v4654_v47  ;;  %v5745_v42 = vmov 1   ;;  %v5746_v47 = vmov 2  }
0x1659   :  { %v4660_v5 = vsel %vm4659_vm13, %v4657_v2, 0.0  ;;  %5516 = vset.pattern.permute.xlu1 %v5745_v42  ;;  %5517 = vset.pattern.permute.xlu0 %v5746_v47  ;;  %v5520_v42 = vld [vmem:[%s8505_s14] ss:$0 sm:$0xff] }
0x165a   :  { %4661 = vadd.xlane.f32.xlu2 %v4660_v5 }
0x16cd   :  { %v4662_v11 = vpop.xlane.xlu2 %4661 }
0x16ce   :  { %v4670_v17 = vmul.f32 %v4669_v39, %v4662_v11 }
0x16d0   :  { %v8403_v6 = vsel %vm306_vm2, %v4657_v2, %v4670_v17 }
0x16d1   :  { %5212 = vmatmul.msk.f32.vlgmr.msra.gmra.mxu2 %vm4676_vm15, %v8403_v6 }
0x1754   :  { %v4697_v56 = vpop.f32.mrf.mxu2 }
0x1755   :  { %v4712_v57 = vmul.f32 %v4697_v56, %v4697_v56  ;;  %4701 = vrot.lane.b32.xlu0 %v4697_v56, %s5727_s27  ;;  %v4740_v28 = vrot.slane %v4697_v56, 4  ;;  %v4731_v9 = vrot.slane %v4697_v56, 2 }
0x1757   :  { %v4714_v32 = vrot.slane %v4712_v57, 2  ;;  %4741 = vrot.lane.b32.xlu1 %v4740_v28, %s5727_s27  ;;  %v4717_v44 = vrot.slane %v4712_v57, 4 }
0x1759   :  { %v4716_v48 = vadd.f32 %v4714_v32, %v4712_v57 }
0x175b   :  { %v4719_v61 = vadd.f32 %v4717_v44, %v4716_v48 }
0x175d   :  { %v4720_v14 = vadd.f32 1e-06, %v4719_v61 }
0x175f   :  { %5693 = vrcp.f32 %v4720_v14 }
0x1765   :  { %v5694_v16 = vpop.eup %5693 }
0x1766   :  { %4725 = vrot.lane.b32.xlu0 %v5694_v16, %s5727_s27 }
0x176e   :  { %4732 = vrot.lane.b32.xlu0 %v4731_v9, %s5727_s27 }
0x17c7   :  { %v4702_v55 = vpop.permute.xlu0 %4701 }
0x17c8   :  { %v4704_v20 = vmul.f32 %v4702_v55, %v4697_v56 }
0x17c9   :  { %v4742_v63 = vpop.permute.xlu1 %4741 }
0x17ca   :  { %v4706_v25 = vrot.slane %v4704_v20, 2  ;;  %v4709_v18 = vrot.slane %v4704_v20, 4 }
0x17cc   :  { %v4708_v41 = vadd.f32 %v4706_v25, %v4704_v20 }
0x17ce   :  { %v4711_v19 = vadd.f32 %v4709_v18, %v4708_v41 }
0x17d0   :  { %v4721_v22 = vmin.f32 %v4711_v19, 0.0 }
0x17d2   :  { %v4722_v45 = vmul.f32 0.8, %v4721_v22 }
0x17d8   :  { %v4726_v43 = vpop.permute.xlu0 %4725 }
0x17d9   :  { %v4728_v62 = vmul.f32 %v4726_v43, %v4722_v45  ;;  %v4909_v43 = vld [vmem:[%s8502_s11 + $0x50] sm:$0xff] }
0x17db   :  { %v4744_v13 = vmul.f32 %v4742_v63, %v4728_v62  ;;  %v4729_v27 = vmul.f32 %v4728_v62, %v4702_v55  ;;  %v4907_v63 = vld [vmem:[%s8502_s11 + $0x40] sm:$0xff] }
0x17dd   :  { %v4746_v60 = vrot.slane %v4744_v13, 4  ;;  %v4730_v35 = vsub.f32 %v4697_v56, %v4729_v27  ;;  %v4906_v13 = vld [vmem:[%s8502_s11 + $0x38] sm:$0xff]  ;;  %v4904_v27 = vld [vmem:[%s8502_s11 + $0x28] sm:$0xff] }
0x17df   :  { %v4748_v21 = vsub.f32 %v4697_v56, %v4746_v60  ;;  %v4902_v60 = vld [vmem:[%s8502_s11 + $0x18] sm:$0xff] }
0x17e0   :  { %v4733_v59 = vpop.permute.xlu0 %4732 }
0x17e1   :  { %v4735_v40 = vmul.f32 %v4733_v59, %v4728_v62  ;;  %v4908_v62 = vld [vmem:[%s8502_s11 + $0x48] sm:$0xff]  ;;  %v4905_v59 = vld [vmem:[%s8502_s11 + $0x30] sm:$0xff] }
0x17e3   :  { %v4737_v3 = vrot.slane %v4735_v40, 6  ;;  %v4903_v40 = vld [vmem:[%s8502_s11 + $0x20] sm:$0xff] }
0x17e5   :  { %v4739_v10 = vsub.f32 %v4697_v56, %v4737_v3  ;;  %v4901_v3 = vld [vmem:[%s8502_s11 + $0x10] sm:$0xff] }
0x17e7   :  { %v4750_v31 = vsel %vm4749_vm1, %v4730_v35, %v4739_v10  ;;  %v4900_v35 = vld [vmem:[%s8502_s11 + $0x8] sm:$0xff]  ;;  %v4899_v10 = vld [vmem:[%s8502_s11] sm:$0xff] }
0x17e8   :  { %v4751_v12 = vsel %vm101_vm0, %v4750_v31, %v4748_v21 }
0x17e9   :  { %5213 = vmatmul.msk.f32.vlgmr.msrb.gmra.mxu3 %vm306_vm2, %v4751_v12  ;;  %vm4947_vm2 = vcmask 195584  }
0x186c   :  { %v4774_v29 = vpop.f32.mrf.mxu3 }
0x186d   :  { %v4789_v23 = vmul.f32 %v4774_v29, %v4774_v29  ;;  %4778 = vrot.lane.b32.xlu0 %v4774_v29, %s5730_s18  ;;  %v4808_v15 = vrot.slane %v4774_v29, 2  ;;  %v4817_v36 = vrot.slane %v4774_v29, 4 }
0x186f   :  { %v4791_v1 = vrot.slane %v4789_v23, 2  ;;  %4809 = vrot.lane.b32.xlu2 %v4808_v15, %s5730_s18  ;;  %v4794_v50 = vrot.slane %v4789_v23, 4 }
0x1871   :  { %v4793_v53 = vadd.f32 %v4791_v1, %v4789_v23 }
0x1873   :  { %v4796_v52 = vadd.f32 %v4794_v50, %v4793_v53 }
0x1875   :  { %v4797_v51 = vadd.f32 1e-06, %v4796_v52 }
0x1877   :  { %5695 = vrcp.f32 %v4797_v51  ;;  %v4942_v51 = vld [vmem:[%s8504_s13 + $0x10] sm:$0xff] }
0x1878   :  { %4964 = vmatpush.msrb.mxu2 %v4942_v51 }
0x187d   :  { %v5696_v7 = vpop.eup %5695 }
0x187e   :  { %4802 = vrot.lane.b32.xlu0 %v5696_v7, %s5730_s18  ;;  %v4940_v7 = vld [vmem:[%s8504_s13] sm:$0xff] }
0x1886   :  { %4818 = vrot.lane.b32.xlu0 %v4817_v36, %s5730_s18  ;;  %v5519_v36 = vld [vmem:[%s8503_s12] ss:$0 sm:$0xff] }
0x18c9   :  { %v4810_v37 = vpop.permute.xlu2 %4809 }
0x18df   :  { %v4779_v4 = vpop.permute.xlu0 %4778 }
0x18e0   :  { %v4781_v8 = vmul.f32 %v4779_v4, %v4774_v29 }
0x18e2   :  { %v4783_v2 = vrot.slane %v4781_v8, 2  ;;  %v4786_v46 = vrot.slane %v4781_v8, 4 }
0x18e4   :  { %v4785_v5 = vadd.f32 %v4783_v2, %v4781_v8 }
0x18e6   :  { %v4788_v30 = vadd.f32 %v4786_v46, %v4785_v5 }
0x18e8   :  { %v4798_v33 = vmin.f32 %v4788_v30, 0.0 }
0x18ea   :  { %v4799_v49 = vmul.f32 0.8, %v4798_v33 }
0x18f0   :  { %v4803_v0 = vpop.permute.xlu0 %4802 }
0x18f1   :  { %v4805_v38 = vmul.f32 %v4803_v0, %v4799_v49 }
0x18f3   :  { %v4812_v58 = vmul.f32 %v4810_v37, %v4805_v38  ;;  %v4806_v11 = vmul.f32 %v4805_v38, %v4779_v4 }
0x18f5   :  { %v4814_v39 = vrot.slane %v4812_v58, 6  ;;  %v4807_v32 = vsub.f32 %v4774_v29, %v4806_v11 }
0x18f7   :  { %v4816_v57 = vsub.f32 %v4774_v29, %v4814_v39 }
0x18f8   :  { %v4819_v17 = vpop.permute.xlu0 %4818 }
0x18f9   :  { %v4821_v56 = vmul.f32 %v4819_v17, %v4805_v38  ;;  %v4826_v44 = vsel %vm4749_vm1, %v4807_v32, %v4816_v57 }
0x18fb   :  { %v4823_v28 = vrot.slane %v4821_v56, 4 }
0x18fd   :  { %v4825_v48 = vsub.f32 %v4774_v29, %v4823_v28 }
0x18ff   :  { %v4827_v61 = vsel %vm101_vm0, %v4826_v44, %v4825_v48  ;;  %vm4915_vm0 = vcmask 785408  }
0x1900   :  { %5214 = vmatmul.msk.f32.vlgmr.msrb.gmra.mxu0 %vm432_vm4, %v4827_v61 }
0x197d   :  { %v4849_v14 = vpop.f32.mrf.mxu0 }
0x197e   :  { %4878 = vperm.xlu0 %5517, %v4849_v14   ;;  %4866 = vperm.xlu1 %5516, %v4849_v14  }
0x1986   :  { %5518 = vset.pattern.permute.xlu1 %v5743_v34  ;;  %v4910_v34 = vld [vmem:[%s8502_s11 + $0x58] sm:$0xff] }
0x1987   :  { %4854 = vperm.xlu1 %5518, %v4849_v14   ;;  %4923 = vmatpush.msra.mxu1 %v4910_v34 }
0x1989   :  { %4924 = vmatpush.msra.mxu1 %v4909_v43 }
0x198b   :  { %4925 = vmatpush.msra.mxu1 %v4908_v62 }
0x198d   :  { %4926 = vmatpush.msra.mxu1 %v4907_v63 }
0x198f   :  { %4927 = vmatpush.msra.mxu1 %v4906_v13 }
0x1991   :  { %4928 = vmatpush.msra.mxu1 %v4905_v59 }
0x1993   :  { %4929 = vmatpush.msra.mxu1 %v4904_v27 }
0x1995   :  { %4930 = vmatpush.msra.mxu1 %v4903_v40 }
0x1997   :  { %4931 = vmatpush.msra.mxu1 %v4902_v60 }
0x1999   :  { %4932 = vmatpush.msra.mxu1 %v4901_v3 }
0x199b   :  { %4933 = vmatpush.msra.mxu1 %v4900_v35 }
0x199d   :  { %4934 = vmatpush.msra.mxu1 %v4899_v10 }
0x19f0   :  { %v4879_v16 = vpop.permute.xlu0 %4878  ;;  %v4867_v9 = vpop.permute.xlu1 %4866 }
0x19f1   :  { %v4881_v55 = vmul.f32 %v4879_v16, %v8403_v6  ;;  %v4869_v54 = vmul.f32 %v4867_v9, %v8403_v6 }
0x19f3   :  { %v4883_v24 = vrot.slane %v4881_v55, 2  ;;  %v4871_v20 = vrot.slane %v4869_v54, 2  ;;  %v4886_v41 = vrot.slane %v4881_v55, 4  ;;  %v4874_v19 = vrot.slane %v4869_v54, 4 }
0x19f5   :  { %v4885_v25 = vadd.f32 %v4883_v24, %v4881_v55  ;;  %v4873_v18 = vadd.f32 %v4871_v20, %v4869_v54 }
0x19f7   :  { %v4888_v22 = vadd.f32 %v4886_v41, %v4885_v25  ;;  %v4876_v45 = vadd.f32 %v4874_v19, %v4873_v18 }
0x19f9   :  { %4894 = vrot.lane.b32.xlu2 %v4888_v22, %s8574_s3  ;;  %4890 = vrot.lane.b32.xlu1 %v4876_v45, %s5747_s10  ;;  %v4855_v21 = vpop.permute.xlu1 %4854  ;;  %s4978_s3 = sshll.u32 %s5748_s22, 4  ;;  %s4979_s3 = int_to_ptr.vmem [resolvable:$true] %s4978_s3 }
0x19fa   :  { %v4857_v31 = vmul.f32 %v4855_v21, %v8403_v6  ;;  %v4941_v6 = vld [vmem:[%s8504_s13 + $0x8] sm:$0xff]  ;;  %s4980_s13 = sshll.u32 %s8506_s15, 4  ;;  %s4981_s13 = int_to_ptr.hbm [resolvable:$true] %s4980_s13 }
0x19fb   :  { %4965 = vmatpush.msrb.mxu2 %v4941_v6 }
0x19fc   :  { %v4859_v12 = vrot.slane %v4857_v31, 2  ;;  %v4862_v23 = vrot.slane %v4857_v31, 4 }
0x19fd   :  { %4966 = vmatpush.msrb.mxu2 %v4940_v7 }
0x19fe   :  { %v4861_v29 = vadd.f32 %v4859_v12, %v4857_v31 }
0x1a00   :  { %v4864_v15 = vadd.f32 %v4862_v23, %v4861_v29 }
0x1a53   :  { %v4895_v53 = vpop.permute.xlu2 %4894 }
0x1a6b   :  { %v4891_v1 = vpop.permute.xlu1 %4890 }
0x1a6c   :  { %v4897_v50 = vsel %vm4676_vm15, %v4864_v15, %v4891_v1 }
0x1a6d   :  { %v4898_v52 = vsel %vm1869_vm5, %v4897_v50, %v4895_v53 }
0x1a6e   :  { %5215 = vmatmul.msk.f32.vlgmr.msra.gmra.mxu1 %vm4915_vm0, %v4898_v52 }
0x1aeb   :  { %v4936_v4 = vpop.f32.mrf.mxu1 }
0x1aec   :  { %v4937_v26 = vadd.f32 %v5519_v36, %v4936_v4 }
0x1aee   :  { %v4939_v8 = vmax.f32 %v4937_v26, 0.0 }
0x1af0   :  { %5216 = vmatmul.msk.f32.vlgmr.msrb.gmra.mxu2 %vm4947_vm2, %v4939_v8 }
0x1b73   :  { %v4968_v47 = vpop.f32.mrf.mxu2 }
0x1b74   :  { %v4969_v2 = vadd.f32 %v5520_v42, %v4968_v47 }
0x1b76   :  { %4972 = vst.msk [vmem:[#allocation2] sm:$0x3] %vm4971_vm3, %v4969_v2 }
0x1b77   :  { %4983 = dma.vmem_to_hbm [thread:$0]  %s4979_s3, 32, %s4981_s13, [#allocation3]  }
0x1b78   :  { %5725 = dma.done.wait [#allocation3], 32  }
0x1b79   :  { %5726 = vsyncadd [#allocation3], 4294967264 }
0x1b7a   :  { %4988 = vsyncpa [#allocation3], 1 }

</bundles_post_ra>
